<compile_context>
chip_gen: v5e
topology: v5e:2x2
jax: 0.10.0
libtpu: 0.0.40
codegen_flags: <defaults>
</compile_context>

<pallas_src>
import jax
import jax.numpy as jnp
from jax.experimental import pallas as pl
from jax.experimental.pallas import tpu as pltpu


def _round_up(x: int, m: int) -> int:
    return (x + m - 1) // m * m


def _vmem_capacity_bytes() -> int:
    """Generation-aware VMEM capacity; conservative 64 MiB (v7x per-core) fallback."""
    try:
        info = pltpu.get_tpu_info()
        cap = getattr(info, "vmem_capacity_bytes", None)
        if cap:
            return int(cap)
    except Exception:
        pass
    return 64 * 1024 * 1024


def _vq_kernel(x_ref, wt_ref, bias_ref, idx_ref, max_sc, arg_sc):
    # x_ref:    (TN, D)   streamed tile of flattened inputs (stream dtype)
    # wt_ref:   (D, KB)   codebook K-block, pre-transposed (stream dtype)
    # bias_ref: (1, KB)   -0.5*||w_k||^2 (f32); -inf on padded columns
    # idx_ref:  (1, TN)   nearest-codebook indices (int32), lane-dense
    # max_sc:   (TN, 1)   running best score (f32)     [scratch]
    # arg_sc:   (TN, 1)   running best index (int32)   [scratch]
    k = pl.program_id(1)
    kb = bias_ref.shape[-1]

    @pl.when(k == 0)
    def _init():
        max_sc[...] = jnp.full(max_sc.shape, -jnp.inf, jnp.float32)
        arg_sc[...] = jnp.zeros(arg_sc.shape, jnp.int32)

    # MXU: (TN, D) @ (D, KB) with f32 accumulation; tiny f32 epilogue.
    score = jnp.dot(x_ref[...], wt_ref[...], preferred_element_type=jnp.float32)
    score = score + bias_ref[...]

    # Block-local max + first-occurrence argmax via iota/min (no full-K argmax,
    # stays in vregs; padded columns are -inf and never selected).
    local_max = jnp.max(score, axis=1, keepdims=True)                     # (TN, 1)
    col_ids = jax.lax.broadcasted_iota(jnp.int32, score.shape, 1) + k * kb
    local_arg = jnp.min(jnp.where(score == local_max, col_ids, jnp.int32(2 ** 30)),
                        axis=1, keepdims=True)                            # (TN, 1)

    # Cross-block running (max, arg); strict '>' keeps first occurrence on ties.
    better = local_max > max_sc[...]
    arg_sc[...] = jnp.where(better, local_arg, arg_sc[...])
    max_sc[...] = jnp.where(better, local_max, max_sc[...])

    @pl.when(k == pl.num_programs(1) - 1)
    def _finalize():
        # One sublane->lane relayout per row tile (not per K block).
        idx_ref[0, :] = arg_sc[...][:, 0]


def prepare_codebook(codebook: jax.Array,
                     compute_dtype=jnp.bfloat16,
                     k_block: int = 512):
    """One-time codebook preprocessing: (D, K_pad) transpose, f32 norm bias, K pad."""
    assert k_block % 128 == 0
    K, D = codebook.shape
    w32 = codebook.astype(jnp.float32)

    k_pad = _round_up(K, 128)
    kb = k_pad if k_pad <= k_block else k_block
    k_pad = _round_up(K, kb)

    w_t = jnp.zeros((D, k_pad), compute_dtype).at[:, :K].set(
        w32.T.astype(compute_dtype))
    bias = jnp.full((1, k_pad), -jnp.inf, jnp.float32)
    bias = bias.at[0, :K].set(-0.5 * jnp.sum(w32 * w32, axis=1))
    return w_t, bias, kb


def _vq_lookup(z_e_x: jax.Array, w_t: jax.Array, bias: jax.Array,
               K: int, kb: int, *, compute_dtype=jnp.bfloat16,
               tile_n: int = 1024) -> jax.Array:
    *lead, D = z_e_x.shape
    D_w, k_pad = w_t.shape
    assert D == D_w, "embedding dim mismatch"
    k_blocks = k_pad // kb

    x_flat = z_e_x.reshape(-1, D).astype(compute_dtype)
    N = x_flat.shape[0]

    x_item = jnp.dtype(compute_dtype).itemsize
    w_item = jnp.dtype(w_t.dtype).itemsize

    cap = _vmem_capacity_bytes()
    budget = int(0.70 * cap)

    # Row tile: as large as requested, but (a) split so the "parallel" row axis
    # has >= 2 steps when N allows (both TCs on v7x), and (b) K-aware so the
    # double-buffered inputs + (tile, kb) f32 score fit comfortably in VMEM.
    tile = min(_round_up(max(tile_n, 256), 256), _round_up(max(N, 1), 256))
    if N > 256:
        tile = min(tile, _round_up((N + 1) // 2, 256))

    def footprint(t: int) -> int:
        return (2 * t * D * x_item             # double-buffered x tiles
                + 2 * D * kb * w_item          # double-buffered codebook block
                + 2 * 8 * kb * 4               # bias block (sublane-padded)
                + 2 * 8 * max(t, 128) * 4      # int32 output block
                + 2 * t * kb * 4               # f32 score + epilogue temps
                + 2 * t * 128 * 4)             # (tile,1) running max/arg scratch

    while tile > 256 and footprint(tile) > budget:
        tile = _round_up(tile // 2, 256)

    n_pad = _round_up(N, tile)
    if n_pad != N:
        x_flat = jnp.pad(x_flat, ((0, n_pad - N), (0, 0)))
    grid = (n_pad // tile, k_blocks)

    vmem_limit = int(min(max(2 * footprint(tile), 32 * 1024 * 1024),
                         int(0.90 * cap)))

    cost = pl.CostEstimate(
        flops=2 * n_pad * D * k_pad,
        transcendentals=0,
        bytes_accessed=(n_pad * D * x_item
                        + (n_pad // tile) * D * k_pad * w_item
                        + k_pad * 4 + n_pad * 4))

    idx = pl.pallas_call(
        _vq_kernel,
        out_shape=jax.ShapeDtypeStruct((1, n_pad), jnp.int32),
        grid_spec=pltpu.PrefetchScalarGridSpec(
            num_scalar_prefetch=0,
            grid=grid,
            in_specs=[
                pl.BlockSpec((tile, D), lambda i, k: (i, 0)),   # streamed x rows
                pl.BlockSpec((D, kb), lambda i, k: (0, k)),     # codebook K-block
                pl.BlockSpec((1, kb), lambda i, k: (0, k)),     # bias K-block
            ],
            out_specs=pl.BlockSpec((1, tile), lambda i, k: (0, i)),
            scratch_shapes=[
                pltpu.VMEM((tile, 1), jnp.float32),   # running best score
                pltpu.VMEM((tile, 1), jnp.int32),     # running best index
            ]),
        compiler_params=pltpu.CompilerParams(
            dimension_semantics=("parallel", "arbitrary"),
            vmem_limit_bytes=vmem_limit),
        cost_estimate=cost,
    )(x_flat, w_t, bias)

    return idx.reshape(-1)[:N].reshape(*lead)


def vq_embedding_forward(z_e_x: jax.Array, codebook: jax.Array, *,
                         compute_dtype=jnp.bfloat16, tile_n: int = 1024,
                         k_block: int = 512) -> jax.Array:
    """Standalone helper: preprocess codebook + run the lookup kernel."""
    w_t, bias, kb = prepare_codebook(codebook, compute_dtype, k_block)
    return _vq_lookup(z_e_x, w_t, bias, codebook.shape[0], kb,
                      compute_dtype=compute_dtype, tile_n=tile_n)


class VQEmbeddingPallas:
    """JAX/Pallas port of VQEmbedding (forward pass = vq -> indices)."""

    def __init__(self, K: int, D: int, key: jax.Array, *,
                 compute_dtype=jnp.bfloat16, k_block: int = 512):
        self.K, self.D = K, D
        self.compute_dtype = compute_dtype
        # matches: self.embedding.weight.data.uniform_(-1/K, 1/K)
        self.weight = jax.random.uniform(
            key, (K, D), dtype=jnp.float32, minval=-1.0 / K, maxval=1.0 / K)
        # Codebook preprocessing hoisted out of the per-call path (cached).
        self._wt, self._bias, self._kb = prepare_codebook(
            self.weight, compute_dtype, k_block)

    def forward(self, z_e_x: jax.Array, tile_n: int = 1024) -> jax.Array:
        return _vq_lookup(z_e_x, self._wt, self._bias, self.K, self._kb,
                          compute_dtype=self.compute_dtype, tile_n=tile_n)

    # TODO(synk): straight_through (vq_st custom backward + index_select) is a
    # training-time path; only the forward `vq` hot path is kernelized.


# ----------------------------- reference / checks -----------------------------

def _reference_indices(z_e_x, codebook):
    D = z_e_x.shape[-1]
    x = z_e_x.reshape(-1, D).astype(jnp.float32)
    w = codebook.astype(jnp.float32)
    d = (jnp.sum(x * x, 1, keepdims=True) + jnp.sum(w * w, 1)[None, :]
         - 2.0 * x @ w.T)
    return jnp.argmin(d, axis=1).astype(jnp.int32)


def _assert_near_optimal(idx, z_e_x, codebook, atol):
    """Kernel indices must be within `atol` of the optimal squared distance
    (covers bf16-streaming near-tie flips)."""
    D = z_e_x.shape[-1]
    flat = idx.reshape(-1).astype(jnp.int32)
    assert bool(jnp.all(flat >= 0)) and bool(jnp.all(flat < codebook.shape[0]))
    x = z_e_x.reshape(-1, D).astype(jnp.float32)
    w = codebook.astype(jnp.float32)
    d = (jnp.sum(x * x, 1, keepdims=True) + jnp.sum(w * w, 1)[None, :]
         - 2.0 * x @ w.T)
    best = jnp.min(d, axis=1)
    picked = jnp.take_along_axis(d, flat[:, None], axis=1)[:, 0]
    gap = float(jnp.max(picked - best))
    assert gap <= atol, f"distance gap {gap} > {atol}"


if __name__ == "__main__":
    key = jax.random.PRNGKey(0)
    k_w, k_x = jax.random.split(key)

    K, D = 32, 64               # codebook size, embedding dim
    B, H, W = 2, 15, 16         # (B, H, W, D); N = 480 rows (padding + 2-row-tile grid)

    module = VQEmbeddingPallas(K, D, k_w)          # default bf16 streaming
    z_e_x = jax.random.normal(k_x, (B, H, W, D), dtype=jnp.float32)

    ref = _reference_indices(z_e_x, module.weight).reshape(B, H, W)

    # 1) f32 streaming path: matches the full-distance argmin reference exactly.
    lat_f32 = jax.block_until_ready(
        vq_embedding_forward(z_e_x, module.weight, compute_dtype=jnp.float32))
    assert lat_f32.shape == (B, H, W)
    assert lat_f32.dtype == jnp.int32
    assert bool(jnp.all(lat_f32 == ref))

    # 2) default bf16 streaming (HBM-roofline win): near-tie tolerance check.
    lat_bf16 = jax.block_until_ready(module.forward(z_e_x))
    assert lat_bf16.shape == (B, H, W)
    assert lat_bf16.dtype == jnp.int32
    _assert_near_optimal(lat_bf16, z_e_x, module.weight, atol=5e-2)

    # 3) larger codebook -> multi-block K reduction (grid axis 1 has 2 steps).
    k_w2, _ = jax.random.split(jax.random.PRNGKey(1))
    K2 = 1000
    w2 = jax.random.uniform(k_w2, (K2, D), dtype=jnp.float32,
                            minval=-1.0 / K2, maxval=1.0 / K2)
    lat_big = jax.block_until_ready(
        vq_embedding_forward(z_e_x, w2, tile_n=256, k_block=512))
    assert lat_big.shape == (B, H, W)
    _assert_near_optimal(lat_big, z_e_x, w2, atol=5e-2)

    print("KERNEL_OK")
</pallas_src>

<mosaic_0001>
module attributes {stable_mosaic.version = 11 : i64} {
  func.func @_vq_kernel(%arg0: i32, %arg1: i32, %arg2: memref<256x64xf32, #tpu.memory_space<vmem>>, %arg3: memref<64x128xf32, #tpu.memory_space<vmem>>, %arg4: memref<1x128xf32, #tpu.memory_space<vmem>>, %arg5: memref<1x256xi32, #tpu.memory_space<vmem>>, %arg6: memref<256x1xf32, #tpu.memory_space<vmem>>, %arg7: memref<256x1xi32, #tpu.memory_space<vmem>>) attributes {dimension_semantics = [#tpu.dimension_semantics<parallel>, #tpu.dimension_semantics<arbitrary>], iteration_bounds = array<i64: 2, 1>, scalar_prefetch = 0 : i64, scratch_operands = 2 : i64, tpu.core_type = #tpu.core_type<tc>, window_params = [{transform_indices = @transform_0, window_bounds = array<i64: 256, 64>}, {transform_indices = @transform_1, window_bounds = array<i64: 64, 128>}, {transform_indices = @transform_2, window_bounds = array<i64: 1, 128>}, {transform_indices = @transform_3, window_bounds = array<i64: 1, 256>}]} {
    %c0_i32 = arith.constant 0 : i32
    %0 = arith.cmpi eq, %arg1, %c0_i32 : i32
    %1 = arith.extui %0 : i1 to i32
    %c0_i32_0 = arith.constant 0 : i32
    %2 = arith.cmpi ne, %1, %c0_i32_0 : i32
    scf.if %2 {
      %cst_20 = arith.constant 0xFF800000 : f32
      %32 = vector.broadcast %cst_20 : f32 to vector<256x1xf32>
      %c0_21 = arith.constant 0 : index
      %c0_22 = arith.constant 0 : index
      %33 = vector.load %arg6[%c0_21, %c0_22] : memref<256x1xf32, #tpu.memory_space<vmem>>, vector<256x1xf32>
      tpu.vector_store %arg6[%c0_21, %c0_22], %32 {strides = array<i32>} : memref<256x1xf32, #tpu.memory_space<vmem>>, vector<256x1xf32>,
      %c0_i32_23 = arith.constant 0 : i32
      %34 = vector.broadcast %c0_i32_23 : i32 to vector<256x1xi32>
      %c0_24 = arith.constant 0 : index
      %c0_25 = arith.constant 0 : index
      %35 = vector.load %arg7[%c0_24, %c0_25] : memref<256x1xi32, #tpu.memory_space<vmem>>, vector<256x1xi32>
      tpu.vector_store %arg7[%c0_24, %c0_25], %34 {strides = array<i32>} : memref<256x1xi32, #tpu.memory_space<vmem>>, vector<256x1xi32>,
    } else {
    }
    %c0 = arith.constant 0 : index
    %c0_1 = arith.constant 0 : index
    %3 = vector.load %arg2[%c0, %c0_1] : memref<256x64xf32, #tpu.memory_space<vmem>>, vector<256x64xf32>
    %c0_2 = arith.constant 0 : index
    %c0_3 = arith.constant 0 : index
    %4 = vector.load %arg3[%c0_2, %c0_3] : memref<64x128xf32, #tpu.memory_space<vmem>>, vector<64x128xf32>
    %cst = arith.constant dense<0.000000e+00> : vector<256x128xf32>
    %5 = tpu.matmul %3, %4, %cst {dimension_numbers = #tpu.dot_dimension_numbers<[1], [0], [0], [1], [0, 0, 1, 1], [], []>} : vector<256x64xf32>, vector<64x128xf32>, vector<256x128xf32> -> vector<256x128xf32>
    %c0_4 = arith.constant 0 : index
    %c0_5 = arith.constant 0 : index
    %6 = vector.load %arg4[%c0_4, %c0_5] : memref<1x128xf32, #tpu.memory_space<vmem>>, vector<1x128xf32>
    %7 = vector.broadcast %6 : vector<1x128xf32> to vector<256x128xf32>
    %8 = arith.addf %5, %7 : vector<256x128xf32>
    %cst_6 = arith.constant dense<0xFF800000> : vector<256xf32>
    %9 = vector.multi_reduction <maximumf>, %8, %cst_6 [1] : vector<256x128xf32> to vector<256xf32>
    %10 = vector.shape_cast %9 : vector<256xf32> to vector<256x1xf32>
    %11 = tpu.iota {dimensions = array<i32: 1>} : vector<256x128xi32>
    %c128_i32 = arith.constant 128 : i32
    %12 = arith.muli %arg1, %c128_i32 : i32
    %13 = vector.broadcast %12 : i32 to vector<256x128xi32>
    %14 = arith.addi %11, %13 : vector<256x128xi32>
    %15 = vector.broadcast %10 : vector<256x1xf32> to vector<256x128xf32>
    %16 = arith.cmpf oeq, %8, %15 : vector<256x128xf32>
    %c1073741824_i32 = arith.constant 1073741824 : i32
    %17 = vector.broadcast %c1073741824_i32 : i32 to vector<256x128xi32>
    %18 = arith.select %16, %14, %17 : vector<256x128xi1>, vector<256x128xi32>
    %cst_7 = arith.constant dense<2147483647> : vector<256xi32>
    %19 = vector.multi_reduction <minsi>, %18, %cst_7 [1] : vector<256x128xi32> to vector<256xi32>
    %20 = vector.shape_cast %19 : vector<256xi32> to vector<256x1xi32>
    %c0_8 = arith.constant 0 : index
    %c0_9 = arith.constant 0 : index
    %21 = vector.load %arg6[%c0_8, %c0_9] : memref<256x1xf32, #tpu.memory_space<vmem>>, vector<256x1xf32>
    %22 = arith.cmpf ogt, %10, %21 : vector<256x1xf32>
    %c0_10 = arith.constant 0 : index
    %c0_11 = arith.constant 0 : index
    %23 = vector.load %arg7[%c0_10, %c0_11] : memref<256x1xi32, #tpu.memory_space<vmem>>, vector<256x1xi32>
    %24 = arith.select %22, %20, %23 : vector<256x1xi1>, vector<256x1xi32>
    %c0_12 = arith.constant 0 : index
    %c0_13 = arith.constant 0 : index
    %25 = vector.load %arg7[%c0_12, %c0_13] : memref<256x1xi32, #tpu.memory_space<vmem>>, vector<256x1xi32>
    tpu.vector_store %arg7[%c0_12, %c0_13], %24 {strides = array<i32>} : memref<256x1xi32, #tpu.memory_space<vmem>>, vector<256x1xi32>,
    %c0_14 = arith.constant 0 : index
    %c0_15 = arith.constant 0 : index
    %26 = vector.load %arg6[%c0_14, %c0_15] : memref<256x1xf32, #tpu.memory_space<vmem>>, vector<256x1xf32>
    %27 = arith.select %22, %10, %26 : vector<256x1xi1>, vector<256x1xf32>
    %c0_16 = arith.constant 0 : index
    %c0_17 = arith.constant 0 : index
    %28 = vector.load %arg6[%c0_16, %c0_17] : memref<256x1xf32, #tpu.memory_space<vmem>>, vector<256x1xf32>
    tpu.vector_store %arg6[%c0_16, %c0_17], %27 {strides = array<i32>} : memref<256x1xf32, #tpu.memory_space<vmem>>, vector<256x1xf32>,
    %c0_i32_18 = arith.constant 0 : i32
    %29 = arith.cmpi eq, %arg1, %c0_i32_18 : i32
    %30 = arith.extui %29 : i1 to i32
    %c0_i32_19 = arith.constant 0 : i32
    %31 = arith.cmpi ne, %30, %c0_i32_19 : i32
    scf.if %31 {
      %c0_20 = arith.constant 0 : index
      %c0_21 = arith.constant 0 : index
      %32 = vector.load %arg7[%c0_20, %c0_21] : memref<256x1xi32, #tpu.memory_space<vmem>>, vector<256x1xi32>
      %33 = vector.shape_cast %32 : vector<256x1xi32> to vector<256xi32>
      %c0_22 = arith.constant 0 : index
      %c0_23 = arith.constant 0 : index
      %34 = vector.load %arg5[%c0_22, %c0_23] : memref<1x256xi32, #tpu.memory_space<vmem>>, vector<1x256xi32>
      %35 = vector.shape_cast %34 : vector<1x256xi32> to vector<256xi32>
      %36 = vector.shape_cast %33 : vector<256xi32> to vector<1x256xi32>
      tpu.vector_store %arg5[%c0_22, %c0_23], %36 {strides = array<i32>} : memref<1x256xi32, #tpu.memory_space<vmem>>, vector<1x256xi32>,
    } else {
    }
    return
  }
  func.func @transform_0(%arg0: i32, %arg1: i32) -> (i32, i32) {
    %c0_i32 = arith.constant 0 : i32
    %c0_i32_0 = arith.constant 0 : i32
    return %arg0, %c0_i32 : i32, i32
  }
  func.func @transform_1(%arg0: i32, %arg1: i32) -> (i32, i32) {
    %c0_i32 = arith.constant 0 : i32
    %c0_i32_0 = arith.constant 0 : i32
    return %c0_i32, %arg1 : i32, i32
  }
  func.func @transform_2(%arg0: i32, %arg1: i32) -> (i32, i32) {
    %c0_i32 = arith.constant 0 : i32
    %c0_i32_0 = arith.constant 0 : i32
    return %c0_i32, %arg1 : i32, i32
  }
  func.func @transform_3(%arg0: i32, %arg1: i32) -> (i32, i32) {
    %c0_i32 = arith.constant 0 : i32
    %c0_i32_0 = arith.constant 0 : i32
    return %c0_i32, %arg0 : i32, i32
  }
}

</mosaic_0001>

<bundles_post_ra>
// kernel: tpu_custom_call.1
= control target key start
LH: loop header
LB: loop body
LE: loop exit
PB: predicated region body
PF: predicated region fallthrough
CT: control target
= control target key end

     0   :  { %8 = vsyncpa [#allocation5], 0  ;;  %s3857_s0 = inlined_call_operand.vmem [shape: f32[512,64], index: 0, kind: input, shape index: {}]   ;;  %s3858_s1 = inlined_call_operand.vmem [shape: f32[64,128], index: 1, kind: input, shape index: {}]   ;;  %s3859_s2 = inlined_call_operand.vmem [shape: f32[1,128], index: 2, kind: input, shape index: {}]   ;;  %s3860_s3 = inlined_call_operand.hbm [shape: s32[1,512], index: 3, kind: output, shape index: {}]  }
   0x1   :  { %10 = vsyncpa [#allocation5 + $0x1], 0  ;;  %s2469_s12 = smov 0   ;;  %s2471_s13 = smov 0  }
   0x2   :  { %s2473_s14 = smov 0   ;;  %s2475_s15 = smov 0  }
   0x3   :  { %s2477_s16 = smov 0   ;;  %s2479_s17 = smov 0  }
   0x4 LB: > { %s2236_s18 = sadd.s32 4294967295, %s2445_s17   ;;  %s2237_s19 = sadd.s32 4294967294, %s2445_s17   ;;  %s2445_s17 = sphi %s2479_s17, %s16_s17   ;;  %s2441_s16 = sphi %s2477_s16, %s4077_s16   ;;  %s2437_s15 = sphi %s2475_s15, %s4076_s15   ;;  %s2433_s14 = sphi %s2473_s14, %s4075_s14   ;;  %s2429_s13 = sphi %s2471_s13, %s4074_s13   ;;  %s2425_s12 = sphi %s2469_s12, %s4073_s12  }
   0x5   : > { %s28_s20 = sadd.s32 1, %s2441_s16  ;;  %s113_s21 = sadd.s32 1, %s2433_s14 }
   0x6   : > { %p30_p0 = scmp.ge.s32.totalorder %s28_s20, 2  ;;  %p123_p1 = scmp.ne.s32.totalorder %s2433_s14, %s2429_s13 }
   0x7   : > { %p124_p2 = scmp.eq.s32.totalorder %s2236_s18, 1  ;;  %p129_p3 = scmp.ne.s32.totalorder %s2429_s13, %s2425_s12 }
   0x8   : > { %s4079_s20 = smov (%p30_p0, %s28_s20), 0  ;;  %p130_p5 = scmp.eq.s32.totalorder %s2237_s19, 1 }
   0x9   : > { %p2509_p4 = por %p124_p2, %p123_p1  ;;  %s110_s23 = ssub.s32 %s2441_s16, %s4079_s20 }
   0xa   : > { %p2242_p6 = scmp.ge.s32.totalorder %s2445_s17, 1  ;;  %p111_p7 = scmp.eq.s32.totalorder %s110_s23, 0 }
   0xb   : > { %p2516_p8 = por %p130_p5, %p129_p3  ;;  %p170_p9 = scmp.lt.s32.totalorder %s2445_s17, 3 }
   0xc   : > { %s2522_s25 = scalar_select %p111_p7, %s2433_s14, %s113_s21  }
   0xd   : > { %p171_p10 = pnand %p2242_p6, %p170_p9 }
   0xf   : > { %174 = sbr.rel (%p171_p10) target bundleno = 2241 (0x8c1), region = 32 }
  0x14   : > { %v323_v0 = vld [vmem:[%s3858_s1 + $0x38] sm:$0xff]  ;;  %v322_v1 = vld [vmem:[%s3858_s1 + $0x30] sm:$0xff]  ;;  %s2244_s30 = sshll.u32 %s2437_s15, 5  ;;  %v321_v2 = vld [vmem:[%s3858_s1 + $0x28] sm:$0xff]  ;;  %vm328_vm0 = vcmask 523264   ;;  %vm219_vm1 = vcmask 7168  }
  0x15   : > { %433 = vmatpush.msra.mxu0 %v323_v0  ;;  %2282 = vmatpush.msra.mxu1 %v323_v0  ;;  %p202_p11 = scmp.lt.s32.totalorder %s2244_s30, 63  ;;  %v320_v3 = vld [vmem:[%s3858_s1 + $0x20] sm:$0xff]  ;;  %v319_v4 = vld [vmem:[%s3858_s1 + $0x18] sm:$0xff]  ;;  %v318_v5 = vld [vmem:[%s3858_s1 + $0x10] sm:$0xff]  ;;  %s198_s5 = sand.u32 1, %s2429_s13  }
  0x16   : > { %2283 = vmatpush.msra.mxu2 %v323_v0  ;;  %2284 = vmatpush.msra.mxu3 %v323_v0  ;;  %v317_v6 = vld [vmem:[%s3858_s1 + $0x8] sm:$0xff]  ;;  %v316_v7 = vld [vmem:[%s3858_s1] sm:$0xff]  ;;  %s3811_s6 = sshll.u32 %s198_s5, 1  ;;  %s2279_s7 = sshll.u32 %s2437_s15, 1 }
  0x17   : > { %434 = vmatpush.msra.mxu0 %v322_v1  ;;  %2285 = vmatpush.msra.mxu1 %v322_v1  ;;  %s4081_s30 = smov (!%p202_p11, %s2244_s30), 63  ;;  %v2621_v40 = vld [vmem:[%s3859_s2] ss:$0 sm:$0xff]  ;;  %s2137_s10 = scalar_lea.hbm %s3860_s3, %s2279_s7 }
  0x18   : > { %2286 = vmatpush.msra.mxu2 %v322_v1  ;;  %2287 = vmatpush.msra.mxu3 %v322_v1  ;;  %s2245_s18 = sshll.u32 %s4081_s30, 3  ;;  %s200_s15 = scalar_lea.vmem [#allocation4], %s3811_s6 }
  0x19   : > { %435 = vmatpush.msra.mxu0 %v321_v2  ;;  %2288 = vmatpush.msra.mxu1 %v321_v2  ;;  %s2549_s27 = scalar_lea.vmem %s3857_s0, %s2245_s18  ;;  %s2139_s11 = sshll.u32 %s200_s15, 4  ;;  %s2140_s11 = int_to_ptr.vmem [resolvable:$true] %s2139_s11 }
  0x1a   : > { %2289 = vmatpush.msra.mxu2 %v321_v2  ;;  %2290 = vmatpush.msra.mxu3 %v321_v2  ;;  %v284_v8 = vld [vmem:[%s2549_s27] sm:$0xff]  ;;  %v285_v12 = vld [vmem:[%s2549_s27 + $0x8] sm:$0xff]  ;;  %v286_v16 = vld [vmem:[%s2549_s27 + $0x10] sm:$0xff]  ;;  %s2141_s18 = sshll.u32 %s2137_s10, 4  ;;  %s2127_s19 = scalar_lea.sflag [#allocation5], %s198_s5  ;;  %s2142_s18 = int_to_ptr.hbm [resolvable:$true] %s2141_s18 }
  0x1b   : > { %436 = vmatpush.msra.mxu0 %v320_v3  ;;  %2291 = vmatpush.msra.mxu1 %v320_v3  ;;  %v292_v9 = vld [vmem:[%s2549_s27 + $0x40] sm:$0xff]  ;;  %v293_v13 = vld [vmem:[%s2549_s27 + $0x48] sm:$0xff]  ;;  %v294_v17 = vld [vmem:[%s2549_s27 + $0x50] sm:$0xff]  ;;  %s2381_s21 = sshra.s32 %s2142_s18, 4  ;;  %s2387_s28 = scalar_lea.hbm %s3860_s3, 4  ;;  %s2382_s21 = int_to_ptr.hbm [resolvable:$true] %s2381_s21 }
  0x1c   : > { %2292 = vmatpush.msra.mxu2 %v320_v3  ;;  %2293 = vmatpush.msra.mxu3 %v320_v3  ;;  %v300_v10 = vld [vmem:[%s2549_s27 + $0x80] sm:$0xff]  ;;  %v301_v14 = vld [vmem:[%s2549_s27 + $0x88] sm:$0xff]  ;;  %v310_v18 = vld [vmem:[%s2549_s27 + $0xd0] sm:$0xff]  ;;  %s2383_s23 = scalar_lea.hbm %s2382_s21, 2  ;;  %p2388_p1 = scmp.lt.s32.totalorder %s2382_s21, %s3860_s3 }
  0x1d   : > { %437 = vmatpush.msra.mxu0 %v319_v4  ;;  %2294 = vmatpush.msra.mxu1 %v319_v4  ;;  %v308_v11 = vld [vmem:[%s2549_s27 + $0xc0] sm:$0xff]  ;;  %v309_v15 = vld [vmem:[%s2549_s27 + $0xc8] sm:$0xff]  ;;  %v302_v19 = vld [vmem:[%s2549_s27 + $0x90] sm:$0xff]  ;;  %p2384_p12 = scmp.ne.s32.totalorder %s2382_s21, %s2383_s23  ;;  %p2389_p2 = scmp.lt.s32.totalorder %s2387_s28, %s2383_s23 }
  0x1e   : > { %2295 = vmatpush.msra.mxu2 %v319_v4  ;;  %2296 = vmatpush.msra.mxu3 %v319_v4  ;;  %v287_v20 = vld [vmem:[%s2549_s27 + $0x18] sm:$0xff]  ;;  %v288_v24 = vld [vmem:[%s2549_s27 + $0x20] sm:$0xff]  ;;  %v289_v28 = vld [vmem:[%s2549_s27 + $0x28] sm:$0xff] }
  0x1f   : > { %438 = vmatpush.msra.mxu0 %v318_v5  ;;  %2297 = vmatpush.msra.mxu1 %v318_v5  ;;  %v295_v21 = vld [vmem:[%s2549_s27 + $0x58] sm:$0xff]  ;;  %v296_v25 = vld [vmem:[%s2549_s27 + $0x60] sm:$0xff]  ;;  %v297_v29 = vld [vmem:[%s2549_s27 + $0x68] sm:$0xff]  ;;  %p2385_p13 = pnand %p2384_p12, %p2509_p4  ;;  %p2390_p3 = por %p2389_p2, %p2388_p1 }
  0x20   : > { %2298 = vmatpush.msra.mxu2 %v318_v5  ;;  %2299 = vmatpush.msra.mxu3 %v318_v5  ;;  %v303_v22 = vld [vmem:[%s2549_s27 + $0x98] sm:$0xff]  ;;  %v304_v26 = vld [vmem:[%s2549_s27 + $0xa0] sm:$0xff]  ;;  %v305_v30 = vld [vmem:[%s2549_s27 + $0xa8] sm:$0xff] }
  0x21   : > { %439 = vmatpush.msra.mxu0 %v317_v6  ;;  %2300 = vmatpush.msra.mxu1 %v317_v6  ;;  %v311_v23 = vld [vmem:[%s2549_s27 + $0xd8] sm:$0xff]  ;;  %v312_v27 = vld [vmem:[%s2549_s27 + $0xe0] sm:$0xff]  ;;  %v313_v31 = vld [vmem:[%s2549_s27 + $0xe8] sm:$0xff]  ;;  %p2386_p0 = pneg %p2385_p13 }
  0x22   : > { %2301 = vmatpush.msra.mxu2 %v317_v6  ;;  %2302 = vmatpush.msra.mxu3 %v317_v6  ;;  %v298_v32 = vld [vmem:[%s2549_s27 + $0x70] sm:$0xff]  ;;  %v299_v36 = vld [vmem:[%s2549_s27 + $0x78] sm:$0xff] }
  0x23   : > { %440 = vmatpush.msra.mxu0 %v316_v7  ;;  %2303 = vmatpush.msra.mxu1 %v316_v7  ;;  %v290_v33 = vld [vmem:[%s2549_s27 + $0x30] sm:$0xff]  ;;  %v291_v37 = vld [vmem:[%s2549_s27 + $0x38] sm:$0xff]  ;;  %p2391_p5 = pnand %p2390_p3, %p2386_p0 }
  0x24   : > { %2304 = vmatpush.msra.mxu2 %v316_v7  ;;  %2305 = vmatpush.msra.mxu3 %v316_v7  ;;  %v306_v34 = vld [vmem:[%s2549_s27 + $0xb0] sm:$0xff]  ;;  %v307_v38 = vld [vmem:[%s2549_s27 + $0xb8] sm:$0xff] }
  0x25   : > { %2246 = vmatmul.msk.f32.vlgmr.msra.gmra.mxu0 %vm328_vm0, %v284_v8  ;;  %2254 = vmatmul.msk.f32.vlgmr.msra.gmra.mxu1 %vm328_vm0, %v292_v9  ;;  %v314_v35 = vld [vmem:[%s2549_s27 + $0xf0] sm:$0xff]  ;;  %v315_v39 = vld [vmem:[%s2549_s27 + $0xf8] sm:$0xff] }
  0x26   : > { %2262 = vmatmul.msk.f32.vlgmr.msra.gmra.mxu2 %vm328_vm0, %v300_v10  ;;  %2270 = vmatmul.msk.f32.vlgmr.msra.gmra.mxu3 %vm328_vm0, %v308_v11 }
  0x2d   : > { %2247 = vmatmul.msk.f32.gmra.mxu0 %vm328_vm0, %v285_v12  ;;  %2255 = vmatmul.msk.f32.gmra.mxu1 %vm328_vm0, %v293_v13 }
  0x2e   : > { %2263 = vmatmul.msk.f32.gmra.mxu2 %vm328_vm0, %v301_v14  ;;  %2271 = vmatmul.msk.f32.gmra.mxu3 %vm328_vm0, %v309_v15 }
  0x35   : > { %2248 = vmatmul.msk.f32.gmra.mxu0 %vm328_vm0, %v286_v16  ;;  %2256 = vmatmul.msk.f32.gmra.mxu1 %vm328_vm0, %v294_v17 }
  0x36   : > { %2272 = vmatmul.msk.f32.gmra.mxu3 %vm328_vm0, %v310_v18  ;;  %2264 = vmatmul.msk.f32.gmra.mxu2 %vm328_vm0, %v302_v19  ;;  %v2447_v18 = vmov -inf  }
  0x37   : > { %228 = vst.msk [vmem:[#allocation2 + $0x40] sm:$0xff] %vm219_vm1, %v2447_v18 }
  0x38   : > { %220 = vst.msk [vmem:[#allocation2] sm:$0xff] %vm219_vm1, %v2447_v18 }
  0x39   : > { %221 = vst.msk [vmem:[#allocation2 + $0x8] sm:$0xff] %vm219_vm1, %v2447_v18 }
  0x3a   : > { %222 = vst.msk [vmem:[#allocation2 + $0x10] sm:$0xff] %vm219_vm1, %v2447_v18 }
  0x3b   : > { %223 = vst.msk [vmem:[#allocation2 + $0x18] sm:$0xff] %vm219_vm1, %v2447_v18 }
  0x3c   : > { %224 = vst.msk [vmem:[#allocation2 + $0x20] sm:$0xff] %vm219_vm1, %v2447_v18 }
  0x3d   : > { %2249 = vmatmul.msk.f32.gmra.mxu0 %vm328_vm0, %v287_v20  ;;  %2257 = vmatmul.msk.f32.gmra.mxu1 %vm328_vm0, %v295_v21  ;;  %225 = vst.msk [vmem:[#allocation2 + $0x28] sm:$0xff] %vm219_vm1, %v2447_v18 }
  0x3e   : > { %2265 = vmatmul.msk.f32.gmra.mxu2 %vm328_vm0, %v303_v22  ;;  %2273 = vmatmul.msk.f32.gmra.mxu3 %vm328_vm0, %v311_v23  ;;  %226 = vst.msk [vmem:[#allocation2 + $0x30] sm:$0xff] %vm219_vm1, %v2447_v18 }
  0x3f   : > { %227 = vst.msk [vmem:[#allocation2 + $0x38] sm:$0xff] %vm219_vm1, %v2447_v18 }
  0x40   : > { %229 = vst.msk [vmem:[#allocation2 + $0x48] sm:$0xff] %vm219_vm1, %v2447_v18 }
  0x41   : > { %230 = vst.msk [vmem:[#allocation2 + $0x50] sm:$0xff] %vm219_vm1, %v2447_v18 }
  0x42   : > { %231 = vst.msk [vmem:[#allocation2 + $0x58] sm:$0xff] %vm219_vm1, %v2447_v18 }
  0x43   : > { %232 = vst.msk [vmem:[#allocation2 + $0x60] sm:$0xff] %vm219_vm1, %v2447_v18 }
  0x44   : > { %233 = vst.msk [vmem:[#allocation2 + $0x68] sm:$0xff] %vm219_vm1, %v2447_v18 }
  0x45   : > { %2250 = vmatmul.msk.f32.gmra.mxu0 %vm328_vm0, %v288_v24  ;;  %2258 = vmatmul.msk.f32.gmra.mxu1 %vm328_vm0, %v296_v25  ;;  %234 = vst.msk [vmem:[#allocation2 + $0x70] sm:$0xff] %vm219_vm1, %v2447_v18 }
  0x46   : > { %2266 = vmatmul.msk.f32.gmra.mxu2 %vm328_vm0, %v304_v26  ;;  %2274 = vmatmul.msk.f32.gmra.mxu3 %vm328_vm0, %v312_v27  ;;  %235 = vst.msk [vmem:[#allocation2 + $0x78] sm:$0xff] %vm219_vm1, %v2447_v18 }
  0x47   : > { %236 = vst.msk [vmem:[#allocation2 + $0x80] sm:$0xff] %vm219_vm1, %v2447_v18 }
  0x48   : > { %237 = vst.msk [vmem:[#allocation2 + $0x88] sm:$0xff] %vm219_vm1, %v2447_v18 }
  0x49   : > { %238 = vst.msk [vmem:[#allocation2 + $0x90] sm:$0xff] %vm219_vm1, %v2447_v18 }
  0x4a   : > { %239 = vst.msk [vmem:[#allocation2 + $0x98] sm:$0xff] %vm219_vm1, %v2447_v18 }
  0x4b   : > { %240 = vst.msk [vmem:[#allocation2 + $0xa0] sm:$0xff] %vm219_vm1, %v2447_v18 }
  0x4c   : > { %241 = vst.msk [vmem:[#allocation2 + $0xa8] sm:$0xff] %vm219_vm1, %v2447_v18 }
  0x4d   : > { %2251 = vmatmul.msk.f32.gmra.mxu0 %vm328_vm0, %v289_v28  ;;  %2259 = vmatmul.msk.f32.gmra.mxu1 %vm328_vm0, %v297_v29  ;;  %242 = vst.msk [vmem:[#allocation2 + $0xb0] sm:$0xff] %vm219_vm1, %v2447_v18 }
  0x4e   : > { %2267 = vmatmul.msk.f32.gmra.mxu2 %vm328_vm0, %v305_v30  ;;  %2275 = vmatmul.msk.f32.gmra.mxu3 %vm328_vm0, %v313_v31  ;;  %243 = vst.msk [vmem:[#allocation2 + $0xb8] sm:$0xff] %vm219_vm1, %v2447_v18 }
  0x4f   : > { %244 = vst.msk [vmem:[#allocation2 + $0xc0] sm:$0xff] %vm219_vm1, %v2447_v18 }
  0x50   : > { %245 = vst.msk [vmem:[#allocation2 + $0xc8] sm:$0xff] %vm219_vm1, %v2447_v18 }
  0x51   : > { %246 = vst.msk [vmem:[#allocation2 + $0xd0] sm:$0xff] %vm219_vm1, %v2447_v18 }
  0x52   : > { %247 = vst.msk [vmem:[#allocation2 + $0xd8] sm:$0xff] %vm219_vm1, %v2447_v18 }
  0x53   : > { %248 = vst.msk [vmem:[#allocation2 + $0xe0] sm:$0xff] %vm219_vm1, %v2447_v18 }
  0x54   : > { %249 = vst.msk [vmem:[#allocation2 + $0xe8] sm:$0xff] %vm219_vm1, %v2447_v18 }
  0x55   : > { %2260 = vmatmul.msk.f32.gmra.mxu1 %vm328_vm0, %v298_v32  ;;  %2252 = vmatmul.msk.f32.gmra.mxu0 %vm328_vm0, %v290_v33  ;;  %250 = vst.msk [vmem:[#allocation2 + $0xf0] sm:$0xff] %vm219_vm1, %v2447_v18 }
  0x56   : > { %2268 = vmatmul.msk.f32.gmra.mxu2 %vm328_vm0, %v306_v34  ;;  %2276 = vmatmul.msk.f32.gmra.mxu3 %vm328_vm0, %v314_v35  ;;  %251 = vst.msk [vmem:[#allocation2 + $0xf8] sm:$0xff] %vm219_vm1, %v2447_v18 }
  0x5d   : > { %2261 = vmatmul.msk.f32.gmra.mxu1 %vm328_vm0, %v299_v36  ;;  %2253 = vmatmul.msk.f32.gmra.mxu0 %vm328_vm0, %v291_v37 }
  0x5e   : > { %2269 = vmatmul.msk.f32.gmra.mxu2 %vm328_vm0, %v307_v38  ;;  %2277 = vmatmul.msk.f32.gmra.mxu3 %vm328_vm0, %v315_v39 }
  0xa2   : > { %v442_v41 = vpop.f32.mrf.mxu0  ;;  %v466_v42 = vpop.f32.mrf.mxu1 }
  0xa3   : > { %v2624_v43 = vadd.f32 %v2621_v40, %v442_v41  ;;  %v2627_v44 = vadd.f32 %v2621_v40, %v466_v42 }
  0xa5   : > { %554 = vmax.xlane.f32.xlu2 %v2627_v44  ;;  %538 = vmax.xlane.f32.xlu0 %v2624_v43 }
  0xa9   : > { %v490_v45 = vpop.f32.mrf.mxu2  ;;  %v514_v46 = vpop.f32.mrf.mxu3 }
  0xaa   : > { %v2632_v47 = vadd.f32 %v2621_v40, %v490_v45  ;;  %v2635_v48 = vadd.f32 %v2621_v40, %v514_v46  ;;  %v445_v49 = vpop.f32.mrf.mxu0  ;;  %v469_v50 = vpop.f32.mrf.mxu1  ;;  %v3861_v45 = vlaneseq  ;;  %v2783_v46 = vld [vmem:[#allocation2 + $0x40] sm:$0xff] }
  0xab   : > { %v2640_v51 = vadd.f32 %v2621_v40, %v445_v49  ;;  %v2655_v59 = vadd.f32 %v2621_v40, %v469_v50  ;;  %v2785_v49 = vld [vmem:[#allocation2] sm:$0xff] }
  0xac   : > { %3950 = vst [vmem:[#allocation7_spill] sm:$0xff] %v2632_v47  ;;  %570 = vmax.xlane.f32.xlu1 %v2632_v47  ;;  %v2788_v50 = vand.u32 127, %v3861_v45 }
  0xad   : > { %3951 = vst [vmem:[#allocation8_spill] sm:$0xff] %v2635_v48  ;;  %586 = vmax.xlane.f32.xlu0 %v2635_v48  ;;  %v3021_v48 = vld [vmem:[#allocation2 + $0xa0] sm:$0xff] }
  0xae   : > { %3979 = vst [vmem:[#allocation36_spill] sm:$0xff] %v3021_v48 }
  0xb1   : > { %v493_v52 = vpop.f32.mrf.mxu2  ;;  %v517_v53 = vpop.f32.mrf.mxu3 }
  0xb2   : > { %v2643_v54 = vadd.f32 %v2621_v40, %v493_v52  ;;  %v2646_v55 = vadd.f32 %v2621_v40, %v517_v53  ;;  %v448_v56 = vpop.f32.mrf.mxu0  ;;  %v472_v57 = vpop.f32.mrf.mxu1 }
  0xb3   : > { %v2652_v58 = vadd.f32 %v2621_v40, %v448_v56  ;;  %v2664_v1 = vadd.f32 %v2621_v40, %v472_v57 }
  0xb4   : > { %3952 = vst [vmem:[#allocation9_spill] sm:$0xff] %v2643_v54  ;;  %588 = vmax.xlane.f32.xlu1 %v2646_v55  ;;  %572 = vmax.xlane.f32.xlu2 %v2643_v54 }
  0xb5   : > { %3953 = vst [vmem:[#allocation10_spill] sm:$0xff] %v2646_v55  ;;  %540 = vmax.xlane.f32.xlu0 %v2640_v51 }
  0xb9   : > { %v520_v60 = vpop.f32.mrf.mxu3  ;;  %v496_v61 = vpop.f32.mrf.mxu2 }
  0xba   : > { %v2658_v62 = vadd.f32 %v2621_v40, %v520_v60  ;;  %v451_v63 = vpop.f32.mrf.mxu0  ;;  %v475_v0 = vpop.f32.mrf.mxu1  ;;  %v2670_v3 = vadd.f32 %v2621_v40, %v496_v61  ;;  %v2816_v60 = vld [vmem:[#allocation2 + $0x80] sm:$0xff] }
  0xbb   : > { %v2667_v2 = vadd.f32 %v2621_v40, %v475_v0  ;;  %v2676_v7 = vadd.f32 %v2621_v40, %v451_v63  ;;  %3966 = vst [vmem:[#allocation23_spill] sm:$0xff] %v2816_v60  ;;  %v2820_v63 = vld [vmem:[#allocation2 + $0xc0] sm:$0xff] }
  0xbc   : > { %3954 = vst [vmem:[#allocation11_spill] sm:$0xff] %v2658_v62  ;;  %590 = vmax.xlane.f32.xlu2 %v2658_v62  ;;  %542 = vmax.xlane.f32.xlu1 %v2652_v58 }
  0xbd   : > { %556 = vmax.xlane.f32.xlu0 %v2655_v59  ;;  %3955 = vst [vmem:[#allocation12_spill] sm:$0xff] %v2670_v3 }
  0xbe   : > { %3967 = vst [vmem:[#allocation24_spill] sm:$0xff] %v2820_v63 }
  0xc1   : > { %v499_v4 = vpop.f32.mrf.mxu2  ;;  %v523_v6 = vpop.f32.mrf.mxu3 }
  0xc2   : > { %v454_v5 = vpop.f32.mrf.mxu0  ;;  %v478_v9 = vpop.f32.mrf.mxu1  ;;  %v2682_v10 = vadd.f32 %v2621_v40, %v523_v6  ;;  %v2688_v12 = vadd.f32 %v2621_v40, %v499_v4 }
  0xc3   : > { %v2679_v8 = vadd.f32 %v2621_v40, %v454_v5  ;;  %v2694_v14 = vadd.f32 %v2621_v40, %v478_v9  ;;  %v2843_v9 = vld [vmem:[#allocation2 + $0xc8] sm:$0xff] }
  0xc4   : > { %560 = vmax.xlane.f32.xlu2 %v2667_v2  ;;  %558 = vmax.xlane.f32.xlu1 %v2664_v1  ;;  %3956 = vst [vmem:[#allocation13_spill] sm:$0xff] %v2682_v10 }
  0xc5   : > { %574 = vmax.xlane.f32.xlu0 %v2670_v3  ;;  %3957 = vst [vmem:[#allocation14_spill] sm:$0xff] %v2688_v12 }
  0xc6   : > { %3970 = vst [vmem:[#allocation27_spill] sm:$0xff] %v2843_v9 }
  0xc9   : > { %v502_v11 = vpop.f32.mrf.mxu2  ;;  %v526_v22 = vpop.f32.mrf.mxu3 }
  0xca   : > { %v2691_v13 = vadd.f32 %v2621_v40, %v502_v11  ;;  %v481_v15 = vpop.f32.mrf.mxu1  ;;  %v457_v16 = vpop.f32.mrf.mxu0  ;;  %v2763_v35 = vadd.f32 %v2621_v40, %v526_v22  ;;  %v2845_v11 = vld [vmem:[#allocation2 + $0x88] sm:$0xff] }
  0xcb   : > { %v2703_v19 = vadd.f32 %v2621_v40, %v457_v16  ;;  %v2706_v20 = vadd.f32 %v2621_v40, %v481_v15  ;;  %3971 = vst [vmem:[#allocation28_spill] sm:$0xff] %v2845_v11  ;;  %v2847_v15 = vld [vmem:[#allocation2 + $0x8] sm:$0xff] }
  0xcc   : > { %546 = vmax.xlane.f32.xlu2 %v2679_v8  ;;  %544 = vmax.xlane.f32.xlu1 %v2676_v7  ;;  %3958 = vst [vmem:[#allocation15_spill] sm:$0xff] %v2691_v13 }
  0xcd   : > { %592 = vmax.xlane.f32.xlu0 %v2682_v10  ;;  %3962 = vst [vmem:[#allocation19_spill] sm:$0xff] %v2763_v35 }
  0xd1   : > { %v505_v17 = vpop.f32.mrf.mxu2  ;;  %v529_v30 = vpop.f32.mrf.mxu3 }
  0xd2   : > { %v2710_v21 = vadd.f32 %v2621_v40, %v505_v17  ;;  %v484_v23 = vpop.f32.mrf.mxu1  ;;  %v460_v24 = vpop.f32.mrf.mxu0  ;;  %v2746_v33 = vadd.f32 %v2621_v40, %v529_v30  ;;  %v2887_v30 = vld [vmem:[#allocation2 + $0x10] sm:$0xff] }
  0xd3   : > { %v2723_v26 = vadd.f32 %v2621_v40, %v484_v23  ;;  %v2730_v28 = vadd.f32 %v2621_v40, %v460_v24 }
  0xd4   : > { %578 = vmax.xlane.f32.xlu2 %v2691_v13  ;;  %576 = vmax.xlane.f32.xlu1 %v2688_v12  ;;  %3959 = vst [vmem:[#allocation16_spill] sm:$0xff] %v2710_v21 }
  0xd5   : > { %562 = vmax.xlane.f32.xlu0 %v2694_v14  ;;  %3961 = vst [vmem:[#allocation18_spill] sm:$0xff] %v2746_v33 }
  0xd9   : > { %v508_v25 = vpop.f32.mrf.mxu2  ;;  %v532_v37 = vpop.f32.mrf.mxu3 }
  0xda   : > { %v2726_v27 = vadd.f32 %v2621_v40, %v508_v25  ;;  %v463_v29 = vpop.f32.mrf.mxu0  ;;  %v487_v31 = vpop.f32.mrf.mxu1  ;;  %v2775_v39 = vadd.f32 %v2621_v40, %v532_v37 }
  0xdb   : > { %v2743_v32 = vadd.f32 %v2621_v40, %v463_v29  ;;  %v2750_v34 = vadd.f32 %v2621_v40, %v487_v31 }
  0xdc   : > { %548 = vmax.xlane.f32.xlu2 %v2703_v19  ;;  %564 = vmax.xlane.f32.xlu1 %v2706_v20  ;;  %3960 = vst [vmem:[#allocation17_spill] sm:$0xff] %v2726_v27 }
  0xdd   : > { %580 = vmax.xlane.f32.xlu0 %v2710_v21  ;;  %3964 = vst [vmem:[#allocation21_spill] sm:$0xff] %v2775_v39  ;;  %v3107_v21 = vld [vmem:[#allocation2 + $0x30] sm:$0xff] }
  0xe1   : > { %v511_v36 = vpop.f32.mrf.mxu2  ;;  %v535_v41 = vpop.f32.mrf.mxu3 }
  0xe2   : > { %v2772_v38 = vadd.f32 %v2621_v40, %v511_v36  ;;  %v2780_v42 = vadd.f32 %v2621_v40, %v535_v41  ;;  %v2891_v36 = vld [vmem:[#allocation2 + $0x48] sm:$0xff] }
  0xe4   : > { %566 = vmax.xlane.f32.xlu2 %v2723_v26  ;;  %582 = vmax.xlane.f32.xlu1 %v2726_v27  ;;  %3963 = vst [vmem:[#allocation20_spill] sm:$0xff] %v2772_v38  ;;  %v3063_v27 = vld [vmem:[#allocation2 + $0xa8] sm:$0xff] }
  0xe5   : > { %550 = vmax.xlane.f32.xlu0 %v2730_v28  ;;  %3965 = vst [vmem:[#allocation22_spill] sm:$0xff] %v2780_v42 }
  0xe6   : > { %3985 = vst [vmem:[#allocation42_spill] sm:$0xff] %v3063_v27 }
  0xec   : > { %552 = vmax.xlane.f32.xlu1 %v2743_v32  ;;  %596 = vmax.xlane.f32.xlu2 %v2746_v33 }
  0xed   : > { %568 = vmax.xlane.f32.xlu0 %v2750_v34 }
  0xf4   : > { %594 = vmax.xlane.f32.xlu1 %v2763_v35  ;;  %584 = vmax.xlane.f32.xlu2 %v2772_v38  ;;  %v2973_v35 = vld [vmem:[#allocation2 + $0xd8] sm:$0xff] }
  0xf5   : > { %3977 = vst [vmem:[#allocation34_spill] sm:$0xff] %v2973_v35 }
  0xfc   : > { %598 = vmax.xlane.f32.xlu1 %v2775_v39  ;;  %600 = vmax.xlane.f32.xlu2 %v2780_v42  ;;  %v2971_v42 = vld [vmem:[#allocation2 + $0x18] sm:$0xff] }
 0x118   : > { %v2790_v52 = vpop.xlane.xlu2 %554  ;;  %v2792_v53 = vpop.xlane.xlu0 %538 }
 0x119   : > { %vm1159_vm2 = vcmp.gt.f32.partialorder %v2790_v52, %v2783_v46  ;;  %vm607_vm3 = vcmp.eq.f32.partialorder %v2624_v43, %v2792_v53  ;;  %vm1151_vm4 = vcmp.gt.f32.partialorder %v2792_v53, %v2785_v49 }
 0x11a   : > { %v1320_v40 = vsel %vm1159_vm2, %v2790_v52, %v2783_v46  ;;  %v1312_v56 = vsel %vm1151_vm4, %v2792_v53, %v2785_v49  ;;  %v2811_v57 = vsel %vm607_vm3, %v2788_v50, 1073741824 }
 0x11b   : > { %1352 = vst.msk [vmem:[#allocation2 + $0x40] sm:$0xff] %vm219_vm1, %v1320_v40  ;;  %v672_v43 = vshra.s32 %v2811_v57, 16 }
 0x11c   : > { %1344 = vst.msk [vmem:[#allocation2] sm:$0xff] %vm219_vm1, %v1312_v56 }
 0x11d   : > { %v2818_v61 = vcvt.s32.f32 %v672_v43 }
 0x11f   : > { %v2822_v0 = vpop.xlane.xlu1 %570  ;;  %675 = vmin.xlane.f32.xlu0 %v2818_v61 }
 0x120   : > { %3968 = vst [vmem:[#allocation25_spill] sm:$0xff] %v2822_v0  ;;  %vm3893_vm5 = vcmp.gt.f32.partialorder %v2822_v0, %v2816_v60  ;;  %v2827_v4 = vpop.xlane.xlu0 %586 }
 0x121   : > { %3969 = vst [vmem:[#allocation26_spill] sm:$0xff] %v2827_v4  ;;  %v1328_v5 = vsel %vm3893_vm5, %v2822_v0, %v2816_v60  ;;  %vm3869_vm6 = vcmp.gt.f32.partialorder %v2827_v4, %v2820_v63  ;;  %v3103_v60 = vld [vmem:[#allocation2 + $0x70] sm:$0xff] }
 0x122   : > { %1360 = vst.msk [vmem:[#allocation2 + $0x80] sm:$0xff] %vm219_vm1, %v1328_v5  ;;  %v1336_v6 = vsel %vm3869_vm6, %v2827_v4, %v2820_v63 }
 0x123   : > { %1368 = vst.msk [vmem:[#allocation2 + $0xc0] sm:$0xff] %vm219_vm1, %v1336_v6 }
 0x124   : > { %3987 = vst [vmem:[#allocation44_spill] sm:$0xff] %v3103_v60 }
 0x127   : > { %v2849_v16 = vpop.xlane.xlu1 %588  ;;  %v2851_v17 = vpop.xlane.xlu2 %572 }
 0x128   : > { %3972 = vst [vmem:[#allocation29_spill] sm:$0xff] %v2849_v16  ;;  %vm3870_vm7 = vcmp.gt.f32.partialorder %v2849_v16, %v2843_v9  ;;  %vm3904_vm8 = vcmp.gt.f32.partialorder %v2851_v17, %v2845_v11  ;;  %v2857_v18 = vpop.xlane.xlu0 %540 }
 0x129   : > { %v1337_v22 = vsel %vm3870_vm7, %v2849_v16, %v2843_v9  ;;  %v1329_v23 = vsel %vm3904_vm8, %v2851_v17, %v2845_v11  ;;  %vm608_vm9 = vcmp.eq.f32.partialorder %v2640_v51, %v2857_v18  ;;  %vm1152_vm10 = vcmp.gt.f32.partialorder %v2857_v18, %v2847_v15  ;;  %v2885_v51 = vld [vmem:[#allocation2 + $0xd0] sm:$0xff]  ;;  %v3061_v16 = vld [vmem:[#allocation2 + $0x68] sm:$0xff] }
 0x12a   : > { %1369 = vst.msk [vmem:[#allocation2 + $0xc8] sm:$0xff] %vm219_vm1, %v1337_v22  ;;  %v1313_v24 = vsel %vm1152_vm10, %v2857_v18, %v2847_v15  ;;  %v2880_v25 = vsel %vm608_vm9, %v2788_v50, 1073741824 }
 0x12b   : > { %1361 = vst.msk [vmem:[#allocation2 + $0x88] sm:$0xff] %vm219_vm1, %v1329_v23  ;;  %v686_v29 = vshra.s32 %v2880_v25, 16  ;;  %v2932_v23 = vld [vmem:[#allocation2 + $0x58] sm:$0xff] }
 0x12c   : > { %1345 = vst.msk [vmem:[#allocation2 + $0x8] sm:$0xff] %vm219_vm1, %v1313_v24  ;;  %v2934_v24 = vld [vmem:[#allocation2 + $0x50] sm:$0xff] }
 0x12d   : > { %3973 = vst [vmem:[#allocation30_spill] sm:$0xff] %v2885_v51  ;;  %v2889_v31 = vcvt.s32.f32 %v686_v29  ;;  %v2936_v29 = vld [vmem:[#allocation2 + $0x90] sm:$0xff] }
 0x12e   : > { %3975 = vst [vmem:[#allocation32_spill] sm:$0xff] %v2936_v29 }
 0x12f   : > { %v2893_v37 = vpop.xlane.xlu2 %590  ;;  %v2895_v41 = vpop.xlane.xlu1 %542  ;;  %689 = vmin.xlane.f32.xlu0 %v2889_v31  ;;  %3984 = vst [vmem:[#allocation41_spill] sm:$0xff] %v3061_v16 }
 0x130   : > { %3974 = vst [vmem:[#allocation31_spill] sm:$0xff] %v2893_v37  ;;  %vm3868_vm11 = vcmp.gt.f32.partialorder %v2893_v37, %v2885_v51  ;;  %vm609_vm12 = vcmp.eq.f32.partialorder %v2652_v58, %v2895_v41  ;;  %vm1153_vm13 = vcmp.gt.f32.partialorder %v2895_v41, %v2887_v30  ;;  %v2904_v40 = vpop.xlane.xlu0 %556 }
 0x131   : > { %v1338_v56 = vsel %vm3868_vm11, %v2893_v37, %v2885_v51  ;;  %v1314_v43 = vsel %vm1153_vm13, %v2895_v41, %v2887_v30  ;;  %vm1160_vm14 = vcmp.gt.f32.partialorder %v2904_v40, %v2891_v36  ;;  %v2925_v5 = vsel %vm609_vm12, %v2788_v50, 1073741824  ;;  %v2969_v51 = vld [vmem:[#allocation2 + $0x20] sm:$0xff] }
 0x132   : > { %1370 = vst.msk [vmem:[#allocation2 + $0xd0] sm:$0xff] %vm219_vm1, %v1338_v56  ;;  %v1321_v58 = vsel %vm1160_vm14, %v2904_v40, %v2891_v36  ;;  %v700_v6 = vshra.s32 %v2925_v5, 16 }
 0x133   : > { %1346 = vst.msk [vmem:[#allocation2 + $0x10] sm:$0xff] %vm219_vm1, %v1314_v43 }
 0x134   : > { %1353 = vst.msk [vmem:[#allocation2 + $0x48] sm:$0xff] %vm219_vm1, %v1321_v58  ;;  %v2930_v22 = vcvt.s32.f32 %v700_v6 }
 0x136   : > { %703 = vmin.xlane.f32.xlu2 %v2930_v22 }
 0x137   : > { %v2939_v56 = vpop.xlane.xlu2 %560  ;;  %v2941_v45 = vpop.xlane.xlu1 %558 }
 0x138   : > { %vm1162_vm15 = vcmp.gt.f32.partialorder %v2939_v56, %v2932_v23  ;;  %vm1161_vm0 = vcmp.gt.f32.partialorder %v2941_v45, %v2934_v24  ;;  %v2947_v43 = vpop.xlane.xlu0 %574 }
 0x139   : > { %3976 = vst [vmem:[#allocation33_spill] sm:$0xff] %v2947_v43  ;;  %v1323_v58 = vsel %vm1162_vm15, %v2939_v56, %v2932_v23  ;;  %v1322_v6 = vsel %vm1161_vm0, %v2941_v45, %v2934_v24  ;;  %vm3891_vm3 = vcmp.gt.f32.partialorder %v2947_v43, %v2936_v29 }
 0x13a   : > { %1355 = vst.msk [vmem:[#allocation2 + $0x58] sm:$0xff] %vm219_vm1, %v1323_v58  ;;  %v1330_v39 = vsel %vm3891_vm3, %v2947_v43, %v2936_v29  ;;  %v3154_v43 = vld [vmem:[#allocation2 + $0x78] sm:$0xff] }
 0x13b   : > { %1354 = vst.msk [vmem:[#allocation2 + $0x50] sm:$0xff] %vm219_vm1, %v1322_v6 }
 0x13c   : > { %1362 = vst.msk [vmem:[#allocation2 + $0x90] sm:$0xff] %vm219_vm1, %v1330_v39 }
 0x13d   : > { %3991 = vst [vmem:[#allocation48_spill] sm:$0xff] %v3154_v43 }
 0x13f   : > { %v2975_v63 = vpop.xlane.xlu2 %546  ;;  %v2977_v33 = vpop.xlane.xlu1 %544 }
 0x140   : > { %vm611_vm9 = vcmp.eq.f32.partialorder %v2679_v8, %v2975_v63  ;;  %vm1155_vm12 = vcmp.gt.f32.partialorder %v2975_v63, %v2969_v51  ;;  %vm610_vm11 = vcmp.eq.f32.partialorder %v2676_v7, %v2977_v33  ;;  %vm1154_vm6 = vcmp.gt.f32.partialorder %v2977_v33, %v2971_v42  ;;  %v2987_v39 = vpop.xlane.xlu0 %592 }
 0x141   : > { %3978 = vst [vmem:[#allocation35_spill] sm:$0xff] %v2987_v39  ;;  %v1316_v58 = vsel %vm1155_vm12, %v2975_v63, %v2969_v51  ;;  %v1315_v8 = vsel %vm1154_vm6, %v2977_v33, %v2971_v42  ;;  %vm3882_vm7 = vcmp.gt.f32.partialorder %v2987_v39, %v2973_v35  ;;  %v3008_v6 = vsel %vm611_vm9, %v2788_v50, 1073741824 }
 0x142   : > { %1348 = vst.msk [vmem:[#allocation2 + $0x20] sm:$0xff] %vm219_vm1, %v1316_v58  ;;  %v1339_v7 = vsel %vm3882_vm7, %v2987_v39, %v2973_v35  ;;  %v3011_v9 = vsel %vm610_vm11, %v2788_v50, 1073741824  ;;  %v728_v62 = vshra.s32 %v3008_v6, 16  ;;  %v3023_v35 = vld [vmem:[#allocation2 + $0x98] sm:$0xff]  ;;  %v3025_v39 = vld [vmem:[#allocation2 + $0x60] sm:$0xff] }
 0x143   : > { %1347 = vst.msk [vmem:[#allocation2 + $0x18] sm:$0xff] %vm219_vm1, %v1315_v8  ;;  %v714_v37 = vshra.s32 %v3011_v9, 16 }
 0x144   : > { %1371 = vst.msk [vmem:[#allocation2 + $0xd8] sm:$0xff] %vm219_vm1, %v1339_v7  ;;  %v3017_v58 = vcvt.s32.f32 %v728_v62 }
 0x145   : > { %v3019_v10 = vcvt.s32.f32 %v714_v37  ;;  %3980 = vst [vmem:[#allocation37_spill] sm:$0xff] %v3023_v35 }
 0x146   : > { %3981 = vst [vmem:[#allocation38_spill] sm:$0xff] %v3025_v39  ;;  %731 = vmin.xlane.f32.xlu1 %v3017_v58 }
 0x147   : > { %717 = vmin.xlane.f32.xlu2 %v3019_v10  ;;  %v3029_v8 = vpop.xlane.xlu2 %578  ;;  %v3031_v4 = vpop.xlane.xlu1 %576 }
 0x148   : > { %3982 = vst [vmem:[#allocation39_spill] sm:$0xff] %v3029_v8  ;;  %vm3890_vm11 = vcmp.gt.f32.partialorder %v3029_v8, %v3021_v48  ;;  %vm3892_vm9 = vcmp.gt.f32.partialorder %v3031_v4, %v3023_v35  ;;  %v3037_v62 = vpop.xlane.xlu0 %562 }
 0x149   : > { %3983 = vst [vmem:[#allocation40_spill] sm:$0xff] %v3031_v4  ;;  %v1332_v37 = vsel %vm3890_vm11, %v3029_v8, %v3021_v48  ;;  %v1331_v7 = vsel %vm3892_vm9, %v3031_v4, %v3023_v35  ;;  %vm3905_vm7 = vcmp.gt.f32.partialorder %v3037_v62, %v3025_v39  ;;  %v3059_v48 = vld [vmem:[#allocation2 + $0x28] sm:$0xff] }
 0x14a   : > { %1364 = vst.msk [vmem:[#allocation2 + $0xa0] sm:$0xff] %vm219_vm1, %v1332_v37  ;;  %v1324_v55 = vsel %vm3905_vm7, %v3037_v62, %v3025_v39  ;;  %v3193_v39 = vld [vmem:[#allocation2 + $0xe0] sm:$0xff] }
 0x14b   : > { %1363 = vst.msk [vmem:[#allocation2 + $0x98] sm:$0xff] %vm219_vm1, %v1331_v7 }
 0x14c   : > { %1356 = vst.msk [vmem:[#allocation2 + $0x60] sm:$0xff] %vm219_vm1, %v1324_v55 }
 0x14d   : > { %3993 = vst [vmem:[#allocation50_spill] sm:$0xff] %v3193_v39 }
 0x14f   : > { %v3065_v29 = vpop.xlane.xlu2 %548  ;;  %v3067_v38 = vpop.xlane.xlu1 %564 }
 0x150   : > { %vm612_vm11 = vcmp.eq.f32.partialorder %v2703_v19, %v3065_v29  ;;  %vm1156_vm3 = vcmp.gt.f32.partialorder %v3065_v29, %v3059_v48  ;;  %vm3917_vm9 = vcmp.gt.f32.partialorder %v3067_v38, %v3061_v16  ;;  %v3075_v55 = vpop.xlane.xlu0 %580 }
 0x151   : > { %3986 = vst [vmem:[#allocation43_spill] sm:$0xff] %v3075_v55  ;;  %v1317_v37 = vsel %vm1156_vm3, %v3065_v29, %v3059_v48  ;;  %v1325_v19 = vsel %vm3917_vm9, %v3067_v38, %v3061_v16  ;;  %vm3903_vm5 = vcmp.gt.f32.partialorder %v3075_v55, %v3063_v27  ;;  %v3096_v35 = vsel %vm612_vm11, %v2788_v50, 1073741824 }
 0x152   : > { %1349 = vst.msk [vmem:[#allocation2 + $0x28] sm:$0xff] %vm219_vm1, %v1317_v37  ;;  %v1333_v7 = vsel %vm3903_vm5, %v3075_v55, %v3063_v27  ;;  %v742_v13 = vshra.s32 %v3096_v35, 16  ;;  %v3105_v37 = vld [vmem:[#allocation2 + $0xb0] sm:$0xff] }
 0x153   : > { %1357 = vst.msk [vmem:[#allocation2 + $0x68] sm:$0xff] %vm219_vm1, %v1325_v19 }
 0x154   : > { %1365 = vst.msk [vmem:[#allocation2 + $0xa8] sm:$0xff] %vm219_vm1, %v1333_v7  ;;  %v3101_v8 = vcvt.s32.f32 %v742_v13 }
 0x155   : > { %3988 = vst [vmem:[#allocation45_spill] sm:$0xff] %v3105_v37 }
 0x156   : > { %745 = vmin.xlane.f32.xlu0 %v3101_v8 }
 0x157   : > { %v3110_v27 = vpop.xlane.xlu2 %566  ;;  %v3112_v55 = vpop.xlane.xlu1 %582 }
 0x158   : > { %3989 = vst [vmem:[#allocation46_spill] sm:$0xff] %v3112_v55  ;;  %vm3908_vm11 = vcmp.gt.f32.partialorder %v3110_v27, %v3103_v60  ;;  %v3116_v19 = vpop.xlane.xlu0 %550  ;;  %vm3916_vm5 = vcmp.gt.f32.partialorder %v3112_v55, %v3105_v37 }
 0x159   : > { %v1326_v13 = vsel %vm3908_vm11, %v3110_v27, %v3103_v60  ;;  %vm613_vm8 = vcmp.eq.f32.partialorder %v2730_v28, %v3116_v19  ;;  %vm1157_vm7 = vcmp.gt.f32.partialorder %v3116_v19, %v3107_v21  ;;  %v1334_v7 = vsel %vm3916_vm5, %v3112_v55, %v3105_v37  ;;  %v3152_v55 = vld [vmem:[#allocation2 + $0xe8] sm:$0xff] }
 0x15a   : > { %1358 = vst.msk [vmem:[#allocation2 + $0x70] sm:$0xff] %vm219_vm1, %v1326_v13  ;;  %v1318_v11 = vsel %vm1157_vm7, %v3116_v19, %v3107_v21  ;;  %v3141_v3 = vsel %vm613_vm8, %v2788_v50, 1073741824  ;;  %vm616_vm11 = vcmp.eq.f32.partialorder %v2655_v59, %v2904_v40  ;;  %v3150_v13 = vld [vmem:[#allocation2 + $0x38] sm:$0xff] }
 0x15b   : > { %1350 = vst.msk [vmem:[#allocation2 + $0x30] sm:$0xff] %vm219_vm1, %v1318_v11  ;;  %v756_v28 = vshra.s32 %v3141_v3, 16  ;;  %v3157_v60 = vsel %vm616_vm11, %v2788_v50, 1073741824 }
 0x15c   : > { %1366 = vst.msk [vmem:[#allocation2 + $0xb0] sm:$0xff] %vm219_vm1, %v1334_v7  ;;  %v798_v7 = vshra.s32 %v3157_v60, 16 }
 0x15d   : > { %v3148_v37 = vcvt.s32.f32 %v756_v28  ;;  %3990 = vst [vmem:[#allocation47_spill] sm:$0xff] %v3152_v55 }
 0x15e   : > { %v3191_v0 = vcvt.s32.f32 %v798_v7  ;;  %v3210_v7 = vld [vmem:[#allocation2 + $0xf0] sm:$0xff] }
 0x15f   : > { %759 = vmin.xlane.f32.xlu2 %v3148_v37  ;;  %v3160_v59 = vpop.xlane.xlu1 %552  ;;  %v3162_v11 = vpop.xlane.xlu2 %596  ;;  %3997 = vst [vmem:[#allocation54_spill] sm:$0xff] %v3210_v7 }
 0x160   : > { %3992 = vst [vmem:[#allocation49_spill] sm:$0xff] %v3162_v11  ;;  %v3164_v12 = vpop.xlane.xlu0 %568  ;;  %vm1158_vm8 = vcmp.gt.f32.partialorder %v3160_v59, %v3150_v13  ;;  %vm3926_vm5 = vcmp.gt.f32.partialorder %v3162_v11, %v3152_v55 }
 0x161   : > { %vm3927_vm9 = vcmp.gt.f32.partialorder %v3164_v12, %v3154_v43  ;;  %v1319_v28 = vsel %vm1158_vm8, %v3160_v59, %v3150_v13  ;;  %v1341_v4 = vsel %vm3926_vm5, %v3162_v11, %v3152_v55 }
 0x162   : > { %v1327_v47 = vsel %vm3927_vm9, %v3164_v12, %v3154_v43  ;;  %1351 = vst.msk [vmem:[#allocation2 + $0x38] sm:$0xff] %vm219_vm1, %v1319_v28 }
 0x163   : > { %1359 = vst.msk [vmem:[#allocation2 + $0x78] sm:$0xff] %vm219_vm1, %v1327_v47  ;;  %v3206_v47 = vld [vmem:[#allocation2 + $0xb8] sm:$0xff] }
 0x164   : > { %1373 = vst.msk [vmem:[#allocation2 + $0xe8] sm:$0xff] %vm219_vm1, %v1341_v4 }
 0x165   : > { %3995 = vst [vmem:[#allocation52_spill] sm:$0xff] %v3206_v47 }
 0x167   : > { %801 = vmin.xlane.f32.xlu2 %v3191_v0  ;;  %v3196_v16 = vpop.xlane.xlu1 %594  ;;  %v3208_v4 = vpop.xlane.xlu2 %584 }
 0x168   : > { %3994 = vst [vmem:[#allocation51_spill] sm:$0xff] %v3196_v16  ;;  %vm3933_vm11 = vcmp.gt.f32.partialorder %v3196_v16, %v3193_v39  ;;  %vm3939_vm5 = vcmp.gt.f32.partialorder %v3208_v4, %v3206_v47 }
 0x169   : > { %v1340_v28 = vsel %vm3933_vm11, %v3196_v16, %v3193_v39  ;;  %3996 = vst [vmem:[#allocation53_spill] sm:$0xff] %v3208_v4  ;;  %v3230_v16 = vld [vmem:[#allocation2 + $0xf8] sm:$0xff] }
 0x16a   : > { %1372 = vst.msk [vmem:[#allocation2 + $0xe0] sm:$0xff] %vm219_vm1, %v1340_v28  ;;  %v1335_v28 = vsel %vm3939_vm5, %v3208_v4, %v3206_v47 }
 0x16b   : > { %1367 = vst.msk [vmem:[#allocation2 + $0xb8] sm:$0xff] %vm219_vm1, %v1335_v28 }
 0x16c   : > { %3999 = vst [vmem:[#allocation56_spill] sm:$0xff] %v3230_v16 }
 0x16f   : > { %v3212_v55 = vpop.xlane.xlu1 %598  ;;  %v3232_v11 = vpop.xlane.xlu2 %600 }
 0x170   : > { %3998 = vst [vmem:[#allocation55_spill] sm:$0xff] %v3212_v55  ;;  %vm3936_vm9 = vcmp.gt.f32.partialorder %v3212_v55, %v3210_v7  ;;  %vm3944_vm11 = vcmp.gt.f32.partialorder %v3232_v11, %v3230_v16 }
 0x171   : > { %v1342_v39 = vsel %vm3936_vm9, %v3212_v55, %v3210_v7  ;;  %4000 = vst [vmem:[#allocation57_spill] sm:$0xff] %v3232_v11  ;;  %v1343_v47 = vsel %vm3944_vm11, %v3232_v11, %v3230_v16  ;;  %v671_v7 = vand.u32 65535, %v2811_v57  ;;  %vm614_vm9 = vcmp.eq.f32.partialorder %v2743_v32, %v3160_v59 }
 0x172   : > { %1374 = vst.msk [vmem:[#allocation2 + $0xf0] sm:$0xff] %vm219_vm1, %v1342_v39  ;;  %v3248_v55 = vsel %vm614_vm9, %v2788_v50, 1073741824  ;;  %v685_v57 = vand.u32 65535, %v2880_v25  ;;  %vm615_vm11 = vcmp.eq.f32.partialorder %v2627_v44, %v2790_v52 }
 0x173   : > { %1375 = vst.msk [vmem:[#allocation2 + $0xf8] sm:$0xff] %vm219_vm1, %v1343_v47  ;;  %v673_v28 = vcvt.s32.f32 %v671_v7  ;;  %v770_v16 = vshra.s32 %v3248_v55, 16 }
 0x174   : > { %v687_v47 = vcvt.s32.f32 %v685_v57 }
 0x175   : > { %v3253_v11 = vcvt.s32.f32 %v770_v16  ;;  %v699_v16 = vand.u32 65535, %v2925_v5 }
 0x177   : > { %v701_v25 = vcvt.s32.f32 %v699_v16 }
 0x192   : > { %v3245_v39 = vpop.xlane.xlu0 %675 }
 0x193   : > { %vm677_vm5 = vcmp.eq.f32.partialorder %v2818_v61, %v3245_v39 }
 0x194   : > { %v678_v43 = vsel %vm677_vm5, %v673_v28, inf }
 0x195   : > { %679 = vmin.xlane.f32.xlu1 %v678_v43  ;;  %v3264_v43 = vsel %vm615_vm11, %v2788_v50, 1073741824 }
 0x196   : > { %v784_v7 = vshra.s32 %v3264_v43, 16 }
 0x198   : > { %v3272_v44 = vcvt.s32.f32 %v784_v7  ;;  %v2448_v7 = vmov 0  }
 0x199   : > { %252 = vst.msk [vmem:[#allocation3] sm:$0xff] %vm219_vm1, %v2448_v7  ;;  %2364 = vset.pattern.permute.xlu1 %v2448_v7  ;;  %2365 = vset.pattern.permute.xlu2 %v2448_v7 }
 0x19a   : > { %253 = vst.msk [vmem:[#allocation3 + $0x8] sm:$0xff] %vm219_vm1, %v2448_v7  ;;  %2363 = vset.pattern.permute.xlu0 %v2448_v7 }
 0x19b   : > { %254 = vst.msk [vmem:[#allocation3 + $0x10] sm:$0xff] %vm219_vm1, %v2448_v7 }
 0x19c   : > { %255 = vst.msk [vmem:[#allocation3 + $0x18] sm:$0xff] %vm219_vm1, %v2448_v7 }
 0x19d   : > { %773 = vmin.xlane.f32.xlu1 %v3253_v11  ;;  %256 = vst.msk [vmem:[#allocation3 + $0x20] sm:$0xff] %vm219_vm1, %v2448_v7 }
 0x19e   : > { %257 = vst.msk [vmem:[#allocation3 + $0x28] sm:$0xff] %vm219_vm1, %v2448_v7 }
 0x19f   : > { %258 = vst.msk [vmem:[#allocation3 + $0x30] sm:$0xff] %vm219_vm1, %v2448_v7 }
 0x1a0   : > { %259 = vst.msk [vmem:[#allocation3 + $0x38] sm:$0xff] %vm219_vm1, %v2448_v7 }
 0x1a1   : > { %260 = vst.msk [vmem:[#allocation3 + $0x40] sm:$0xff] %vm219_vm1, %v2448_v7 }
 0x1a2   : > { %v3259_v32 = vpop.xlane.xlu0 %689  ;;  %261 = vst.msk [vmem:[#allocation3 + $0x48] sm:$0xff] %vm219_vm1, %v2448_v7 }
 0x1a3   : > { %vm691_vm9 = vcmp.eq.f32.partialorder %v2889_v31, %v3259_v32  ;;  %v727_v31 = vand.u32 65535, %v3008_v6  ;;  %262 = vst.msk [vmem:[#allocation3 + $0x50] sm:$0xff] %vm219_vm1, %v2448_v7 }
 0x1a4   : > { %v692_v61 = vsel %vm691_vm9, %v687_v47, inf  ;;  %v713_v47 = vand.u32 65535, %v3011_v9  ;;  %263 = vst.msk [vmem:[#allocation3 + $0x58] sm:$0xff] %vm219_vm1, %v2448_v7 }
 0x1a5   : > { %693 = vmin.xlane.f32.xlu0 %v692_v61  ;;  %v729_v4 = vcvt.s32.f32 %v727_v31  ;;  %264 = vst.msk [vmem:[#allocation3 + $0x60] sm:$0xff] %vm219_vm1, %v2448_v7 }
 0x1a6   : > { %v715_v54 = vcvt.s32.f32 %v713_v47  ;;  %265 = vst.msk [vmem:[#allocation3 + $0x68] sm:$0xff] %vm219_vm1, %v2448_v7 }
 0x1a7   : > { %266 = vst.msk [vmem:[#allocation3 + $0x70] sm:$0xff] %vm219_vm1, %v2448_v7 }
 0x1a8   : > { %267 = vst.msk [vmem:[#allocation3 + $0x78] sm:$0xff] %vm219_vm1, %v2448_v7 }
 0x1a9   : > { %v3268_v28 = vpop.xlane.xlu2 %703  ;;  %268 = vst.msk [vmem:[#allocation3 + $0x80] sm:$0xff] %vm219_vm1, %v2448_v7 }
 0x1aa   : > { %vm705_vm5 = vcmp.eq.f32.partialorder %v2930_v22, %v3268_v28  ;;  %269 = vst.msk [vmem:[#allocation3 + $0x88] sm:$0xff] %vm219_vm1, %v2448_v7 }
 0x1ab   : > { %v706_v57 = vsel %vm705_vm5, %v701_v25, inf  ;;  %270 = vst.msk [vmem:[#allocation3 + $0x90] sm:$0xff] %vm219_vm1, %v2448_v7  ;;  %v682_v25 = vcvt.f32.s32 %v3245_v39 }
 0x1ac   : > { %707 = vmin.xlane.f32.xlu1 %v706_v57  ;;  %271 = vst.msk [vmem:[#allocation3 + $0x98] sm:$0xff] %vm219_vm1, %v2448_v7 }
 0x1ad   : > { %787 = vmin.xlane.f32.xlu0 %v3272_v44  ;;  %272 = vst.msk [vmem:[#allocation3 + $0xa0] sm:$0xff] %vm219_vm1, %v2448_v7  ;;  %v683_v31 = vshll.u32 %v682_v25, 16 }
 0x1ae   : > { %273 = vst.msk [vmem:[#allocation3 + $0xa8] sm:$0xff] %vm219_vm1, %v2448_v7 }
 0x1af   : > { %274 = vst.msk [vmem:[#allocation3 + $0xb0] sm:$0xff] %vm219_vm1, %v2448_v7 }
 0x1b0   : > { %275 = vst.msk [vmem:[#allocation3 + $0xb8] sm:$0xff] %vm219_vm1, %v2448_v7 }
 0x1b1   : > { %276 = vst.msk [vmem:[#allocation3 + $0xc0] sm:$0xff] %vm219_vm1, %v2448_v7 }
 0x1b2   : > { %277 = vst.msk [vmem:[#allocation3 + $0xc8] sm:$0xff] %vm219_vm1, %v2448_v7 }
 0x1b3   : > { %278 = vst.msk [vmem:[#allocation3 + $0xd0] sm:$0xff] %vm219_vm1, %v2448_v7 }
 0x1b4   : > { %279 = vst.msk [vmem:[#allocation3 + $0xd8] sm:$0xff] %vm219_vm1, %v2448_v7 }
 0x1b5   : > { %280 = vst.msk [vmem:[#allocation3 + $0xe0] sm:$0xff] %vm219_vm1, %v2448_v7 }
 0x1b6   : > { %281 = vst.msk [vmem:[#allocation3 + $0xe8] sm:$0xff] %vm219_vm1, %v2448_v7 }
 0x1b7   : > { %282 = vst.msk [vmem:[#allocation3 + $0xf0] sm:$0xff] %vm219_vm1, %v2448_v7 }
 0x1b8   : > { %283 = vst.msk [vmem:[#allocation3 + $0xf8] sm:$0xff] %vm219_vm1, %v2448_v7 }
 0x1b9   : > { %v3279_v5 = vpop.xlane.xlu1 %731 }
 0x1ba   : > { %v3277_v61 = vpop.xlane.xlu2 %717  ;;  %vm733_vm11 = vcmp.eq.f32.partialorder %v3017_v58, %v3279_v5 }
 0x1bb   : > { %vm719_vm9 = vcmp.eq.f32.partialorder %v3019_v10, %v3277_v61  ;;  %v734_v22 = vsel %vm733_vm11, %v729_v4, inf  ;;  %vm618_vm11 = vcmp.eq.f32.partialorder %v2667_v2, %v2939_v56 }
 0x1bc   : > { %v720_v16 = vsel %vm719_vm9, %v715_v54, inf  ;;  %735 = vmin.xlane.f32.xlu2 %v734_v22  ;;  %v797_v54 = vand.u32 65535, %v3157_v60  ;;  %v755_v60 = vand.u32 65535, %v3141_v3  ;;  %v3320_v4 = vsel %vm618_vm11, %v2788_v50, 1073741824  ;;  %v1183_v22 = vld [vmem:[#allocation3] sm:$0xff] }
 0x1bd   : > { %721 = vmin.xlane.f32.xlu0 %v720_v16  ;;  %v826_v2 = vshra.s32 %v3320_v4, 16 }
 0x1be   : > { %v799_v6 = vcvt.s32.f32 %v797_v54  ;;  %v769_v54 = vand.u32 65535, %v3248_v55 }
 0x1c0   : > { %v771_v7 = vcvt.s32.f32 %v769_v54 }
 0x1d2   : > { %v3289_v9 = vpop.xlane.xlu2 %759 }
 0x1d3   : > { %vm761_vm9 = vcmp.eq.f32.partialorder %v3148_v37, %v3289_v9  ;;  %v3330_v37 = vcvt.s32.f32 %v826_v2 }
 0x1da   : > { %v3300_v10 = vpop.xlane.xlu2 %801 }
 0x1db   : > { %vm803_vm5 = vcmp.eq.f32.partialorder %v3191_v0, %v3300_v10  ;;  %v757_v0 = vcvt.s32.f32 %v755_v60  ;;  %v808_v33 = vcvt.f32.s32 %v3300_v10 }
 0x1dc   : > { %v804_v58 = vsel %vm803_vm5, %v799_v6, inf }
 0x1dd   : > { %805 = vmin.xlane.f32.xlu0 %v804_v58  ;;  %v762_v3 = vsel %vm761_vm9, %v757_v0, inf  ;;  %v3342_v58 = vpop.xlane.xlu0 %745  ;;  %v696_v0 = vcvt.f32.s32 %v3259_v32  ;;  %v783_v32 = vand.u32 65535, %v3264_v43  ;;  %v1185_v43 = vld [vmem:[#allocation3 + $0x10] sm:$0xff] }
 0x1de   : > { %vm747_vm11 = vcmp.eq.f32.partialorder %v3101_v8, %v3342_v58 }
 0x1e5   : > { %763 = vmin.xlane.f32.xlu0 %v762_v3 }
 0x1ed   : > { %829 = vmin.xlane.f32.xlu0 %v3330_v37 }
 0x208   : > { %v680_v57 = vpop.xlane.xlu1 %679 }
 0x209   : > { %v681_v47 = vcvt.f32.s32 %v680_v57 }
 0x20b   : > { %v684_v16 = vadd.s32 %v683_v31, %v681_v47  ;;  %v697_v31 = vshll.u32 %v696_v0, 16 }
 0x20d   : > { %v1215_v6 = vsel %vm1151_vm4, %v684_v16, %v1183_v22 }
 0x20e   : > { %1248 = vst.msk [vmem:[#allocation3] sm:$0xff] %vm219_vm1, %v1215_v6  ;;  %v710_v6 = vcvt.f32.s32 %v3268_v28 }
 0x210   : > { %v3344_v60 = vpop.xlane.xlu1 %773 }
 0x211   : > { %vm775_vm5 = vcmp.eq.f32.partialorder %v3253_v11, %v3344_v60  ;;  %v1184_v11 = vld [vmem:[#allocation3 + $0x8] sm:$0xff] }
 0x212   : > { %v3348_v39 = vsel %vm775_vm5, %v771_v7, inf }
 0x215   : > { %v1379_v3 = vld [vmem:[#allocation3] sm:$0xff] }
 0x216   : > { %v1411_v55 = vrot.slane %v1379_v3, 1  ;;  %v1412_v2 = vrot.slane %v1379_v3, 2  ;;  %v1413_v25 = vrot.slane %v1379_v3, 3  ;;  %1635 = vst [vmem:[#allocation1] ss:$9 sm:$0xff] %v1379_v3  ;;  %v1414_v49 = vrot.slane %v1379_v3, 4 }
 0x217   : > { %v1415_v53 = vrot.slane %v1379_v3, 5  ;;  %v1416_v47 = vrot.slane %v1379_v3, 6  ;;  %v1417_v16 = vrot.slane %v1379_v3, 7  ;;  %v785_v3 = vcvt.s32.f32 %v783_v32 }
 0x218   : > { %1637 = vst [vmem:[#allocation1 + $0x1] ss:$9 sm:$0xff] %v1411_v55  ;;  %v694_v57 = vpop.xlane.xlu0 %693  ;;  %v738_v32 = vcvt.f32.s32 %v3279_v5 }
 0x219   : > { %1639 = vst [vmem:[#allocation1 + $0x2] ss:$9 sm:$0xff] %v1412_v2  ;;  %v695_v22 = vcvt.f32.s32 %v694_v57  ;;  %v711_v2 = vshll.u32 %v710_v6, 16 }
 0x21a   : > { %1641 = vst [vmem:[#allocation1 + $0x3] ss:$9 sm:$0xff] %v1413_v25 }
 0x21b   : > { %1643 = vst [vmem:[#allocation1 + $0x4] ss:$9 sm:$0xff] %v1414_v49  ;;  %v698_v54 = vadd.s32 %v697_v31, %v695_v22 }
 0x21c   : > { %1645 = vst [vmem:[#allocation1 + $0x5] ss:$9 sm:$0xff] %v1415_v53  ;;  %v741_v53 = vand.u32 65535, %v3096_v35 }
 0x21d   : > { %1647 = vst [vmem:[#allocation1 + $0x6] ss:$9 sm:$0xff] %v1416_v47  ;;  %v1216_v7 = vsel %vm1152_vm10, %v698_v54, %v1184_v11  ;;  %vm617_vm10 = vcmp.eq.f32.partialorder %v2664_v1, %v2941_v45  ;;  %v724_v1 = vcvt.f32.s32 %v3277_v61 }
 0x21e   : > { %1649 = vst [vmem:[#allocation1 + $0x7] ss:$9 sm:$0xff] %v1417_v16  ;;  %v743_v22 = vcvt.s32.f32 %v741_v53  ;;  %v3376_v11 = vsel %vm617_vm10, %v2788_v50, 1073741824 }
 0x21f   : > { %1249 = vst.msk [vmem:[#allocation3 + $0x8] sm:$0xff] %vm219_vm1, %v1216_v7  ;;  %v708_v0 = vpop.xlane.xlu1 %707  ;;  %v812_v8 = vshra.s32 %v3376_v11, 16  ;;  %v739_v7 = vshll.u32 %v738_v32, 16  ;;  %v725_v53 = vshll.u32 %v724_v1, 16  ;;  %v809_v1 = vshll.u32 %v808_v33, 16 }
 0x220   : > { %v3357_v55 = vpop.xlane.xlu0 %787  ;;  %v709_v25 = vcvt.f32.s32 %v708_v0  ;;  %v748_v41 = vsel %vm747_vm11, %v743_v22, inf }
 0x221   : > { %vm789_vm4 = vcmp.eq.f32.partialorder %v3272_v44, %v3357_v55 }
 0x222   : > { %v790_v49 = vsel %vm789_vm4, %v785_v3, inf  ;;  %v712_v28 = vadd.s32 %v711_v2, %v709_v25  ;;  %v3380_v2 = vcvt.s32.f32 %v812_v8  ;;  %v1187_v25 = vld [vmem:[#allocation3 + $0x20] sm:$0xff] }
 0x223   : > { %791 = vmin.xlane.f32.xlu1 %v790_v49 }
 0x224   : > { %v1217_v15 = vsel %vm1153_vm13, %v712_v28, %v1185_v43 }
 0x225   : > { %v3367_v18 = vld [vmem:[#allocation1] sm:$0xff]  ;;  %1250 = vst.msk [vmem:[#allocation3 + $0x10] sm:$0xff] %vm219_vm1, %v1217_v15 }
 0x226   : > { %v1380_v57 = vld [vmem:[#allocation3 + $0x8] sm:$0xff] }
 0x227   : > { %v1418_v31 = vrot.slane %v1380_v57, 1  ;;  %v1419_v44 = vrot.slane %v1380_v57, 2  ;;  %v1420_v47 = vrot.slane %v1380_v57, 3  ;;  %1651 = vst [vmem:[#allocation1] ss:$9 sm:$0xff] %v1380_v57  ;;  %v1421_v35 = vrot.slane %v1380_v57, 4 }
 0x228   : > { %v1422_v16 = vrot.slane %v1380_v57, 5  ;;  %v1423_v30 = vrot.slane %v1380_v57, 6  ;;  %v1424_v54 = vrot.slane %v1380_v57, 7 }
 0x229   : > { %1652 = vst [vmem:[#allocation1 + $0x1] ss:$9 sm:$0xff] %v1418_v31 }
 0x22a   : > { %1653 = vst [vmem:[#allocation1 + $0x2] ss:$9 sm:$0xff] %v1419_v44 }
 0x22b   : > { %1654 = vst [vmem:[#allocation1 + $0x3] ss:$9 sm:$0xff] %v1420_v47  ;;  %749 = vmin.xlane.f32.xlu1 %v748_v41 }
 0x22c   : > { %1655 = vst [vmem:[#allocation1 + $0x4] ss:$9 sm:$0xff] %v1421_v35  ;;  %v1381_v43 = vld [vmem:[#allocation3 + $0x10] sm:$0xff]  ;;  %v1186_v35 = vld [vmem:[#allocation3 + $0x18] sm:$0xff] }
 0x22d   : > { %1656 = vst [vmem:[#allocation1 + $0x5] ss:$9 sm:$0xff] %v1422_v16  ;;  %v1425_v57 = vrot.slane %v1381_v43, 1  ;;  %v1426_v31 = vrot.slane %v1381_v43, 2  ;;  %v1427_v44 = vrot.slane %v1381_v43, 3  ;;  %v1428_v47 = vrot.slane %v1381_v43, 4 }
 0x22e   : > { %1657 = vst [vmem:[#allocation1 + $0x6] ss:$9 sm:$0xff] %v1423_v30  ;;  %v1429_v22 = vrot.slane %v1381_v43, 5  ;;  %v1430_v16 = vrot.slane %v1381_v43, 6  ;;  %v1431_v63 = vrot.slane %v1381_v43, 7 }
 0x22f   : > { %1658 = vst [vmem:[#allocation1 + $0x7] ss:$9 sm:$0xff] %v1424_v54  ;;  %v736_v6 = vpop.xlane.xlu2 %735 }
 0x230   : > { %v737_v0 = vcvt.f32.s32 %v736_v6  ;;  %v722_v3 = vpop.xlane.xlu0 %721 }
 0x231   : > { %v723_v28 = vcvt.f32.s32 %v722_v3 }
 0x232   : > { %v740_v49 = vadd.s32 %v739_v7, %v737_v0 }
 0x233   : > { %815 = vmin.xlane.f32.xlu1 %v3380_v2  ;;  %v726_v61 = vadd.s32 %v725_v53, %v723_v28 }
 0x234   : > { %v1219_v5 = vsel %vm1155_vm12, %v740_v49, %v1187_v25 }
 0x235   : > { %1252 = vst.msk [vmem:[#allocation3 + $0x20] sm:$0xff] %vm219_vm1, %v1219_v5  ;;  %v1218_v51 = vsel %vm1154_vm6, %v726_v61, %v1186_v35  ;;  %v766_v5 = vcvt.f32.s32 %v3289_v9  ;;  %v1189_v9 = vld [vmem:[#allocation3 + $0x30] sm:$0xff]  ;;  %vm620_vm6 = vcmp.eq.f32.partialorder %v2706_v20, %v3067_v38  ;;  %v794_v20 = vcvt.f32.s32 %v3357_v55 }
 0x236   : > { %v3387_v15 = vld [vmem:[#allocation1] sm:$0xff]  ;;  %1251 = vst.msk [vmem:[#allocation3 + $0x18] sm:$0xff] %vm219_vm1, %v1218_v51  ;;  %v825_v51 = vand.u32 65535, %v3320_v4  ;;  %v3416_v4 = vsel %vm620_vm6, %v2788_v50, 1073741824  ;;  %v811_v55 = vand.u32 65535, %v3376_v11 }
 0x237   : > { %1660 = vst [vmem:[#allocation1] ss:$9 sm:$0xff] %v1381_v43  ;;  %v1192_v43 = vld [vmem:[#allocation3 + $0x48] sm:$0xff]  ;;  %v854_v21 = vshra.s32 %v3416_v4, 16 }
 0x238   : > { %1661 = vst [vmem:[#allocation1 + $0x1] ss:$9 sm:$0xff] %v1425_v57 }
 0x239   : > { %1662 = vst [vmem:[#allocation1 + $0x2] ss:$9 sm:$0xff] %v1426_v31  ;;  %v3419_v19 = vcvt.s32.f32 %v854_v21 }
 0x23a   : > { %1663 = vst [vmem:[#allocation1 + $0x3] ss:$9 sm:$0xff] %v1427_v44 }
 0x23b   : > { %1664 = vst [vmem:[#allocation1 + $0x4] ss:$9 sm:$0xff] %v1428_v47  ;;  %v767_v47 = vshll.u32 %v766_v5, 16 }
 0x23c   : > { %1665 = vst [vmem:[#allocation1 + $0x5] ss:$9 sm:$0xff] %v1429_v22  ;;  %v1383_v49 = vld [vmem:[#allocation3 + $0x20] sm:$0xff] }
 0x23d   : > { %1666 = vst [vmem:[#allocation1 + $0x6] ss:$9 sm:$0xff] %v1430_v16  ;;  %v1382_v41 = vld [vmem:[#allocation3 + $0x18] sm:$0xff]  ;;  %v1439_v57 = vrot.slane %v1383_v49, 1  ;;  %v1440_v10 = vrot.slane %v1383_v49, 2  ;;  %v1441_v44 = vrot.slane %v1383_v49, 3 }
 0x23e   : > { %1667 = vst [vmem:[#allocation1 + $0x7] ss:$9 sm:$0xff] %v1431_v63  ;;  %v1432_v54 = vrot.slane %v1382_v41, 1  ;;  %v1433_v32 = vrot.slane %v1382_v41, 2  ;;  %v1434_v8 = vrot.slane %v1382_v41, 3  ;;  %v1435_v6 = vrot.slane %v1382_v41, 4 }
 0x23f   : > { %v1436_v7 = vrot.slane %v1382_v41, 5  ;;  %v1437_v0 = vrot.slane %v1382_v41, 6  ;;  %v1438_v3 = vrot.slane %v1382_v41, 7  ;;  %v1442_v35 = vrot.slane %v1383_v49, 4 }
 0x240   : > { %v1443_v16 = vrot.slane %v1383_v49, 5  ;;  %v1444_v63 = vrot.slane %v1383_v49, 6  ;;  %v1445_v40 = vrot.slane %v1383_v49, 7 }
 0x245   : > { %v3394_v30 = vld [vmem:[#allocation1] sm:$0xff] }
 0x246   : > { %1669 = vst [vmem:[#allocation1] ss:$9 sm:$0xff] %v1382_v41 }
 0x247   : > { %1670 = vst [vmem:[#allocation1 + $0x1] ss:$9 sm:$0xff] %v1432_v54 }
 0x248   : > { %1671 = vst [vmem:[#allocation1 + $0x2] ss:$9 sm:$0xff] %v1433_v32  ;;  %v827_v32 = vcvt.s32.f32 %v825_v51 }
 0x249   : > { %1672 = vst [vmem:[#allocation1 + $0x3] ss:$9 sm:$0xff] %v1434_v8 }
 0x24a   : > { %1673 = vst [vmem:[#allocation1 + $0x4] ss:$9 sm:$0xff] %v1435_v6 }
 0x24b   : > { %1674 = vst [vmem:[#allocation1 + $0x5] ss:$9 sm:$0xff] %v1436_v7  ;;  %v795_v7 = vshll.u32 %v794_v20, 16 }
 0x24c   : > { %1675 = vst [vmem:[#allocation1 + $0x6] ss:$9 sm:$0xff] %v1437_v0 }
 0x24d   : > { %1676 = vst [vmem:[#allocation1 + $0x7] ss:$9 sm:$0xff] %v1438_v3  ;;  %v1191_v3 = vld [vmem:[#allocation3 + $0x40] sm:$0xff] }
 0x250   : > { %v806_v42 = vpop.xlane.xlu0 %805 }
 0x251   : > { %v807_v25 = vcvt.f32.s32 %v806_v42 }
 0x253   : > { %v810_v28 = vadd.s32 %v809_v1, %v807_v25 }
 0x254   : > { %v3401_v31 = vld [vmem:[#allocation1] sm:$0xff] }
 0x255   : > { %v1224_v53 = vsel %vm1160_vm14, %v810_v28, %v1192_v43  ;;  %1678 = vst [vmem:[#allocation1] ss:$9 sm:$0xff] %v1383_v49  ;;  %v1188_v49 = vld [vmem:[#allocation3 + $0x28] sm:$0xff]  ;;  %vm622_vm14 = vcmp.eq.f32.partialorder %v2750_v34, %v3164_v12 }
 0x256   : > { %1257 = vst.msk [vmem:[#allocation3 + $0x48] sm:$0xff] %vm219_vm1, %v1224_v53  ;;  %v813_v53 = vcvt.s32.f32 %v811_v55 }
 0x257   : > { %1679 = vst [vmem:[#allocation1 + $0x1] ss:$9 sm:$0xff] %v1439_v57 }
 0x258   : > { %v764_v61 = vpop.xlane.xlu0 %763  ;;  %1680 = vst [vmem:[#allocation1 + $0x2] ss:$9 sm:$0xff] %v1440_v10 }
 0x259   : > { %v765_v22 = vcvt.f32.s32 %v764_v61  ;;  %1681 = vst [vmem:[#allocation1 + $0x3] ss:$9 sm:$0xff] %v1441_v44 }
 0x25a   : > { %1682 = vst [vmem:[#allocation1 + $0x4] ss:$9 sm:$0xff] %v1442_v35 }
 0x25b   : > { %v768_v36 = vadd.s32 %v767_v47, %v765_v22  ;;  %1683 = vst [vmem:[#allocation1 + $0x5] ss:$9 sm:$0xff] %v1443_v16 }
 0x25c   : > { %1684 = vst [vmem:[#allocation1 + $0x6] ss:$9 sm:$0xff] %v1444_v63 }
 0x25d   : > { %v1221_v41 = vsel %vm1157_vm7, %v768_v36, %v1189_v9  ;;  %1685 = vst [vmem:[#allocation1 + $0x7] ss:$9 sm:$0xff] %v1445_v40  ;;  %vm619_vm7 = vcmp.eq.f32.partialorder %v2694_v14, %v3037_v62 }
 0x25e   : > { %1254 = vst.msk [vmem:[#allocation3 + $0x30] sm:$0xff] %vm219_vm1, %v1221_v41 }
 0x260   : > { %v3411_v54 = vpop.xlane.xlu0 %829 }
 0x261   : > { %vm831_vm13 = vcmp.eq.f32.partialorder %v3330_v37, %v3411_v54  ;;  %v752_v37 = vcvt.f32.s32 %v3342_v58 }
 0x262   : > { %v832_v8 = vsel %vm831_vm13, %v827_v32, inf  ;;  %v836_v32 = vcvt.f32.s32 %v3411_v54 }
 0x263   : > { %833 = vmin.xlane.f32.xlu1 %v832_v8  ;;  %v753_v25 = vshll.u32 %v752_v37, 16 }
 0x264   : > { %v3437_v52 = vld [vmem:[#allocation1] sm:$0xff]  ;;  %v837_v21 = vshll.u32 %v836_v32, 16 }
 0x265   : > { %v1385_v14 = vld [vmem:[#allocation3 + $0x30] sm:$0xff] }
 0x266   : > { %v1453_v16 = vrot.slane %v1385_v14, 1  ;;  %v1454_v63 = vrot.slane %v1385_v14, 2  ;;  %v1455_v36 = vrot.slane %v1385_v14, 3  ;;  %v1456_v40 = vrot.slane %v1385_v14, 4 }
 0x267   : > { %v1457_v51 = vrot.slane %v1385_v14, 5  ;;  %v1459_v41 = vrot.slane %v1385_v14, 7 }
 0x26b   : > { %857 = vmin.xlane.f32.xlu1 %v3419_v19 }
 0x296   : > { %v792_v6 = vpop.xlane.xlu1 %791 }
 0x297   : > { %v793_v0 = vcvt.f32.s32 %v792_v6  ;;  %v1194_v6 = vld [vmem:[#allocation3 + $0x58] sm:$0xff] }
 0x299   : > { %v796_v33 = vadd.s32 %v795_v7, %v793_v0  ;;  %v853_v0 = vand.u32 65535, %v3416_v4 }
 0x29b   : > { %v1223_v42 = vsel %vm1159_vm2, %v796_v33, %v1191_v3  ;;  %v855_v37 = vcvt.s32.f32 %v853_v0 }
 0x29c   : > { %1256 = vst.msk [vmem:[#allocation3 + $0x40] sm:$0xff] %vm219_vm1, %v1223_v42  ;;  %v3461_v42 = vsel %vm622_vm14, %v2788_v50, 1073741824 }
 0x29d   : > { %v882_v4 = vshra.s32 %v3461_v42, 16 }
 0x29e   : > { %v750_v1 = vpop.xlane.xlu1 %749 }
 0x29f   : > { %v751_v43 = vcvt.f32.s32 %v750_v1  ;;  %v3464_v23 = vcvt.s32.f32 %v882_v4 }
 0x2a1   : > { %v754_v28 = vadd.s32 %v753_v25, %v751_v43  ;;  %v1193_v43 = vld [vmem:[#allocation3 + $0x50] sm:$0xff] }
 0x2a3   : > { %v1220_v5 = vsel %vm1156_vm3, %v754_v28, %v1188_v49 }
 0x2a4   : > { %1253 = vst.msk [vmem:[#allocation3 + $0x28] sm:$0xff] %vm219_vm1, %v1220_v5 }
 0x2a6   : > { %v3433_v58 = vpop.xlane.xlu1 %815 }
 0x2a7   : > { %vm817_vm2 = vcmp.eq.f32.partialorder %v3380_v2, %v3433_v58  ;;  %v3442_v2 = vsel %vm619_vm7, %v2788_v50, 1073741824  ;;  %v822_v56 = vcvt.f32.s32 %v3433_v58 }
 0x2a8   : > { %v818_v46 = vsel %vm817_vm2, %v813_v53, inf  ;;  %v840_v35 = vshra.s32 %v3442_v2, 16 }
 0x2a9   : > { %819 = vmin.xlane.f32.xlu2 %v818_v46  ;;  %v823_v1 = vshll.u32 %v822_v56, 16  ;;  %v1190_v46 = vld [vmem:[#allocation3 + $0x38] sm:$0xff] }
 0x2aa   : > { %v842_v22 = vcvt.s32.f32 %v840_v35 }
 0x2ab   : > { %v1384_v57 = vld [vmem:[#allocation3 + $0x28] sm:$0xff] }
 0x2ac   : > { %v1446_v10 = vrot.slane %v1384_v57, 1  ;;  %v1447_v44 = vrot.slane %v1384_v57, 2  ;;  %v1448_v11 = vrot.slane %v1384_v57, 3  ;;  %1687 = vst [vmem:[#allocation1] ss:$9 sm:$0xff] %v1384_v57  ;;  %v1449_v48 = vrot.slane %v1384_v57, 4 }
 0x2ad   : > { %v1450_v29 = vrot.slane %v1384_v57, 5  ;;  %v1451_v61 = vrot.slane %v1384_v57, 6  ;;  %v1452_v47 = vrot.slane %v1384_v57, 7 }
 0x2ae   : > { %1688 = vst [vmem:[#allocation1 + $0x1] ss:$9 sm:$0xff] %v1446_v10  ;;  %v839_v10 = vand.u32 65535, %v3442_v2  ;;  %v4001_v2 = vld [vmem:[#allocation9_spill] sm:$0xff] }
 0x2af   : > { %1689 = vst [vmem:[#allocation1 + $0x2] ss:$9 sm:$0xff] %v1447_v44  ;;  %vm624_vm12 = vcmp.eq.f32.partialorder %v4001_v2, %v2851_v17 }
 0x2b0   : > { %1690 = vst [vmem:[#allocation1 + $0x3] ss:$9 sm:$0xff] %v1448_v11  ;;  %v841_v24 = vcvt.s32.f32 %v839_v10 }
 0x2b1   : > { %1691 = vst [vmem:[#allocation1 + $0x4] ss:$9 sm:$0xff] %v1449_v48  ;;  %777 = vmin.xlane.f32.xlu2 %v3348_v39  ;;  %v1458_v39 = vrot.slane %v1385_v14, 6 }
 0x2b2   : > { %1692 = vst [vmem:[#allocation1 + $0x5] ss:$9 sm:$0xff] %v1450_v29 }
 0x2b3   : > { %1693 = vst [vmem:[#allocation1 + $0x6] ss:$9 sm:$0xff] %v1451_v61 }
 0x2b4   : > { %1694 = vst [vmem:[#allocation1 + $0x7] ss:$9 sm:$0xff] %v1452_v47 }
 0x2b9   : > { %843 = vmin.xlane.f32.xlu2 %v842_v22 }
 0x2bb   : > { %v3446_v9 = vld [vmem:[#allocation1] sm:$0xff] }
 0x2bc   : > { %1696 = vst [vmem:[#allocation1] ss:$9 sm:$0xff] %v1385_v14 }
 0x2bd   : > { %1697 = vst [vmem:[#allocation1 + $0x1] ss:$9 sm:$0xff] %v1453_v16  ;;  %v3494_v16 = vsel %vm624_vm12, %v2788_v50, 1073741824 }
 0x2be   : > { %1698 = vst [vmem:[#allocation1 + $0x2] ss:$9 sm:$0xff] %v1454_v63  ;;  %v910_v63 = vshra.s32 %v3494_v16, 16 }
 0x2bf   : > { %1699 = vst [vmem:[#allocation1 + $0x3] ss:$9 sm:$0xff] %v1455_v36  ;;  %v1387_v36 = vld [vmem:[#allocation3 + $0x40] sm:$0xff] }
 0x2c0   : > { %1700 = vst [vmem:[#allocation1 + $0x4] ss:$9 sm:$0xff] %v1456_v40  ;;  %v3498_v40 = vcvt.s32.f32 %v910_v63  ;;  %v1469_v32 = vrot.slane %v1387_v36, 3 }
 0x2c1   : > { %1701 = vst [vmem:[#allocation1 + $0x5] ss:$9 sm:$0xff] %v1457_v51  ;;  %v1467_v51 = vrot.slane %v1387_v36, 1 }
 0x2c2   : > { %1702 = vst [vmem:[#allocation1 + $0x6] ss:$9 sm:$0xff] %v1458_v39 }
 0x2c3   : > { %1703 = vst [vmem:[#allocation1 + $0x7] ss:$9 sm:$0xff] %v1459_v41  ;;  %v1468_v41 = vrot.slane %v1387_v36, 2 }
 0x2ca   : > { %v3486_v11 = vld [vmem:[#allocation1] sm:$0xff] }
 0x2d6   : > { %v834_v8 = vpop.xlane.xlu1 %833 }
 0x2d7   : > { %v835_v20 = vcvt.f32.s32 %v834_v8  ;;  %v1470_v8 = vrot.slane %v1387_v36, 4 }
 0x2d9   : > { %v838_v7 = vadd.s32 %v837_v21, %v835_v20  ;;  %v1471_v21 = vrot.slane %v1387_v36, 5  ;;  %v1472_v20 = vrot.slane %v1387_v36, 6 }
 0x2db   : > { %v1226_v3 = vsel %vm1162_vm15, %v838_v7, %v1194_v6  ;;  %vm621_vm15 = vcmp.eq.f32.partialorder %v2723_v26, %v3110_v27  ;;  %v1473_v6 = vrot.slane %v1387_v36, 7  ;;  %v1388_v7 = vld [vmem:[#allocation3 + $0x48] sm:$0xff] }
 0x2dc   : > { %1259 = vst.msk [vmem:[#allocation3 + $0x58] sm:$0xff] %vm219_vm1, %v1226_v3  ;;  %v3484_v44 = vsel %vm621_vm15, %v2788_v50, 1073741824  ;;  %v1474_v0 = vrot.slane %v1388_v7, 1  ;;  %v1477_v4 = vrot.slane %v1388_v7, 4 }
 0x2dd   : > { %v868_v26 = vshra.s32 %v3484_v44, 16 }
 0x2de   : > { %v3456_v33 = vpop.xlane.xlu1 %857 }
 0x2df   : > { %vm859_vm3 = vcmp.eq.f32.partialorder %v3419_v19, %v3456_v33  ;;  %v780_v19 = vcvt.f32.s32 %v3344_v60  ;;  %v3491_v14 = vcvt.s32.f32 %v868_v26  ;;  %v864_v56 = vcvt.f32.s32 %v3456_v33 }
 0x2e0   : > { %v860_v54 = vsel %vm859_vm3, %v855_v37, inf  ;;  %v1475_v37 = vrot.slane %v1388_v7, 2 }
 0x2e1   : > { %861 = vmin.xlane.f32.xlu2 %v860_v54  ;;  %v781_v5 = vshll.u32 %v780_v19, 16  ;;  %v1476_v54 = vrot.slane %v1388_v7, 3 }
 0x2e9   : > { %885 = vmin.xlane.f32.xlu2 %v3464_v23 }
 0x31c   : > { %v820_v34 = vpop.xlane.xlu2 %819 }
 0x31d   : > { %v821_v25 = vcvt.f32.s32 %v820_v34  ;;  %v1478_v34 = vrot.slane %v1388_v7, 5 }
 0x31f   : > { %v824_v49 = vadd.s32 %v823_v1, %v821_v25  ;;  %v1479_v1 = vrot.slane %v1388_v7, 6  ;;  %v1480_v25 = vrot.slane %v1388_v7, 7 }
 0x321   : > { %v1225_v28 = vsel %vm1161_vm0, %v824_v49, %v1193_v43  ;;  %v865_v49 = vshll.u32 %v864_v56, 16 }
 0x322   : > { %1258 = vst.msk [vmem:[#allocation3 + $0x50] sm:$0xff] %vm219_vm1, %v1225_v28  ;;  %v1196_v28 = vld [vmem:[#allocation3 + $0x68] sm:$0xff] }
 0x324   : > { %v778_v55 = vpop.xlane.xlu2 %777 }
 0x325   : > { %v779_v53 = vcvt.f32.s32 %v778_v55 }
 0x327   : > { %v782_v57 = vadd.s32 %v781_v5, %v779_v53  ;;  %v4002_v5 = vld [vmem:[#allocation41_spill] sm:$0xff] }
 0x329   : > { %v1222_v58 = vsel %vm1158_vm8, %v782_v57, %v1190_v46  ;;  %vm4003_vm8 = vcmp.gt.f32.partialorder %v3067_v38, %v4002_v5  ;;  %v1389_v46 = vld [vmem:[#allocation3 + $0x50] sm:$0xff]  ;;  %v1390_v38 = vld [vmem:[#allocation3 + $0x58] sm:$0xff]  ;;  %v909_v5 = vand.u32 65535, %v3494_v16 }
 0x32a   : > { %1255 = vst.msk [vmem:[#allocation3 + $0x38] sm:$0xff] %vm219_vm1, %v1222_v58  ;;  %v1481_v33 = vrot.slane %v1389_v46, 1  ;;  %v1482_v58 = vrot.slane %v1389_v46, 2  ;;  %v1483_v10 = vrot.slane %v1389_v46, 3  ;;  %v1490_v26 = vrot.slane %v1390_v38, 3 }
 0x32b   : > { %v1492_v2 = vrot.slane %v1390_v38, 5 }
 0x32c   : > { %v3480_v45 = vpop.xlane.xlu2 %843 }
 0x32d   : > { %vm845_vm0 = vcmp.eq.f32.partialorder %v842_v22, %v3480_v45  ;;  %v850_v63 = vcvt.f32.s32 %v3480_v45 }
 0x32e   : > { %v846_v60 = vsel %vm845_vm0, %v841_v24, inf  ;;  %v1484_v24 = vrot.slane %v1389_v46, 4 }
 0x32f   : > { %847 = vmin.xlane.f32.xlu0 %v846_v60  ;;  %v1485_v60 = vrot.slane %v1389_v46, 5 }
 0x331   : > { %v1386_v13 = vld [vmem:[#allocation3 + $0x38] sm:$0xff] }
 0x332   : > { %v1460_v59 = vrot.slane %v1386_v13, 1  ;;  %v1461_v48 = vrot.slane %v1386_v13, 2  ;;  %v1462_v29 = vrot.slane %v1386_v13, 3  ;;  %1705 = vst [vmem:[#allocation1] ss:$9 sm:$0xff] %v1386_v13  ;;  %v1463_v61 = vrot.slane %v1386_v13, 4 }
 0x333   : > { %v1464_v47 = vrot.slane %v1386_v13, 5  ;;  %v1465_v35 = vrot.slane %v1386_v13, 6  ;;  %v1466_v22 = vrot.slane %v1386_v13, 7  ;;  %v1486_v13 = vrot.slane %v1389_v46, 6 }
 0x334   : > { %1706 = vst [vmem:[#allocation1 + $0x1] ss:$9 sm:$0xff] %v1460_v59  ;;  %v1487_v59 = vrot.slane %v1389_v46, 7 }
 0x335   : > { %1707 = vst [vmem:[#allocation1 + $0x2] ss:$9 sm:$0xff] %v1461_v48  ;;  %v1488_v48 = vrot.slane %v1390_v38, 1 }
 0x336   : > { %1708 = vst [vmem:[#allocation1 + $0x3] ss:$9 sm:$0xff] %v1462_v29 }
 0x337   : > { %1709 = vst [vmem:[#allocation1 + $0x4] ss:$9 sm:$0xff] %v1463_v61  ;;  %871 = vmin.xlane.f32.xlu0 %v3491_v14  ;;  %v1489_v61 = vrot.slane %v1390_v38, 2 }
 0x338   : > { %1710 = vst [vmem:[#allocation1 + $0x5] ss:$9 sm:$0xff] %v1464_v47  ;;  %v1491_v47 = vrot.slane %v1390_v38, 4 }
 0x339   : > { %1711 = vst [vmem:[#allocation1 + $0x6] ss:$9 sm:$0xff] %v1465_v35  ;;  %v1493_v35 = vrot.slane %v1390_v38, 6 }
 0x33a   : > { %1712 = vst [vmem:[#allocation1 + $0x7] ss:$9 sm:$0xff] %v1466_v22  ;;  %v1494_v22 = vrot.slane %v1390_v38, 7 }
 0x33f   : > { %913 = vmin.xlane.f32.xlu0 %v3498_v40 }
 0x341   : > { %v3500_v39 = vld [vmem:[#allocation1] sm:$0xff] }
 0x342   : > { %1714 = vst [vmem:[#allocation1] ss:$9 sm:$0xff] %v1387_v36 }
 0x343   : > { %1715 = vst [vmem:[#allocation1 + $0x1] ss:$9 sm:$0xff] %v1467_v51  ;;  %v851_v51 = vshll.u32 %v850_v63, 16 }
 0x344   : > { %1716 = vst [vmem:[#allocation1 + $0x2] ss:$9 sm:$0xff] %v1468_v41 }
 0x345   : > { %1717 = vst [vmem:[#allocation1 + $0x3] ss:$9 sm:$0xff] %v1469_v32  ;;  %v1195_v32 = vld [vmem:[#allocation3 + $0x60] sm:$0xff] }
 0x346   : > { %1718 = vst [vmem:[#allocation1 + $0x4] ss:$9 sm:$0xff] %v1470_v8 }
 0x347   : > { %1719 = vst [vmem:[#allocation1 + $0x5] ss:$9 sm:$0xff] %v1471_v21  ;;  %v867_v21 = vand.u32 65535, %v3484_v44 }
 0x348   : > { %1720 = vst [vmem:[#allocation1 + $0x6] ss:$9 sm:$0xff] %v1472_v20  ;;  %v4004_v20 = vld [vmem:[#allocation38_spill] sm:$0xff] }
 0x349   : > { %1721 = vst [vmem:[#allocation1 + $0x7] ss:$9 sm:$0xff] %v1473_v6  ;;  %vm4005_vm9 = vcmp.gt.f32.partialorder %v3037_v62, %v4004_v20  ;;  %v4013_v20 = vld [vmem:[#allocation12_spill] sm:$0xff] }
 0x350   : > { %v3503_v3 = vld [vmem:[#allocation1] sm:$0xff] }
 0x351   : > { %1723 = vst [vmem:[#allocation1] ss:$9 sm:$0xff] %v1388_v7  ;;  %v4006_v7 = vld [vmem:[#allocation25_spill] sm:$0xff] }
 0x352   : > { %1724 = vst [vmem:[#allocation1 + $0x1] ss:$9 sm:$0xff] %v1474_v0  ;;  %v4007_v0 = vld [vmem:[#allocation7_spill] sm:$0xff] }
 0x353   : > { %1725 = vst [vmem:[#allocation1 + $0x2] ss:$9 sm:$0xff] %v1475_v37  ;;  %vm623_vm5 = vcmp.eq.f32.partialorder %v4007_v0, %v4006_v7 }
 0x354   : > { %1726 = vst [vmem:[#allocation1 + $0x3] ss:$9 sm:$0xff] %v1476_v54  ;;  %v862_v43 = vpop.xlane.xlu2 %861  ;;  %v869_v54 = vcvt.s32.f32 %v867_v21  ;;  %v4012_v21 = vld [vmem:[#allocation33_spill] sm:$0xff] }
 0x355   : > { %1727 = vst [vmem:[#allocation1 + $0x4] ss:$9 sm:$0xff] %v1477_v4  ;;  %v863_v19 = vcvt.f32.s32 %v862_v43  ;;  %v655_v4 = vsel %vm623_vm5, %v2788_v50, 1073741824  ;;  %vm625_vm13 = vcmp.eq.f32.partialorder %v4013_v20, %v4012_v21 }
 0x356   : > { %1728 = vst [vmem:[#allocation1 + $0x5] ss:$9 sm:$0xff] %v1478_v34  ;;  %v896_v34 = vshra.s32 %v655_v4, 16 }
 0x357   : > { %1729 = vst [vmem:[#allocation1 + $0x6] ss:$9 sm:$0xff] %v1479_v1  ;;  %v866_v55 = vadd.s32 %v865_v49, %v863_v19 }
 0x358   : > { %1730 = vst [vmem:[#allocation1 + $0x7] ss:$9 sm:$0xff] %v1480_v25 }
 0x359   : > { %v1228_v53 = vsel %vm4003_vm8, %v866_v55, %v1196_v28  ;;  %v898_v28 = vcvt.s32.f32 %v896_v34 }
 0x35a   : > { %1261 = vst.msk [vmem:[#allocation3 + $0x68] sm:$0xff] %vm219_vm1, %v1228_v53  ;;  %v4008_v53 = vld [vmem:[#allocation40_spill] sm:$0xff] }
 0x35f   : > { %v3510_v57 = vld [vmem:[#allocation1] sm:$0xff] }
 0x360   : > { %1732 = vst [vmem:[#allocation1] ss:$9 sm:$0xff] %v1389_v46  ;;  %v4009_v46 = vld [vmem:[#allocation14_spill] sm:$0xff] }
 0x361   : > { %1733 = vst [vmem:[#allocation1 + $0x1] ss:$9 sm:$0xff] %v1481_v33  ;;  %vm626_vm10 = vcmp.eq.f32.partialorder %v4009_v46, %v4008_v53  ;;  %v911_v33 = vcvt.s32.f32 %v909_v5 }
 0x362   : > { %1734 = vst [vmem:[#allocation1 + $0x2] ss:$9 sm:$0xff] %v1482_v58  ;;  %v1392_v58 = vld [vmem:[#allocation3 + $0x68] sm:$0xff] }
 0x363   : > { %1735 = vst [vmem:[#allocation1 + $0x3] ss:$9 sm:$0xff] %v1483_v10  ;;  %v1503_v16 = vrot.slane %v1392_v58, 2 }
 0x364   : > { %1736 = vst [vmem:[#allocation1 + $0x4] ss:$9 sm:$0xff] %v1484_v24  ;;  %v3531_v24 = vsel %vm626_vm10, %v2788_v50, 1073741824 }
 0x365   : > { %1737 = vst [vmem:[#allocation1 + $0x5] ss:$9 sm:$0xff] %v1485_v60  ;;  %v1502_v60 = vrot.slane %v1392_v58, 1 }
 0x366   : > { %1738 = vst [vmem:[#allocation1 + $0x6] ss:$9 sm:$0xff] %v1486_v13 }
 0x367   : > { %1739 = vst [vmem:[#allocation1 + $0x7] ss:$9 sm:$0xff] %v1487_v59  ;;  %v938_v59 = vshra.s32 %v3531_v24, 16 }
 0x36e   : > { %v3512_v29 = vld [vmem:[#allocation1] sm:$0xff] }
 0x36f   : > { %1741 = vst [vmem:[#allocation1] ss:$9 sm:$0xff] %v1390_v38  ;;  %v1504_v38 = vrot.slane %v1392_v58, 3 }
 0x370   : > { %1742 = vst [vmem:[#allocation1 + $0x1] ss:$9 sm:$0xff] %v1488_v48  ;;  %v1505_v48 = vrot.slane %v1392_v58, 4 }
 0x371   : > { %1743 = vst [vmem:[#allocation1 + $0x2] ss:$9 sm:$0xff] %v1489_v61  ;;  %v1506_v61 = vrot.slane %v1392_v58, 5 }
 0x372   : > { %1744 = vst [vmem:[#allocation1 + $0x3] ss:$9 sm:$0xff] %v1490_v26  ;;  %v1507_v26 = vrot.slane %v1392_v58, 6 }
 0x373   : > { %1745 = vst [vmem:[#allocation1 + $0x4] ss:$9 sm:$0xff] %v1491_v47  ;;  %v1508_v47 = vrot.slane %v1392_v58, 7 }
 0x374   : > { %1746 = vst [vmem:[#allocation1 + $0x5] ss:$9 sm:$0xff] %v1492_v2 }
 0x375   : > { %1747 = vst [vmem:[#allocation1 + $0x6] ss:$9 sm:$0xff] %v1493_v35 }
 0x376   : > { %1748 = vst [vmem:[#allocation1 + $0x7] ss:$9 sm:$0xff] %v1494_v22 }
 0x37d   : > { %v3524_v56 = vld [vmem:[#allocation1] sm:$0xff] }
 0x3a2   : > { %v848_v36 = vpop.xlane.xlu0 %847 }
 0x3a3   : > { %v849_v41 = vcvt.f32.s32 %v848_v36  ;;  %v1197_v36 = vld [vmem:[#allocation3 + $0x70] sm:$0xff] }
 0x3a5   : > { %v852_v8 = vadd.s32 %v851_v51, %v849_v41  ;;  %v895_v41 = vand.u32 65535, %v655_v4 }
 0x3a7   : > { %v1227_v6 = vsel %vm4005_vm9, %v852_v8, %v1195_v32  ;;  %v4010_v32 = vld [vmem:[#allocation44_spill] sm:$0xff]  ;;  %v897_v0 = vcvt.s32.f32 %v895_v41 }
 0x3a8   : > { %1260 = vst.msk [vmem:[#allocation3 + $0x60] sm:$0xff] %vm219_vm1, %v1227_v6  ;;  %vm4011_vm6 = vcmp.gt.f32.partialorder %v3110_v27, %v4010_v32  ;;  %v4018_v32 = vld [vmem:[#allocation23_spill] sm:$0xff] }
 0x3a9   : > { %vm4019_vm15 = vcmp.gt.f32.partialorder %v4006_v7, %v4018_v32 }
 0x3aa   : > { %v872_v37 = vpop.xlane.xlu0 %871 }
 0x3ab   : > { %vm873_vm4 = vcmp.eq.f32.partialorder %v3491_v14, %v872_v37  ;;  %v878_v2 = vcvt.f32.s32 %v872_v37  ;;  %v657_v37 = vsel %vm625_vm13, %v2788_v50, 1073741824 }
 0x3ac   : > { %v874_v45 = vsel %vm873_vm4, %v869_v54, inf  ;;  %v924_v34 = vshra.s32 %v657_v37, 16  ;;  %v923_v41 = vand.u32 65535, %v657_v37 }
 0x3ad   : > { %875 = vmin.xlane.f32.xlu1 %v874_v45  ;;  %v879_v22 = vshll.u32 %v878_v2, 16  ;;  %v886_v2 = vpop.xlane.xlu2 %885 }
 0x3ae   : > { %v926_v5 = vcvt.s32.f32 %v924_v34  ;;  %v925_v20 = vcvt.s32.f32 %v923_v41  ;;  %vm887_vm8 = vcmp.eq.f32.partialorder %v3464_v23, %v886_v2  ;;  %v4028_v41 = vld [vmem:[#allocation48_spill] sm:$0xff] }
 0x3af   : > { %v1391_v44 = vld [vmem:[#allocation3 + $0x60] sm:$0xff] }
 0x3b0   : > { %v1495_v1 = vrot.slane %v1391_v44, 1  ;;  %v1496_v62 = vrot.slane %v1391_v44, 2  ;;  %v1497_v25 = vrot.slane %v1391_v44, 3  ;;  %1750 = vst [vmem:[#allocation1] ss:$9 sm:$0xff] %v1391_v44  ;;  %v1498_v43 = vrot.slane %v1391_v44, 4 }
 0x3b1   : > { %v1499_v49 = vrot.slane %v1391_v44, 5  ;;  %v1500_v19 = vrot.slane %v1391_v44, 6  ;;  %v1501_v55 = vrot.slane %v1391_v44, 7 }
 0x3b2   : > { %1751 = vst [vmem:[#allocation1 + $0x1] ss:$9 sm:$0xff] %v1495_v1  ;;  %v914_v14 = vpop.xlane.xlu0 %913 }
 0x3b3   : > { %1752 = vst [vmem:[#allocation1 + $0x2] ss:$9 sm:$0xff] %v1496_v62  ;;  %vm915_vm11 = vcmp.eq.f32.partialorder %v3498_v40, %v914_v14  ;;  %v940_v40 = vcvt.s32.f32 %v938_v59  ;;  %v920_v44 = vcvt.f32.s32 %v914_v14  ;;  %v4016_v59 = vld [vmem:[#allocation43_spill] sm:$0xff] }
 0x3b4   : > { %1753 = vst [vmem:[#allocation1 + $0x3] ss:$9 sm:$0xff] %v1497_v25  ;;  %v916_v10 = vsel %vm915_vm11, %v911_v33, inf  ;;  %v1200_v33 = vld [vmem:[#allocation3 + $0x88] sm:$0xff]  ;;  %vm4029_vm11 = vcmp.gt.f32.partialorder %v3164_v12, %v4028_v41 }
 0x3b5   : > { %1754 = vst [vmem:[#allocation1 + $0x4] ss:$9 sm:$0xff] %v1498_v43  ;;  %899 = vmin.xlane.f32.xlu1 %v898_v28 }
 0x3b6   : > { %1755 = vst [vmem:[#allocation1 + $0x5] ss:$9 sm:$0xff] %v1499_v49 }
 0x3b7   : > { %1756 = vst [vmem:[#allocation1 + $0x6] ss:$9 sm:$0xff] %v1500_v19  ;;  %v921_v19 = vshll.u32 %v920_v44, 16  ;;  %v4020_v44 = vld [vmem:[#allocation39_spill] sm:$0xff] }
 0x3b8   : > { %1757 = vst [vmem:[#allocation1 + $0x7] ss:$9 sm:$0xff] %v1501_v55 }
 0x3bd   : > { %917 = vmin.xlane.f32.xlu1 %v916_v10  ;;  %v4014_v10 = vld [vmem:[#allocation28_spill] sm:$0xff] }
 0x3be   : > { %vm4015_vm7 = vcmp.gt.f32.partialorder %v2851_v17, %v4014_v10 }
 0x3bf   : > { %v3533_v13 = vld [vmem:[#allocation1] sm:$0xff] }
 0x3c0   : > { %1759 = vst [vmem:[#allocation1] ss:$9 sm:$0xff] %v1392_v58  ;;  %v937_v58 = vand.u32 65535, %v3531_v24 }
 0x3c1   : > { %1760 = vst [vmem:[#allocation1 + $0x1] ss:$9 sm:$0xff] %v1502_v60 }
 0x3c2   : > { %1761 = vst [vmem:[#allocation1 + $0x2] ss:$9 sm:$0xff] %v1503_v16  ;;  %v4017_v16 = vld [vmem:[#allocation16_spill] sm:$0xff] }
 0x3c3   : > { %1762 = vst [vmem:[#allocation1 + $0x3] ss:$9 sm:$0xff] %v1504_v38  ;;  %vm628_vm14 = vcmp.eq.f32.partialorder %v4017_v16, %v4016_v59 }
 0x3c4   : > { %1763 = vst [vmem:[#allocation1 + $0x4] ss:$9 sm:$0xff] %v1505_v48  ;;  %v939_v48 = vcvt.s32.f32 %v937_v58 }
 0x3c5   : > { %1764 = vst [vmem:[#allocation1 + $0x5] ss:$9 sm:$0xff] %v1506_v61  ;;  %941 = vmin.xlane.f32.xlu1 %v940_v40 }
 0x3c6   : > { %1765 = vst [vmem:[#allocation1 + $0x6] ss:$9 sm:$0xff] %v1507_v26  ;;  %v660_v26 = vsel %vm628_vm14, %v2788_v50, 1073741824 }
 0x3c7   : > { %1766 = vst [vmem:[#allocation1 + $0x7] ss:$9 sm:$0xff] %v1508_v47  ;;  %v966_v47 = vshra.s32 %v660_v26, 16 }
 0x3c9   : > { %v968_v24 = vcvt.s32.f32 %v966_v47  ;;  %v892_v47 = vcvt.f32.s32 %v886_v2  ;;  %v4031_v2 = vld [vmem:[#allocation17_spill] sm:$0xff] }
 0x3ce   : > { %v3543_v45 = vld [vmem:[#allocation1] sm:$0xff] }
 0x420   : > { %v876_v35 = vpop.xlane.xlu1 %875 }
 0x421   : > { %v877_v63 = vcvt.f32.s32 %v876_v35 }
 0x423   : > { %v880_v51 = vadd.s32 %v879_v22, %v877_v63 }
 0x425   : > { %v1229_v8 = vsel %vm4011_vm6, %v880_v51, %v1197_v36  ;;  %v1199_v36 = vld [vmem:[#allocation3 + $0x80] sm:$0xff] }
 0x426   : > { %1262 = vst.msk [vmem:[#allocation3 + $0x70] sm:$0xff] %vm219_vm1, %v1229_v8 }
 0x428   : > { %v900_v6 = vpop.xlane.xlu1 %899 }
 0x429   : > { %vm901_vm2 = vcmp.eq.f32.partialorder %v898_v28, %v900_v6  ;;  %v906_v35 = vcvt.f32.s32 %v900_v6 }
 0x42a   : > { %v902_v54 = vsel %vm901_vm2, %v897_v0, inf }
 0x42b   : > { %903 = vmin.xlane.f32.xlu2 %v902_v54  ;;  %v907_v22 = vshll.u32 %v906_v35, 16  ;;  %v881_v54 = vand.u32 65535, %v3461_v42 }
 0x42d   : > { %v1393_v4 = vld [vmem:[#allocation3 + $0x70] sm:$0xff]  ;;  %v883_v34 = vcvt.s32.f32 %v881_v54 }
 0x42e   : > { %v1509_v1 = vrot.slane %v1393_v4, 1  ;;  %v1510_v27 = vrot.slane %v1393_v4, 2  ;;  %v1511_v62 = vrot.slane %v1393_v4, 3  ;;  %1768 = vst [vmem:[#allocation1] ss:$9 sm:$0xff] %v1393_v4  ;;  %v1512_v25 = vrot.slane %v1393_v4, 4 }
 0x42f   : > { %v1513_v43 = vrot.slane %v1393_v4, 5  ;;  %v1514_v55 = vrot.slane %v1393_v4, 6  ;;  %v1515_v46 = vrot.slane %v1393_v4, 7  ;;  %v4021_v4 = vld [vmem:[#allocation15_spill] sm:$0xff] }
 0x430   : > { %1769 = vst [vmem:[#allocation1 + $0x1] ss:$9 sm:$0xff] %v1509_v1  ;;  %v918_v49 = vpop.xlane.xlu1 %917  ;;  %vm627_vm12 = vcmp.eq.f32.partialorder %v4021_v4, %v4020_v44 }
 0x431   : > { %1770 = vst [vmem:[#allocation1 + $0x2] ss:$9 sm:$0xff] %v1510_v27  ;;  %v919_v28 = vcvt.f32.s32 %v918_v49  ;;  %v1202_v27 = vld [vmem:[#allocation3 + $0x98] sm:$0xff] }
 0x432   : > { %1771 = vst [vmem:[#allocation1 + $0x3] ss:$9 sm:$0xff] %v1511_v62  ;;  %v888_v62 = vsel %vm887_vm8, %v883_v34, inf  ;;  %v4022_v49 = vld [vmem:[#allocation37_spill] sm:$0xff] }
 0x433   : > { %1772 = vst [vmem:[#allocation1 + $0x4] ss:$9 sm:$0xff] %v1512_v25  ;;  %v922_v14 = vadd.s32 %v921_v19, %v919_v28  ;;  %927 = vmin.xlane.f32.xlu2 %v926_v5  ;;  %v659_v25 = vsel %vm627_vm12, %v2788_v50, 1073741824  ;;  %vm4023_vm9 = vcmp.gt.f32.partialorder %v4008_v53, %v4022_v49  ;;  %v965_v28 = vand.u32 65535, %v660_v26 }
 0x434   : > { %1773 = vst [vmem:[#allocation1 + $0x5] ss:$9 sm:$0xff] %v1513_v43  ;;  %v952_v19 = vshra.s32 %v659_v25, 16 }
 0x435   : > { %1774 = vst [vmem:[#allocation1 + $0x6] ss:$9 sm:$0xff] %v1514_v55  ;;  %v1232_v60 = vsel %vm4015_vm7, %v922_v14, %v1200_v33  ;;  %v967_v33 = vcvt.s32.f32 %v965_v28 }
 0x436   : > { %1775 = vst [vmem:[#allocation1 + $0x7] ss:$9 sm:$0xff] %v1515_v46  ;;  %v954_v55 = vcvt.s32.f32 %v952_v19  ;;  %v4025_v46 = vld [vmem:[#allocation20_spill] sm:$0xff] }
 0x437   : > { %1265 = vst.msk [vmem:[#allocation3 + $0x88] sm:$0xff] %vm219_vm1, %v1232_v60 }
 0x438   : > { %v942_v38 = vpop.xlane.xlu1 %941 }
 0x439   : > { %vm943_vm3 = vcmp.eq.f32.partialorder %v940_v40, %v942_v38  ;;  %v948_v6 = vcvt.f32.s32 %v942_v38 }
 0x43a   : > { %v944_v61 = vsel %vm943_vm3, %v939_v48, inf }
 0x43b   : > { %945 = vmin.xlane.f32.xlu2 %v944_v61  ;;  %v949_v1 = vshll.u32 %v948_v6, 16  ;;  %v1201_v61 = vld [vmem:[#allocation3 + $0x90] sm:$0xff] }
 0x43d   : > { %v3591_v6 = vld [vmem:[#allocation1] sm:$0xff] }
 0x443   : > { %969 = vmin.xlane.f32.xlu2 %v968_v24 }
 0x49e   : > { %v904_v17 = vpop.xlane.xlu2 %903 }
 0x49f   : > { %v905_v63 = vcvt.f32.s32 %v904_v17 }
 0x4a1   : > { %v908_v51 = vadd.s32 %v907_v22, %v905_v63  ;;  %v893_v22 = vshll.u32 %v892_v47, 16 }
 0x4a3   : > { %v1231_v8 = vsel %vm4019_vm15, %v908_v51, %v1199_v36  ;;  %v1198_v36 = vld [vmem:[#allocation3 + $0x78] sm:$0xff] }
 0x4a4   : > { %1264 = vst.msk [vmem:[#allocation3 + $0x80] sm:$0xff] %vm219_vm1, %v1231_v8  ;;  %v951_v8 = vand.u32 65535, %v659_v25  ;;  %v4032_v25 = vld [vmem:[#allocation29_spill] sm:$0xff] }
 0x4a6   : > { %v928_v40 = vpop.xlane.xlu2 %927 }
 0x4a7   : > { %vm929_vm0 = vcmp.eq.f32.partialorder %v926_v5, %v928_v40  ;;  %v4024_v5 = vld [vmem:[#allocation53_spill] sm:$0xff]  ;;  %v934_v60 = vcvt.f32.s32 %v928_v40  ;;  %v4030_v40 = vld [vmem:[#allocation46_spill] sm:$0xff] }
 0x4a8   : > { %v930_v0 = vsel %vm929_vm0, %v925_v20, inf  ;;  %vm630_vm5 = vcmp.eq.f32.partialorder %v4025_v46, %v4024_v5  ;;  %vm629_vm6 = vcmp.eq.f32.partialorder %v4031_v2, %v4030_v40 }
 0x4a9   : > { %931 = vmin.xlane.f32.xlu0 %v930_v0  ;;  %v3569_v58 = vsel %vm630_vm5, %v2788_v50, 1073741824  ;;  %v935_v38 = vshll.u32 %v934_v60, 16  ;;  %v3589_v54 = vsel %vm629_vm6, %v2788_v50, 1073741824 }
 0x4aa   : > { %v994_v53 = vshra.s32 %v3569_v58, 16 }
 0x4ac   : > { %v3572_v10 = vcvt.s32.f32 %v994_v53  ;;  %v4034_v53 = vld [vmem:[#allocation42_spill] sm:$0xff] }
 0x4ad   : > { %vm4035_vm7 = vcmp.gt.f32.partialorder %v4016_v59, %v4034_v53 }
 0x4ae   : > { %v946_v37 = vpop.xlane.xlu2 %945 }
 0x4af   : > { %v947_v7 = vcvt.f32.s32 %v946_v37 }
 0x4b1   : > { %v950_v43 = vadd.s32 %v949_v1, %v947_v7  ;;  %889 = vmin.xlane.f32.xlu0 %v888_v62 }
 0x4b3   : > { %v1234_v42 = vsel %vm4023_vm9, %v950_v43, %v1202_v27  ;;  %v980_v27 = vshra.s32 %v3589_v54, 16  ;;  %v4033_v43 = vld [vmem:[#allocation10_spill] sm:$0xff] }
 0x4b4   : > { %1267 = vst.msk [vmem:[#allocation3 + $0x98] sm:$0xff] %vm219_vm1, %v1234_v42  ;;  %vm632_vm2 = vcmp.eq.f32.partialorder %v4033_v43, %v4032_v25 }
 0x4b5   : > { %v3596_v46 = vcvt.s32.f32 %v980_v27 }
 0x4b6   : > { %v970_v23 = vpop.xlane.xlu2 %969 }
 0x4b7   : > { %vm971_vm4 = vcmp.eq.f32.partialorder %v968_v24, %v970_v23  ;;  %v4026_v24 = vld [vmem:[#allocation32_spill] sm:$0xff]  ;;  %v976_v1 = vcvt.f32.s32 %v970_v23  ;;  %v3599_v23 = vsel %vm632_vm2, %v2788_v50, 1073741824 }
 0x4b8   : > { %v972_v14 = vsel %vm971_vm4, %v967_v33, inf  ;;  %vm4027_vm10 = vcmp.gt.f32.partialorder %v4012_v21, %v4026_v24  ;;  %v953_v21 = vcvt.s32.f32 %v951_v8 }
 0x4b9   : > { %955 = vmin.xlane.f32.xlu0 %v954_v55 }
 0x4c1   : > { %973 = vmin.xlane.f32.xlu0 %v972_v14  ;;  %v1204_v14 = vld [vmem:[#allocation3 + $0xa8] sm:$0xff] }
 0x4c9   : > { %997 = vmin.xlane.f32.xlu0 %v3572_v10 }
 0x51c   : > { %v932_v16 = vpop.xlane.xlu0 %931 }
 0x51d   : > { %v933_v48 = vcvt.f32.s32 %v932_v16  ;;  %v1022_v16 = vshra.s32 %v3599_v23, 16 }
 0x51f   : > { %v936_v26 = vadd.s32 %v935_v38, %v933_v48  ;;  %v1395_v38 = vld [vmem:[#allocation3 + $0x80] sm:$0xff]  ;;  %v3607_v48 = vcvt.s32.f32 %v1022_v16 }
 0x520   : > { %v1524_v47 = vrot.slane %v1395_v38, 2  ;;  %v1525_v24 = vrot.slane %v1395_v38, 3  ;;  %v1527_v59 = vrot.slane %v1395_v38, 5 }
 0x521   : > { %v1233_v35 = vsel %vm4027_vm10, %v936_v26, %v1201_v61  ;;  %v1523_v61 = vrot.slane %v1395_v38, 1 }
 0x522   : > { %1266 = vst.msk [vmem:[#allocation3 + $0x90] sm:$0xff] %vm219_vm1, %v1233_v35  ;;  %v1526_v35 = vrot.slane %v1395_v38, 4 }
 0x524   : > { %v890_v17 = vpop.xlane.xlu0 %889 }
 0x525   : > { %v891_v63 = vcvt.f32.s32 %v890_v17  ;;  %v1528_v17 = vrot.slane %v1395_v38, 6 }
 0x527   : > { %v894_v51 = vadd.s32 %v893_v22, %v891_v63  ;;  %v1529_v22 = vrot.slane %v1395_v38, 7  ;;  %v1396_v63 = vld [vmem:[#allocation3 + $0x88] sm:$0xff] }
 0x528   : > { %v1531_v41 = vrot.slane %v1396_v63, 2  ;;  %v1533_v8 = vrot.slane %v1396_v63, 4  ;;  %v1534_v2 = vrot.slane %v1396_v63, 5 }
 0x529   : > { %v1230_v32 = vsel %vm4029_vm11, %v894_v51, %v1198_v36  ;;  %v1530_v36 = vrot.slane %v1396_v63, 1 }
 0x52a   : > { %1263 = vst.msk [vmem:[#allocation3 + $0x78] sm:$0xff] %vm219_vm1, %v1230_v32  ;;  %v1532_v32 = vrot.slane %v1396_v63, 3 }
 0x52c   : > { %v3585_v20 = vpop.xlane.xlu0 %955 }
 0x52d   : > { %vm957_vm13 = vcmp.eq.f32.partialorder %v954_v55, %v3585_v20  ;;  %v977_v55 = vshll.u32 %v976_v1, 16  ;;  %v962_v16 = vcvt.f32.s32 %v3585_v20 }
 0x52e   : > { %v958_v0 = vsel %vm957_vm13, %v953_v21, inf  ;;  %v1535_v21 = vrot.slane %v1396_v63, 6 }
 0x52f   : > { %959 = vmin.xlane.f32.xlu1 %v958_v0  ;;  %v1536_v0 = vrot.slane %v1396_v63, 7 }
 0x531   : > { %v1394_v4 = vld [vmem:[#allocation3 + $0x78] sm:$0xff] }
 0x532   : > { %v1516_v12 = vrot.slane %v1394_v4, 1  ;;  %v1517_v37 = vrot.slane %v1394_v4, 2  ;;  %v1518_v34 = vrot.slane %v1394_v4, 3  ;;  %1777 = vst [vmem:[#allocation1] ss:$9 sm:$0xff] %v1394_v4  ;;  %v1519_v7 = vrot.slane %v1394_v4, 4 }
 0x533   : > { %v1520_v62 = vrot.slane %v1394_v4, 5  ;;  %v1521_v49 = vrot.slane %v1394_v4, 6  ;;  %v1522_v42 = vrot.slane %v1394_v4, 7  ;;  %v1397_v4 = vld [vmem:[#allocation3 + $0x90] sm:$0xff] }
 0x534   : > { %1778 = vst [vmem:[#allocation1 + $0x1] ss:$9 sm:$0xff] %v1516_v12  ;;  %v974_v19 = vpop.xlane.xlu0 %973  ;;  %v1537_v12 = vrot.slane %v1397_v4, 1  ;;  %v1539_v1 = vrot.slane %v1397_v4, 3  ;;  %v1541_v27 = vrot.slane %v1397_v4, 5  ;;  %v1543_v43 = vrot.slane %v1397_v4, 7 }
 0x535   : > { %1779 = vst [vmem:[#allocation1 + $0x2] ss:$9 sm:$0xff] %v1517_v37  ;;  %v975_v28 = vcvt.f32.s32 %v974_v19 }
 0x536   : > { %1780 = vst [vmem:[#allocation1 + $0x3] ss:$9 sm:$0xff] %v1518_v34  ;;  %v1538_v34 = vrot.slane %v1397_v4, 2 }
 0x537   : > { %1781 = vst [vmem:[#allocation1 + $0x4] ss:$9 sm:$0xff] %v1519_v7  ;;  %v978_v33 = vadd.s32 %v977_v55, %v975_v28  ;;  %983 = vmin.xlane.f32.xlu1 %v3596_v46  ;;  %v1540_v7 = vrot.slane %v1397_v4, 4 }
 0x538   : > { %1782 = vst [vmem:[#allocation1 + $0x5] ss:$9 sm:$0xff] %v1520_v62  ;;  %v1542_v62 = vrot.slane %v1397_v4, 6 }
 0x539   : > { %1783 = vst [vmem:[#allocation1 + $0x6] ss:$9 sm:$0xff] %v1521_v49  ;;  %v1236_v60 = vsel %vm4035_vm7, %v978_v33, %v1204_v14  ;;  %v1398_v49 = vld [vmem:[#allocation3 + $0x98] sm:$0xff] }
 0x53a   : > { %1784 = vst [vmem:[#allocation1 + $0x7] ss:$9 sm:$0xff] %v1522_v42  ;;  %v1544_v42 = vrot.slane %v1398_v49, 1  ;;  %v1545_v55 = vrot.slane %v1398_v49, 2  ;;  %v1546_v28 = vrot.slane %v1398_v49, 3  ;;  %v1547_v33 = vrot.slane %v1398_v49, 4 }
 0x53b   : > { %1269 = vst.msk [vmem:[#allocation3 + $0xa8] sm:$0xff] %vm219_vm1, %v1236_v60  ;;  %v1548_v14 = vrot.slane %v1398_v49, 5  ;;  %v1549_v53 = vrot.slane %v1398_v49, 6  ;;  %v1550_v60 = vrot.slane %v1398_v49, 7 }
 0x53f   : > { %1025 = vmin.xlane.f32.xlu1 %v3607_v48 }
 0x541   : > { %v3609_v26 = vld [vmem:[#allocation1] sm:$0xff] }
 0x542   : > { %1786 = vst [vmem:[#allocation1] ss:$9 sm:$0xff] %v1395_v38 }
 0x543   : > { %1787 = vst [vmem:[#allocation1 + $0x1] ss:$9 sm:$0xff] %v1523_v61  ;;  %v963_v61 = vshll.u32 %v962_v16, 16 }
 0x544   : > { %1788 = vst [vmem:[#allocation1 + $0x2] ss:$9 sm:$0xff] %v1524_v47 }
 0x545   : > { %1789 = vst [vmem:[#allocation1 + $0x3] ss:$9 sm:$0xff] %v1525_v24  ;;  %v1203_v24 = vld [vmem:[#allocation3 + $0xa0] sm:$0xff] }
 0x546   : > { %1790 = vst [vmem:[#allocation1 + $0x4] ss:$9 sm:$0xff] %v1526_v35 }
 0x547   : > { %1791 = vst [vmem:[#allocation1 + $0x5] ss:$9 sm:$0xff] %v1527_v59  ;;  %v979_v59 = vand.u32 65535, %v3589_v54 }
 0x548   : > { %1792 = vst [vmem:[#allocation1 + $0x6] ss:$9 sm:$0xff] %v1528_v17  ;;  %v4036_v17 = vld [vmem:[#allocation36_spill] sm:$0xff] }
 0x549   : > { %1793 = vst [vmem:[#allocation1 + $0x7] ss:$9 sm:$0xff] %v1529_v22  ;;  %vm4037_vm14 = vcmp.gt.f32.partialorder %v4020_v44, %v4036_v17 }
 0x550   : > { %v3612_v51 = vld [vmem:[#allocation1] sm:$0xff] }
 0x551   : > { %1795 = vst [vmem:[#allocation1] ss:$9 sm:$0xff] %v1396_v63  ;;  %v4038_v63 = vld [vmem:[#allocation26_spill] sm:$0xff] }
 0x552   : > { %1796 = vst [vmem:[#allocation1 + $0x1] ss:$9 sm:$0xff] %v1530_v36  ;;  %v4039_v36 = vld [vmem:[#allocation8_spill] sm:$0xff] }
 0x553   : > { %1797 = vst [vmem:[#allocation1 + $0x2] ss:$9 sm:$0xff] %v1531_v41  ;;  %vm631_vm3 = vcmp.eq.f32.partialorder %v4039_v36, %v4038_v63  ;;  %v1205_v36 = vld [vmem:[#allocation3 + $0xb0] sm:$0xff] }
 0x554   : > { %1798 = vst [vmem:[#allocation1 + $0x3] ss:$9 sm:$0xff] %v1532_v32  ;;  %v981_v32 = vcvt.s32.f32 %v979_v59 }
 0x555   : > { %1799 = vst [vmem:[#allocation1 + $0x4] ss:$9 sm:$0xff] %v1533_v8  ;;  %v663_v8 = vsel %vm631_vm3, %v2788_v50, 1073741824 }
 0x556   : > { %1800 = vst [vmem:[#allocation1 + $0x5] ss:$9 sm:$0xff] %v1534_v2 }
 0x557   : > { %1801 = vst [vmem:[#allocation1 + $0x6] ss:$9 sm:$0xff] %v1535_v21  ;;  %v1008_v21 = vshra.s32 %v663_v8, 16 }
 0x558   : > { %1802 = vst [vmem:[#allocation1 + $0x7] ss:$9 sm:$0xff] %v1536_v0 }
 0x55f   : > { %v3614_v37 = vld [vmem:[#allocation1] sm:$0xff] }
 0x560   : > { %1804 = vst [vmem:[#allocation1] ss:$9 sm:$0xff] %v1397_v4 }
 0x561   : > { %1805 = vst [vmem:[#allocation1 + $0x1] ss:$9 sm:$0xff] %v1537_v12 }
 0x562   : > { %1806 = vst [vmem:[#allocation1 + $0x2] ss:$9 sm:$0xff] %v1538_v34 }
 0x563   : > { %1807 = vst [vmem:[#allocation1 + $0x3] ss:$9 sm:$0xff] %v1539_v1 }
 0x564   : > { %1808 = vst [vmem:[#allocation1 + $0x4] ss:$9 sm:$0xff] %v1540_v7  ;;  %v1010_v7 = vcvt.s32.f32 %v1008_v21 }
 0x565   : > { %1809 = vst [vmem:[#allocation1 + $0x5] ss:$9 sm:$0xff] %v1541_v27 }
 0x566   : > { %1810 = vst [vmem:[#allocation1 + $0x6] ss:$9 sm:$0xff] %v1542_v62  ;;  %v1021_v62 = vand.u32 65535, %v3599_v23 }
 0x567   : > { %1811 = vst [vmem:[#allocation1 + $0x7] ss:$9 sm:$0xff] %v1543_v43  ;;  %v4040_v43 = vld [vmem:[#allocation35_spill] sm:$0xff] }
 0x56e   : > { %v3616_v19 = vld [vmem:[#allocation1] sm:$0xff] }
 0x56f   : > { %1813 = vst [vmem:[#allocation1] ss:$9 sm:$0xff] %v1398_v49  ;;  %v4041_v49 = vld [vmem:[#allocation13_spill] sm:$0xff] }
 0x570   : > { %1814 = vst [vmem:[#allocation1 + $0x1] ss:$9 sm:$0xff] %v1544_v42  ;;  %vm634_vm0 = vcmp.eq.f32.partialorder %v4041_v49, %v4040_v43  ;;  %v1023_v42 = vcvt.s32.f32 %v1021_v62 }
 0x571   : > { %1815 = vst [vmem:[#allocation1 + $0x2] ss:$9 sm:$0xff] %v1545_v55  ;;  %v1400_v55 = vld [vmem:[#allocation3 + $0xa8] sm:$0xff] }
 0x572   : > { %1816 = vst [vmem:[#allocation1 + $0x3] ss:$9 sm:$0xff] %v1546_v28  ;;  %v1559_v23 = vrot.slane %v1400_v55, 2  ;;  %v1560_v16 = vrot.slane %v1400_v55, 3 }
 0x573   : > { %1817 = vst [vmem:[#allocation1 + $0x4] ss:$9 sm:$0xff] %v1547_v33  ;;  %v3635_v33 = vsel %vm634_vm0, %v2788_v50, 1073741824 }
 0x574   : > { %1818 = vst [vmem:[#allocation1 + $0x5] ss:$9 sm:$0xff] %v1548_v14  ;;  %v1558_v14 = vrot.slane %v1400_v55, 1 }
 0x575   : > { %1819 = vst [vmem:[#allocation1 + $0x6] ss:$9 sm:$0xff] %v1549_v53 }
 0x576   : > { %1820 = vst [vmem:[#allocation1 + $0x7] ss:$9 sm:$0xff] %v1550_v60  ;;  %v1050_v60 = vshra.s32 %v3635_v33, 16 }
 0x57d   : > { %v3628_v2 = vld [vmem:[#allocation1] sm:$0xff] }
 0x5a2   : > { %v960_v38 = vpop.xlane.xlu1 %959 }
 0x5a3   : > { %v961_v47 = vcvt.f32.s32 %v960_v38  ;;  %v1561_v38 = vrot.slane %v1400_v55, 4 }
 0x5a5   : > { %v964_v35 = vadd.s32 %v963_v61, %v961_v47  ;;  %v1562_v61 = vrot.slane %v1400_v55, 5  ;;  %v1563_v47 = vrot.slane %v1400_v55, 6 }
 0x5a7   : > { %v1235_v22 = vsel %vm4037_vm14, %v964_v35, %v1203_v24  ;;  %v1564_v24 = vrot.slane %v1400_v55, 7 }
 0x5a8   : > { %1268 = vst.msk [vmem:[#allocation3 + $0xa0] sm:$0xff] %vm219_vm1, %v1235_v22 }
 0x5aa   : > { %v984_v41 = vpop.xlane.xlu1 %983 }
 0x5ab   : > { %vm985_vm15 = vcmp.eq.f32.partialorder %v3596_v46, %v984_v41  ;;  %v990_v35 = vcvt.f32.s32 %v984_v41 }
 0x5ac   : > { %v986_v20 = vsel %vm985_vm15, %v981_v32, inf }
 0x5ad   : > { %987 = vmin.xlane.f32.xlu2 %v986_v20  ;;  %v991_v17 = vshll.u32 %v990_v35, 16  ;;  %v1007_v20 = vand.u32 65535, %v663_v8 }
 0x5af   : > { %v1399_v54 = vld [vmem:[#allocation3 + $0xa0] sm:$0xff] }
 0x5b0   : > { %v1551_v0 = vrot.slane %v1399_v54, 1  ;;  %v1552_v44 = vrot.slane %v1399_v54, 2  ;;  %v1553_v4 = vrot.slane %v1399_v54, 3  ;;  %1822 = vst [vmem:[#allocation1] ss:$9 sm:$0xff] %v1399_v54  ;;  %v1554_v12 = vrot.slane %v1399_v54, 4 }
 0x5b1   : > { %v1555_v34 = vrot.slane %v1399_v54, 5  ;;  %v1556_v1 = vrot.slane %v1399_v54, 6  ;;  %v1557_v27 = vrot.slane %v1399_v54, 7  ;;  %v4042_v54 = vld [vmem:[#allocation45_spill] sm:$0xff] }
 0x5b2   : > { %1823 = vst [vmem:[#allocation1 + $0x1] ss:$9 sm:$0xff] %v1551_v0  ;;  %v1026_v46 = vpop.xlane.xlu1 %1025  ;;  %vm4043_vm8 = vcmp.gt.f32.partialorder %v4030_v40, %v4042_v54  ;;  %v4044_v0 = vld [vmem:[#allocation31_spill] sm:$0xff] }
 0x5b3   : > { %1824 = vst [vmem:[#allocation1 + $0x2] ss:$9 sm:$0xff] %v1552_v44  ;;  %vm1027_vm12 = vcmp.eq.f32.partialorder %v3607_v48, %v1026_v46  ;;  %v1052_v48 = vcvt.s32.f32 %v1050_v60  ;;  %v4045_v44 = vld [vmem:[#allocation11_spill] sm:$0xff] }
 0x5b4   : > { %1825 = vst [vmem:[#allocation1 + $0x3] ss:$9 sm:$0xff] %v1553_v4  ;;  %v1028_v28 = vsel %vm1027_vm12, %v1023_v42, inf  ;;  %vm633_vm9 = vcmp.eq.f32.partialorder %v4045_v44, %v4044_v0 }
 0x5b5   : > { %1826 = vst [vmem:[#allocation1 + $0x4] ss:$9 sm:$0xff] %v1554_v12  ;;  %1011 = vmin.xlane.f32.xlu2 %v1010_v7  ;;  %v1009_v12 = vcvt.s32.f32 %v1007_v20  ;;  %v665_v41 = vsel %vm633_vm9, %v2788_v50, 1073741824 }
 0x5b6   : > { %1827 = vst [vmem:[#allocation1 + $0x5] ss:$9 sm:$0xff] %v1555_v34  ;;  %v1036_v62 = vshra.s32 %v665_v41, 16 }
 0x5b7   : > { %1828 = vst [vmem:[#allocation1 + $0x6] ss:$9 sm:$0xff] %v1556_v1 }
 0x5b8   : > { %1829 = vst [vmem:[#allocation1 + $0x7] ss:$9 sm:$0xff] %v1557_v27  ;;  %v1032_v27 = vcvt.f32.s32 %v1026_v46 }
 0x5ba   : > { %v1033_v60 = vshll.u32 %v1032_v27, 16  ;;  %v1207_v27 = vld [vmem:[#allocation3 + $0xc0] sm:$0xff] }
 0x5bd   : > { %1029 = vmin.xlane.f32.xlu2 %v1028_v28 }
 0x5bf   : > { %v3637_v53 = vld [vmem:[#allocation1] sm:$0xff] }
 0x5c0   : > { %1831 = vst [vmem:[#allocation1] ss:$9 sm:$0xff] %v1400_v55 }
 0x5c1   : > { %1832 = vst [vmem:[#allocation1 + $0x1] ss:$9 sm:$0xff] %v1558_v14 }
 0x5c2   : > { %1833 = vst [vmem:[#allocation1 + $0x2] ss:$9 sm:$0xff] %v1559_v23 }
 0x5c3   : > { %1834 = vst [vmem:[#allocation1 + $0x3] ss:$9 sm:$0xff] %v1560_v16  ;;  %v1038_v16 = vcvt.s32.f32 %v1036_v62  ;;  %v1035_v62 = vand.u32 65535, %v665_v41 }
 0x5c4   : > { %1835 = vst [vmem:[#allocation1 + $0x4] ss:$9 sm:$0xff] %v1561_v38 }
 0x5c5   : > { %1836 = vst [vmem:[#allocation1 + $0x5] ss:$9 sm:$0xff] %v1562_v61  ;;  %1053 = vmin.xlane.f32.xlu2 %v1052_v48  ;;  %v1208_v61 = vld [vmem:[#allocation3 + $0xc8] sm:$0xff] }
 0x5c6   : > { %1837 = vst [vmem:[#allocation1 + $0x6] ss:$9 sm:$0xff] %v1563_v47  ;;  %v1049_v47 = vand.u32 65535, %v3635_v33 }
 0x5c7   : > { %1838 = vst [vmem:[#allocation1 + $0x7] ss:$9 sm:$0xff] %v1564_v24  ;;  %v4046_v24 = vld [vmem:[#allocation27_spill] sm:$0xff] }
 0x5c8   : > { %vm4047_vm4 = vcmp.gt.f32.partialorder %v4032_v25, %v4046_v24  ;;  %v4054_v24 = vld [vmem:[#allocation34_spill] sm:$0xff] }
 0x5c9   : > { %vm4055_vm7 = vcmp.gt.f32.partialorder %v4040_v43, %v4054_v24  ;;  %v4064_v24 = vld [vmem:[#allocation52_spill] sm:$0xff] }
 0x5ce   : > { %v3647_v1 = vld [vmem:[#allocation1] sm:$0xff] }
 0x620   : > { %v988_v59 = vpop.xlane.xlu2 %987 }
 0x621   : > { %v989_v22 = vcvt.f32.s32 %v988_v59  ;;  %v4048_v59 = vld [vmem:[#allocation49_spill] sm:$0xff] }
 0x623   : > { %v992_v32 = vadd.s32 %v991_v17, %v989_v22  ;;  %v4049_v17 = vld [vmem:[#allocation18_spill] sm:$0xff] }
 0x624   : > { %vm636_vm10 = vcmp.eq.f32.partialorder %v4049_v17, %v4048_v59 }
 0x625   : > { %v1237_v21 = vsel %vm4043_vm8, %v992_v32, %v1205_v36  ;;  %v1051_v36 = vcvt.s32.f32 %v1049_v47  ;;  %v668_v20 = vsel %vm636_vm10, %v2788_v50, 1073741824 }
 0x626   : > { %1270 = vst.msk [vmem:[#allocation3 + $0xb0] sm:$0xff] %vm219_vm1, %v1237_v21  ;;  %v1078_v54 = vshra.s32 %v668_v20, 16  ;;  %v3657_v21 = vpop.xlane.xlu0 %997  ;;  %v1077_v47 = vand.u32 65535, %v668_v20 }
 0x627   : > { %vm999_vm15 = vcmp.eq.f32.partialorder %v3572_v10, %v3657_v21 }
 0x628   : > { %v1012_v4 = vpop.xlane.xlu2 %1011  ;;  %v1080_v33 = vcvt.s32.f32 %v1078_v54  ;;  %v1079_v17 = vcvt.s32.f32 %v1077_v47  ;;  %v4057_v54 = vld [vmem:[#allocation22_spill] sm:$0xff] }
 0x629   : > { %vm1013_vm5 = vcmp.eq.f32.partialorder %v1010_v7, %v1012_v4  ;;  %v1018_v25 = vcvt.f32.s32 %v1012_v4 }
 0x62a   : > { %v1014_v34 = vsel %vm1013_vm5, %v1009_v12, inf  ;;  %vm4065_vm5 = vcmp.gt.f32.partialorder %v4024_v5, %v4064_v24 }
 0x62b   : > { %1015 = vmin.xlane.f32.xlu0 %v1014_v34  ;;  %v1019_v12 = vshll.u32 %v1018_v25, 16 }
 0x62d   : > { %v1401_v8 = vld [vmem:[#allocation3 + $0xb0] sm:$0xff] }
 0x62e   : > { %v1565_v49 = vrot.slane %v1401_v8, 1  ;;  %v1566_v40 = vrot.slane %v1401_v8, 2  ;;  %v1567_v42 = vrot.slane %v1401_v8, 3  ;;  %1840 = vst [vmem:[#allocation1] ss:$9 sm:$0xff] %v1401_v8  ;;  %v1568_v55 = vrot.slane %v1401_v8, 4 }
 0x62f   : > { %v1569_v28 = vrot.slane %v1401_v8, 5  ;;  %v1570_v23 = vrot.slane %v1401_v8, 6  ;;  %v1571_v38 = vrot.slane %v1401_v8, 7 }
 0x630   : > { %1841 = vst [vmem:[#allocation1 + $0x1] ss:$9 sm:$0xff] %v1565_v49  ;;  %v1030_v14 = vpop.xlane.xlu2 %1029  ;;  %v4050_v49 = vld [vmem:[#allocation24_spill] sm:$0xff] }
 0x631   : > { %1842 = vst [vmem:[#allocation1 + $0x2] ss:$9 sm:$0xff] %v1566_v40  ;;  %v1031_v7 = vcvt.f32.s32 %v1030_v14  ;;  %vm4051_vm6 = vcmp.gt.f32.partialorder %v4038_v63, %v4050_v49  ;;  %v4052_v40 = vld [vmem:[#allocation51_spill] sm:$0xff]  ;;  %v1210_v63 = vld [vmem:[#allocation3 + $0xd8] sm:$0xff] }
 0x632   : > { %1843 = vst [vmem:[#allocation1 + $0x3] ss:$9 sm:$0xff] %v1567_v42  ;;  %v4053_v42 = vld [vmem:[#allocation19_spill] sm:$0xff] }
 0x633   : > { %1844 = vst [vmem:[#allocation1 + $0x4] ss:$9 sm:$0xff] %v1568_v55  ;;  %v1034_v46 = vadd.s32 %v1033_v60, %v1031_v7  ;;  %1039 = vmin.xlane.f32.xlu0 %v1038_v16  ;;  %vm635_vm13 = vcmp.eq.f32.partialorder %v4053_v42, %v4052_v40 }
 0x634   : > { %1845 = vst [vmem:[#allocation1 + $0x5] ss:$9 sm:$0xff] %v1569_v28  ;;  %v1037_v28 = vcvt.s32.f32 %v1035_v62  ;;  %v667_v4 = vsel %vm635_vm13, %v2788_v50, 1073741824 }
 0x635   : > { %1846 = vst [vmem:[#allocation1 + $0x6] ss:$9 sm:$0xff] %v1570_v23  ;;  %v1240_v35 = vsel %vm4047_vm4, %v1034_v46, %v1208_v61  ;;  %v1064_v23 = vshra.s32 %v667_v4, 16 }
 0x636   : > { %1847 = vst [vmem:[#allocation1 + $0x7] ss:$9 sm:$0xff] %v1571_v38 }
 0x637   : > { %1273 = vst.msk [vmem:[#allocation3 + $0xc8] sm:$0xff] %vm219_vm1, %v1240_v35  ;;  %v1066_v61 = vcvt.s32.f32 %v1064_v23  ;;  %v4062_v23 = vld [vmem:[#allocation47_spill] sm:$0xff] }
 0x638   : > { %v1054_v22 = vpop.xlane.xlu2 %1053  ;;  %vm4063_vm9 = vcmp.gt.f32.partialorder %v4048_v59, %v4062_v23 }
 0x639   : > { %vm1055_vm11 = vcmp.eq.f32.partialorder %v1052_v48, %v1054_v22  ;;  %v1060_v60 = vcvt.f32.s32 %v1054_v22  ;;  %v993_v22 = vand.u32 65535, %v3569_v58 }
 0x63a   : > { %v1056_v32 = vsel %vm1055_vm11, %v1051_v36, inf }
 0x63b   : > { %1057 = vmin.xlane.f32.xlu0 %v1056_v32  ;;  %v1061_v41 = vshll.u32 %v1060_v60, 16  ;;  %v4056_v32 = vld [vmem:[#allocation57_spill] sm:$0xff]  ;;  %v995_v20 = vcvt.s32.f32 %v993_v22  ;;  %v1004_v60 = vcvt.f32.s32 %v3657_v21 }
 0x63c   : > { %vm638_vm3 = vcmp.eq.f32.partialorder %v4057_v54, %v4056_v32 }
 0x63d   : > { %v1000_v25 = vsel %vm999_vm15, %v995_v20, inf  ;;  %v670_v43 = vsel %vm638_vm3, %v2788_v50, 1073741824  ;;  %vm2045_vm3 = vcmask 392512   ;;  %vm2049_vm15 = vcmask 458112  }
 0x63e   : > { %v1105_v47 = vand.u32 65535, %v670_v43 }
 0x640   : > { %v1107_v21 = vcvt.s32.f32 %v1105_v47 }
 0x643   : > { %1081 = vmin.xlane.f32.xlu0 %v1080_v33 }
 0x69e   : > { %v1016_v44 = vpop.xlane.xlu0 %1015 }
 0x69f   : > { %v1017_v34 = vcvt.f32.s32 %v1016_v44  ;;  %v1106_v44 = vshra.s32 %v670_v43, 16 }
 0x6a1   : > { %v1020_v8 = vadd.s32 %v1019_v12, %v1017_v34  ;;  %v1108_v12 = vcvt.s32.f32 %v1106_v44 }
 0x6a3   : > { %v1239_v48 = vsel %vm4051_vm6, %v1020_v8, %v1207_v27  ;;  %v1209_v27 = vld [vmem:[#allocation3 + $0xd0] sm:$0xff]  ;;  %v1063_v8 = vand.u32 65535, %v667_v4 }
 0x6a4   : > { %1272 = vst.msk [vmem:[#allocation3 + $0xc0] sm:$0xff] %vm219_vm1, %v1239_v48 }
 0x6a6   : > { %v1040_v55 = vpop.xlane.xlu0 %1039 }
 0x6a7   : > { %vm1041_vm2 = vcmp.eq.f32.partialorder %v1038_v16, %v1040_v55  ;;  %v1046_v58 = vcvt.f32.s32 %v1040_v55 }
 0x6a8   : > { %v1042_v14 = vsel %vm1041_vm2, %v1037_v28, inf  ;;  %vm2033_vm2 = vcmask 195712  }
 0x6a9   : > { %1043 = vmin.xlane.f32.xlu1 %v1042_v14  ;;  %v1212_v14 = vld [vmem:[#allocation3 + $0xe8] sm:$0xff] }
 0x6ae   : > { %v1058_v7 = vpop.xlane.xlu0 %1057 }
 0x6af   : > { %v1059_v38 = vcvt.f32.s32 %v1058_v7 }
 0x6b1   : > { %v1062_v46 = vadd.s32 %v1061_v41, %v1059_v38  ;;  %1067 = vmin.xlane.f32.xlu1 %v1066_v61  ;;  %v1005_v38 = vshll.u32 %v1004_v60, 16 }
 0x6b3   : > { %v1242_v35 = vsel %vm4055_vm7, %v1062_v46, %v1210_v63  ;;  %v1206_v63 = vld [vmem:[#allocation3 + $0xb8] sm:$0xff]  ;;  %vm2037_vm7 = vcmask 261312  }
 0x6b4   : > { %1275 = vst.msk [vmem:[#allocation3 + $0xd8] sm:$0xff] %vm219_vm1, %v1242_v35 }
 0x6b6   : > { %v1082_v16 = vpop.xlane.xlu0 %1081 }
 0x6b7   : > { %vm1083_vm14 = vcmp.eq.f32.partialorder %v1080_v33, %v1082_v16  ;;  %v1047_v33 = vshll.u32 %v1046_v58, 16  ;;  %v1088_v49 = vcvt.f32.s32 %v1082_v16 }
 0x6b8   : > { %v1084_v36 = vsel %vm1083_vm14, %v1079_v17, inf  ;;  %v3712_v17 = vld [vmem:[#allocation1] sm:$0xff]  ;;  %vm2041_vm14 = vcmask 326912  }
 0x6b9   : > { %1085 = vmin.xlane.f32.xlu1 %v1084_v36  ;;  %v1089_v42 = vshll.u32 %v1088_v49, 16 }
 0x6c1   : > { %1001 = vmin.xlane.f32.xlu1 %v1000_v25 }
 0x6c9   : > { %1109 = vmin.xlane.f32.xlu1 %v1108_v12 }
 0x6e2   : > { %1934 = vperm.xlu1 %2364, %v3387_v15  }
 0x6ea   : > { %1943 = vperm.xlu1 %2364, %v3437_v52   ;;  %v4058_v52 = vld [vmem:[#allocation30_spill] sm:$0xff] }
 0x6eb   : > { %vm4059_vm0 = vcmp.gt.f32.partialorder %v4044_v0, %v4058_v52 }
 0x6f2   : > { %1949 = vperm.xlu1 %2364, %v3486_v11  }
 0x6fa   : > { %1958 = vperm.xlu1 %2364, %v3510_v57   ;;  %v4060_v57 = vld [vmem:[#allocation55_spill] sm:$0xff] }
 0x702   : > { %1967 = vperm.xlu1 %2364, %v3533_v13   ;;  %v4061_v13 = vld [vmem:[#allocation21_spill] sm:$0xff] }
 0x703   : > { %vm637_vm12 = vcmp.eq.f32.partialorder %v4061_v13, %v4060_v57 }
 0x704   : > { %v3694_v62 = vsel %vm637_vm12, %v2788_v50, 1073741824  ;;  %vm2057_vm12 = vcmask 589312  }
 0x705   : > { %v1092_v48 = vshra.s32 %v3694_v62, 16 }
 0x707   : > { %v3697_v28 = vcvt.s32.f32 %v1092_v48 }
 0x70a   : > { %1976 = vperm.xlu1 %2364, %v3609_v26  }
 0x712   : > { %1985 = vperm.xlu1 %2364, %v3616_v19   ;;  %v1065_v19 = vcvt.s32.f32 %v1063_v8 }
 0x71a   : > { %1994 = vperm.xlu1 %2364, %v3647_v1  }
 0x71c   : > { %v1044_v10 = vpop.xlane.xlu1 %1043 }
 0x71d   : > { %v1045_v34 = vcvt.f32.s32 %v1044_v10 }
 0x71f   : > { %v1048_v15 = vadd.s32 %v1047_v33, %v1045_v34 }
 0x721   : > { %v1241_v11 = vsel %vm4059_vm0, %v1048_v15, %v1209_v27  ;;  %vm2053_vm0 = vcmask 523712  }
 0x722   : > { %1274 = vst.msk [vmem:[#allocation3 + $0xd0] sm:$0xff] %vm219_vm1, %v1241_v11  ;;  %v1404_v11 = vld [vmem:[#allocation3 + $0xc8] sm:$0xff] }
 0x723   : > { %v1586_v13 = vrot.slane %v1404_v11, 1  ;;  %v1588_v49 = vrot.slane %v1404_v11, 3  ;;  %v1589_v48 = vrot.slane %v1404_v11, 4 }
 0x724   : > { %v3690_v26 = vpop.xlane.xlu1 %1067 }
 0x725   : > { %vm1069_vm8 = vcmp.eq.f32.partialorder %v1066_v61, %v3690_v26 }
 0x726   : > { %v1070_v1 = vsel %vm1069_vm8, %v1065_v19, inf  ;;  %vm2061_vm8 = vcmask 654912  }
 0x727   : > { %1071 = vmin.xlane.f32.xlu2 %v1070_v1  ;;  %v1587_v1 = vrot.slane %v1404_v11, 2 }
 0x72c   : > { %v1086_v0 = vpop.xlane.xlu1 %1085 }
 0x72d   : > { %v1087_v55 = vcvt.f32.s32 %v1086_v0  ;;  %v1590_v0 = vrot.slane %v1404_v11, 5 }
 0x72f   : > { %v1090_v4 = vadd.s32 %v1089_v42, %v1087_v55  ;;  %1095 = vmin.xlane.f32.xlu2 %v3697_v28  ;;  %v1591_v42 = vrot.slane %v1404_v11, 6  ;;  %v1592_v55 = vrot.slane %v1404_v11, 7 }
 0x731   : > { %v1244_v7 = vsel %vm4063_vm9, %v1090_v4, %v1212_v14  ;;  %vm2065_vm9 = vcmask 720512  }
 0x732   : > { %1277 = vst.msk [vmem:[#allocation3 + $0xe8] sm:$0xff] %vm219_vm1, %v1244_v7 }
 0x734   : > { %v1002_v41 = vpop.xlane.xlu1 %1001 }
 0x735   : > { %v1003_v61 = vcvt.f32.s32 %v1002_v41 }
 0x737   : > { %v1006_v46 = vadd.s32 %v1005_v38, %v1003_v61 }
 0x739   : > { %v1238_v35 = vsel %vm4065_vm5, %v1006_v46, %v1206_v63  ;;  %vm2069_vm5 = vcmask 786112  }
 0x73a   : > { %1271 = vst.msk [vmem:[#allocation3 + $0xb8] sm:$0xff] %vm219_vm1, %v1238_v35 }
 0x73c   : > { %v3709_v16 = vpop.xlane.xlu1 %1109 }
 0x73d   : > { %vm1111_vm4 = vcmp.eq.f32.partialorder %v1108_v12, %v3709_v16  ;;  %v1403_v12 = vld [vmem:[#allocation3 + $0xc0] sm:$0xff] }
 0x73e   : > { %v1112_v59 = vsel %vm1111_vm4, %v1107_v21, inf  ;;  %v1579_v58 = vrot.slane %v1403_v12, 1  ;;  %v1580_v33 = vrot.slane %v1403_v12, 2  ;;  %v1581_v34 = vrot.slane %v1403_v12, 3 }
 0x73f   : > { %1113 = vmin.xlane.f32.xlu2 %v1112_v59  ;;  %v1582_v27 = vrot.slane %v1403_v12, 4  ;;  %v1583_v15 = vrot.slane %v1403_v12, 5  ;;  %v1584_v8 = vrot.slane %v1403_v12, 6  ;;  %v1585_v52 = vrot.slane %v1403_v12, 7 }
 0x740   : > { %vm2073_vm4 = vcmask 851712  }
 0x741   : > { %v1402_v36 = vld [vmem:[#allocation3 + $0xb8] sm:$0xff] }
 0x742   : > { %v1572_v22 = vrot.slane %v1402_v36, 1  ;;  %v1573_v54 = vrot.slane %v1402_v36, 2  ;;  %v1574_v20 = vrot.slane %v1402_v36, 3  ;;  %1849 = vst [vmem:[#allocation1] ss:$9 sm:$0xff] %v1402_v36  ;;  %v1575_v25 = vrot.slane %v1402_v36, 4 }
 0x743   : > { %v1576_v43 = vrot.slane %v1402_v36, 5  ;;  %v1577_v5 = vrot.slane %v1402_v36, 6  ;;  %v1578_v44 = vrot.slane %v1402_v36, 7 }
 0x744   : > { %1850 = vst [vmem:[#allocation1 + $0x1] ss:$9 sm:$0xff] %v1572_v22 }
 0x745   : > { %1851 = vst [vmem:[#allocation1 + $0x2] ss:$9 sm:$0xff] %v1573_v54  ;;  %v1211_v54 = vld [vmem:[#allocation3 + $0xe0] sm:$0xff] }
 0x746   : > { %1852 = vst [vmem:[#allocation1 + $0x3] ss:$9 sm:$0xff] %v1574_v20 }
 0x747   : > { %1853 = vst [vmem:[#allocation1 + $0x4] ss:$9 sm:$0xff] %v1575_v25  ;;  %v1091_v25 = vand.u32 65535, %v3694_v62 }
 0x748   : > { %1854 = vst [vmem:[#allocation1 + $0x5] ss:$9 sm:$0xff] %v1576_v43  ;;  %v4066_v43 = vld [vmem:[#allocation50_spill] sm:$0xff] }
 0x749   : > { %1855 = vst [vmem:[#allocation1 + $0x6] ss:$9 sm:$0xff] %v1577_v5  ;;  %vm4067_vm10 = vcmp.gt.f32.partialorder %v4052_v40, %v4066_v43 }
 0x74a   : > { %1856 = vst [vmem:[#allocation1 + $0x7] ss:$9 sm:$0xff] %v1578_v44 }
 0x751   : > { %v3714_v10 = vld [vmem:[#allocation1] sm:$0xff] }
 0x752   : > { %1858 = vst [vmem:[#allocation1] ss:$9 sm:$0xff] %v1403_v12 }
 0x753   : > { %1859 = vst [vmem:[#allocation1 + $0x1] ss:$9 sm:$0xff] %v1579_v58 }
 0x754   : > { %1860 = vst [vmem:[#allocation1 + $0x2] ss:$9 sm:$0xff] %v1580_v33 }
 0x755   : > { %1861 = vst [vmem:[#allocation1 + $0x3] ss:$9 sm:$0xff] %v1581_v34 }
 0x756   : > { %1862 = vst [vmem:[#allocation1 + $0x4] ss:$9 sm:$0xff] %v1582_v27 }
 0x757   : > { %1863 = vst [vmem:[#allocation1 + $0x5] ss:$9 sm:$0xff] %v1583_v15  ;;  %1937 = vperm.xlu2 %2365, %v3394_v30   ;;  %v1405_v30 = vld [vmem:[#allocation3 + $0xd0] sm:$0xff]  ;;  %v1408_v15 = vld [vmem:[#allocation3 + $0xe8] sm:$0xff] }
 0x758   : > { %1864 = vst [vmem:[#allocation1 + $0x6] ss:$9 sm:$0xff] %v1584_v8  ;;  %v1594_v4 = vrot.slane %v1405_v30, 2  ;;  %v1595_v60 = vrot.slane %v1405_v30, 3  ;;  %v1596_v23 = vrot.slane %v1405_v30, 4  ;;  %v1597_v7 = vrot.slane %v1405_v30, 5 }
 0x759   : > { %1865 = vst [vmem:[#allocation1 + $0x7] ss:$9 sm:$0xff] %v1585_v52  ;;  %v1598_v41 = vrot.slane %v1405_v30, 6  ;;  %v1599_v38 = vrot.slane %v1405_v30, 7  ;;  %v1614_v52 = vrot.slane %v1408_v15, 1 }
 0x75f   : > { %1940 = vperm.xlu2 %2365, %v3401_v31   ;;  %v1593_v31 = vrot.slane %v1405_v30, 1 }
 0x760   : > { %v1866_v19 = vld [vmem:[#allocation1] sm:$0xff] }
 0x761   : > { %1867 = vst [vmem:[#allocation1] ss:$9 sm:$0xff] %v1404_v11  ;;  %2003 = vperm.xlu1 %2364, %v1866_v19   ;;  %v1615_v19 = vrot.slane %v1408_v15, 2 }
 0x762   : > { %1868 = vst [vmem:[#allocation1 + $0x1] ss:$9 sm:$0xff] %v1586_v13 }
 0x763   : > { %1869 = vst [vmem:[#allocation1 + $0x2] ss:$9 sm:$0xff] %v1587_v1  ;;  %v1616_v1 = vrot.slane %v1408_v15, 3 }
 0x764   : > { %1870 = vst [vmem:[#allocation1 + $0x3] ss:$9 sm:$0xff] %v1588_v49 }
 0x765   : > { %1871 = vst [vmem:[#allocation1 + $0x4] ss:$9 sm:$0xff] %v1589_v48  ;;  %v1617_v48 = vrot.slane %v1408_v15, 4 }
 0x766   : > { %1872 = vst [vmem:[#allocation1 + $0x5] ss:$9 sm:$0xff] %v1590_v0  ;;  %v1214_v0 = vld [vmem:[#allocation3 + $0xf8] sm:$0xff] }
 0x767   : > { %1873 = vst [vmem:[#allocation1 + $0x6] ss:$9 sm:$0xff] %v1591_v42  ;;  %1946 = vperm.xlu2 %2365, %v3446_v9   ;;  %v1406_v9 = vld [vmem:[#allocation3 + $0xd8] sm:$0xff]  ;;  %v1618_v42 = vrot.slane %v1408_v15, 5 }
 0x768   : > { %1874 = vst [vmem:[#allocation1 + $0x7] ss:$9 sm:$0xff] %v1592_v55  ;;  %v1600_v61 = vrot.slane %v1406_v9, 1  ;;  %v1602_v46 = vrot.slane %v1406_v9, 3  ;;  %v1603_v47 = vrot.slane %v1406_v9, 4  ;;  %v1604_v24 = vrot.slane %v1406_v9, 5 }
 0x769   : > { %v1605_v35 = vrot.slane %v1406_v9, 6  ;;  %v1606_v21 = vrot.slane %v1406_v9, 7  ;;  %v1619_v55 = vrot.slane %v1408_v15, 6 }
 0x76f   : > { %v3719_v14 = vld [vmem:[#allocation1] sm:$0xff]  ;;  %1955 = vperm.xlu2 %2365, %v3503_v3   ;;  %v1601_v3 = vrot.slane %v1406_v9, 2 }
 0x770   : > { %1876 = vst [vmem:[#allocation1] ss:$9 sm:$0xff] %v1405_v30  ;;  %v4068_v30 = vld [vmem:[#allocation56_spill] sm:$0xff] }
 0x771   : > { %1877 = vst [vmem:[#allocation1 + $0x1] ss:$9 sm:$0xff] %v1593_v31  ;;  %vm4069_vm6 = vcmp.gt.f32.partialorder %v4056_v32, %v4068_v30 }
 0x772   : > { %1878 = vst [vmem:[#allocation1 + $0x2] ss:$9 sm:$0xff] %v1594_v4 }
 0x773   : > { %1879 = vst [vmem:[#allocation1 + $0x3] ss:$9 sm:$0xff] %v1595_v60 }
 0x774   : > { %1880 = vst [vmem:[#allocation1 + $0x4] ss:$9 sm:$0xff] %v1596_v23 }
 0x775   : > { %1881 = vst [vmem:[#allocation1 + $0x5] ss:$9 sm:$0xff] %v1597_v7 }
 0x776   : > { %1882 = vst [vmem:[#allocation1 + $0x6] ss:$9 sm:$0xff] %v1598_v41  ;;  %v4070_v41 = vld [vmem:[#allocation54_spill] sm:$0xff] }
 0x777   : > { %1883 = vst [vmem:[#allocation1 + $0x7] ss:$9 sm:$0xff] %v1599_v38  ;;  %1964 = vperm.xlu2 %2365, %v3524_v56   ;;  %vm4071_vm13 = vcmp.gt.f32.partialorder %v4060_v57, %v4070_v41  ;;  %v3755_v57 = vadd.s32 4294967272, %v2788_v50 }
 0x77e   : > { %v1884_v63 = vld [vmem:[#allocation1] sm:$0xff] }
 0x77f   : > { %1885 = vst [vmem:[#allocation1] ss:$9 sm:$0xff] %v1406_v9  ;;  %1973 = vperm.xlu2 %2365, %v3591_v6   ;;  %v1074_v6 = vcvt.f32.s32 %v3690_v26 }
 0x780   : > { %1886 = vst [vmem:[#allocation1 + $0x1] ss:$9 sm:$0xff] %v1600_v61  ;;  %v3752_v61 = vadd.s32 4294967288, %v2788_v50 }
 0x781   : > { %1887 = vst [vmem:[#allocation1 + $0x2] ss:$9 sm:$0xff] %v1601_v3  ;;  %v1075_v36 = vshll.u32 %v1074_v6, 16 }
 0x782   : > { %1888 = vst [vmem:[#allocation1 + $0x3] ss:$9 sm:$0xff] %v1602_v46 }
 0x783   : > { %1889 = vst [vmem:[#allocation1 + $0x4] ss:$9 sm:$0xff] %v1603_v47  ;;  %v3758_v47 = vadd.s32 4294967264, %v2788_v50 }
 0x784   : > { %1890 = vst [vmem:[#allocation1 + $0x5] ss:$9 sm:$0xff] %v1604_v24  ;;  %v3761_v24 = vadd.s32 4294967280, %v2788_v50 }
 0x785   : > { %1891 = vst [vmem:[#allocation1 + $0x6] ss:$9 sm:$0xff] %v1605_v35 }
 0x786   : > { %1892 = vst [vmem:[#allocation1 + $0x7] ss:$9 sm:$0xff] %v1606_v21 }
 0x787   : > { %1982 = vperm.xlu2 %2365, %v3614_v37  }
 0x78d   : > { %v1893_v56 = vld [vmem:[#allocation1] sm:$0xff] }
 0x78e   : > { %2012 = vperm.xlu1 %2364, %v1893_v56  }
 0x78f   : > { %1991 = vperm.xlu2 %2365, %v3637_v53   ;;  %v1093_v53 = vcvt.s32.f32 %v1091_v25 }
 0x797   : > { %2000 = vperm.xlu2 %2365, %v3714_v10  }
 0x79a   : > { %v1072_v59 = vpop.xlane.xlu2 %1071 }
 0x79b   : > { %v1073_v22 = vcvt.f32.s32 %v1072_v59 }
 0x79d   : > { %v1076_v20 = vadd.s32 %v1075_v36, %v1073_v22 }
 0x79f   : > { %v1243_v5 = vsel %vm4067_vm10, %v1076_v20, %v1211_v54  ;;  %2009 = vperm.xlu2 %2365, %v1884_v63   ;;  %vm2077_vm10 = vcmask 917312  }
 0x7a0   : > { %1276 = vst.msk [vmem:[#allocation3 + $0xe0] sm:$0xff] %vm219_vm1, %v1243_v5 }
 0x7a2   : > { %v1096_v37 = vpop.xlane.xlu2 %1095 }
 0x7a3   : > { %vm1097_vm11 = vcmp.eq.f32.partialorder %v3697_v28, %v1096_v37  ;;  %v1116_v28 = vcvt.f32.s32 %v3709_v16  ;;  %v1620_v16 = vrot.slane %v1408_v15, 7  ;;  %v1102_v32 = vcvt.f32.s32 %v1096_v37 }
 0x7a4   : > { %v1098_v26 = vsel %vm1097_vm11, %v1093_v53, inf  ;;  %vm2081_vm11 = vcmask 982912  }
 0x7a5   : > { %1099 = vmin.xlane.f32.xlu0 %v1098_v26  ;;  %v1117_v11 = vshll.u32 %v1116_v28, 16  ;;  %v1103_v60 = vshll.u32 %v1102_v32, 16 }
 0x7a7   : > { %v1407_v44 = vld [vmem:[#allocation3 + $0xe0] sm:$0xff] }
 0x7a8   : > { %v1607_v12 = vrot.slane %v1407_v44, 1  ;;  %v1608_v58 = vrot.slane %v1407_v44, 2  ;;  %v1609_v10 = vrot.slane %v1407_v44, 3  ;;  %1894 = vst [vmem:[#allocation1] ss:$9 sm:$0xff] %v1407_v44  ;;  %v1610_v33 = vrot.slane %v1407_v44, 4 }
 0x7a9   : > { %v1611_v62 = vrot.slane %v1407_v44, 5  ;;  %v1612_v34 = vrot.slane %v1407_v44, 6  ;;  %v1613_v40 = vrot.slane %v1407_v44, 7 }
 0x7aa   : > { %1895 = vst [vmem:[#allocation1 + $0x1] ss:$9 sm:$0xff] %v1607_v12 }
 0x7ab   : > { %1896 = vst [vmem:[#allocation1 + $0x2] ss:$9 sm:$0xff] %v1608_v58 }
 0x7ac   : > { %1897 = vst [vmem:[#allocation1 + $0x3] ss:$9 sm:$0xff] %v1609_v10 }
 0x7ad   : > { %1898 = vst [vmem:[#allocation1 + $0x4] ss:$9 sm:$0xff] %v1610_v33 }
 0x7ae   : > { %1899 = vst [vmem:[#allocation1 + $0x5] ss:$9 sm:$0xff] %v1611_v62 }
 0x7af   : > { %1900 = vst [vmem:[#allocation1 + $0x6] ss:$9 sm:$0xff] %v1612_v34 }
 0x7b0   : > { %1901 = vst [vmem:[#allocation1 + $0x7] ss:$9 sm:$0xff] %v1613_v40 }
 0x7b2   : > { %v1114_v27 = vpop.xlane.xlu2 %1113 }
 0x7b3   : > { %v1115_v8 = vcvt.f32.s32 %v1114_v27 }
 0x7b5   : > { %v1118_v49 = vadd.s32 %v1117_v11, %v1115_v8 }
 0x7b7   : > { %v1902_v13 = vld [vmem:[#allocation1] sm:$0xff]  ;;  %v1246_v31 = vsel %vm4069_vm6, %v1118_v49, %v1214_v0  ;;  %vm2085_vm6 = vcmask 1048512  }
 0x7b8   : > { %1903 = vst [vmem:[#allocation1] ss:$9 sm:$0xff] %v1408_v15 }
 0x7b9   : > { %1904 = vst [vmem:[#allocation1 + $0x1] ss:$9 sm:$0xff] %v1614_v52  ;;  %1931 = vperm.xlu0 %2363, %v3367_v18  }
 0x7ba   : > { %1905 = vst [vmem:[#allocation1 + $0x2] ss:$9 sm:$0xff] %v1615_v19 }
 0x7bb   : > { %1906 = vst [vmem:[#allocation1 + $0x3] ss:$9 sm:$0xff] %v1616_v1 }
 0x7bc   : > { %1907 = vst [vmem:[#allocation1 + $0x4] ss:$9 sm:$0xff] %v1617_v48 }
 0x7bd   : > { %1908 = vst [vmem:[#allocation1 + $0x5] ss:$9 sm:$0xff] %v1618_v42 }
 0x7be   : > { %1909 = vst [vmem:[#allocation1 + $0x6] ss:$9 sm:$0xff] %v1619_v55 }
 0x7bf   : > { %1910 = vst [vmem:[#allocation1 + $0x7] ss:$9 sm:$0xff] %v1620_v16 }
 0x7c0   : > { %1279 = vst.msk [vmem:[#allocation3 + $0xf8] sm:$0xff] %vm219_vm1, %v1246_v31 }
 0x7c1   : > { %1952 = vperm.xlu0 %2363, %v3500_v39   ;;  %v1213_v39 = vld [vmem:[#allocation3 + $0xf0] sm:$0xff] }
 0x7c6   : > { %v1911_v18 = vld [vmem:[#allocation1] sm:$0xff] }
 0x7c7   : > { %2018 = vperm.xlu2 %2365, %v1911_v18   ;;  %v1410_v37 = vld [vmem:[#allocation3 + $0xf8] sm:$0xff] }
 0x7c8   : > { %v1628_v53 = vrot.slane %v1410_v37, 1  ;;  %v1629_v44 = vrot.slane %v1410_v37, 2  ;;  %v1630_v12 = vrot.slane %v1410_v37, 3  ;;  %v1631_v58 = vrot.slane %v1410_v37, 4 }
 0x7c9   : > { %1961 = vperm.xlu0 %2363, %v3512_v29   ;;  %v1632_v10 = vrot.slane %v1410_v37, 5  ;;  %v1633_v33 = vrot.slane %v1410_v37, 6  ;;  %v1634_v62 = vrot.slane %v1410_v37, 7 }
 0x7d1   : > { %1970 = vperm.xlu0 %2363, %v3543_v45   ;;  %v1938_v45 = vpop.permute.xlu2 %1937 }
 0x7d2   : > { %v2032_v36 = vperm.slane %v1938_v45, %v3761_v24 }
 0x7d9   : > { %1979 = vperm.xlu0 %2363, %v3612_v51   ;;  %v1935_v51 = vpop.permute.xlu1 %1934  ;;  %v1941_v35 = vpop.permute.xlu2 %1940 }
 0x7da   : > { %v2028_v56 = vperm.slane %v1935_v51, %v3752_v61  ;;  %v2036_v22 = vperm.slane %v1941_v35, %v3755_v57  ;;  %v2055_v35 = vadd.s32 4294967232, %v2788_v50 }
 0x7e1   : > { %1988 = vperm.xlu0 %2363, %v3628_v2   ;;  %v1944_v6 = vpop.permute.xlu1 %1943  ;;  %v1947_v40 = vpop.permute.xlu2 %1946 }
 0x7e2   : > { %v2040_v20 = vperm.slane %v1944_v6, %v3758_v47 }
 0x7e9   : > { %1997 = vperm.xlu0 %2363, %v3712_v17   ;;  %v1950_v27 = vpop.permute.xlu1 %1949  ;;  %v1956_v15 = vpop.permute.xlu2 %1955 }
 0x7f1   : > { %2006 = vperm.xlu0 %2363, %v3719_v14   ;;  %v1959_v8 = vpop.permute.xlu1 %1958  ;;  %v3774_v11 = vpop.permute.xlu2 %1964 }
 0x7f9   : > { %2015 = vperm.xlu0 %2363, %v1902_v13   ;;  %v3776_v13 = vpop.permute.xlu1 %1967  ;;  %v3780_v1 = vpop.permute.xlu2 %1973 }
 0x801   : > { %v3782_v49 = vpop.permute.xlu1 %1976  ;;  %v1983_v0 = vpop.permute.xlu2 %1982 }
 0x802   : > { %v2088_v18 = vperm.slane %v1983_v0, %v3752_v61 }
 0x809   : > { %v1986_v42 = vpop.permute.xlu1 %1985  ;;  %v1992_v16 = vpop.permute.xlu2 %1991 }
 0x80a   : > { %v2094_v45 = vperm.slane %v1992_v16, %v3758_v47  ;;  %v2079_v16 = vadd.s32 4294967184, %v2788_v50 }
 0x811   : > { %v1995_v31 = vpop.permute.xlu1 %1994  ;;  %v2001_v51 = vpop.permute.xlu2 %2000 }
 0x818   : > { %v1100_v4 = vpop.xlane.xlu0 %1099 }
 0x819   : > { %v1101_v23 = vcvt.f32.s32 %v1100_v4 }
 0x81b   : > { %v1104_v7 = vadd.s32 %v1103_v60, %v1101_v23  ;;  %v2090_v23 = vperm.slane %v1986_v42, %v3761_v24 }
 0x81d   : > { %v1245_v29 = vsel %vm4071_vm13, %v1104_v7, %v1213_v39  ;;  %v2043_v7 = vadd.s32 4294967256, %v2788_v50  ;;  %vm2119_vm13 = vcmask 1040384  }
 0x81e   : > { %1278 = vst.msk [vmem:[#allocation3 + $0xf0] sm:$0xff] %vm219_vm1, %v1245_v29  ;;  %vm2029_vm1 = vcmask 130112   ;;  %v2047_v29 = vadd.s32 4294967248, %v2788_v50 }
 0x81f   : > { %v2096_v61 = vperm.slane %v1995_v31, %v2043_v7 }
 0x825   : > { %v1409_v2 = vld [vmem:[#allocation3 + $0xf0] sm:$0xff] }
 0x826   : > { %v1621_v38 = vrot.slane %v1409_v2, 1  ;;  %v1622_v17 = vrot.slane %v1409_v2, 2  ;;  %v1623_v9 = vrot.slane %v1409_v2, 3  ;;  %1912 = vst [vmem:[#allocation1] ss:$9 sm:$0xff] %v1409_v2  ;;  %v1624_v14 = vrot.slane %v1409_v2, 4 }
 0x827   : > { %v1625_v63 = vrot.slane %v1409_v2, 5  ;;  %v1626_v3 = vrot.slane %v1409_v2, 6  ;;  %v1627_v46 = vrot.slane %v1409_v2, 7  ;;  %v2004_v2 = vpop.permute.xlu1 %2003 }
 0x828   : > { %1913 = vst [vmem:[#allocation1 + $0x1] ss:$9 sm:$0xff] %v1621_v38  ;;  %v2044_v38 = vperm.slane %v1947_v40, %v2043_v7 }
 0x829   : > { %1914 = vst [vmem:[#allocation1 + $0x2] ss:$9 sm:$0xff] %v1622_v17  ;;  %v2051_v17 = vadd.s32 4294967240, %v2788_v50 }
 0x82a   : > { %1915 = vst [vmem:[#allocation1 + $0x3] ss:$9 sm:$0xff] %v1623_v9 }
 0x82b   : > { %1916 = vst [vmem:[#allocation1 + $0x4] ss:$9 sm:$0xff] %v1624_v14  ;;  %v1932_v21 = vpop.permute.xlu0 %1931  ;;  %v2100_v6 = vperm.slane %v2001_v51, %v2051_v17 }
 0x82c   : > { %1917 = vst [vmem:[#allocation1 + $0x5] ss:$9 sm:$0xff] %v1625_v63  ;;  %v2026_v59 = vperm.slane %v1932_v21, %v2788_v50 }
 0x82d   : > { %1918 = vst [vmem:[#allocation1 + $0x6] ss:$9 sm:$0xff] %v1626_v3 }
 0x82e   : > { %1919 = vst [vmem:[#allocation1 + $0x7] ss:$9 sm:$0xff] %v1627_v46  ;;  %v2030_v54 = vsel %vm2029_vm1, %v2028_v56, %v2026_v59  ;;  %v2048_v46 = vperm.slane %v1950_v27, %v2047_v29  ;;  %v2059_v56 = vadd.s32 4294967224, %v2788_v50 }
 0x82f   : > { %v2034_v25 = vsel %vm2033_vm2, %v2032_v36, %v2030_v54  ;;  %v2056_v36 = vperm.slane %v1956_v15, %v2055_v35  ;;  %v2013_v54 = vpop.permute.xlu1 %2012 }
 0x830   : > { %v2038_v43 = vsel %vm2037_vm7, %v2036_v22, %v2034_v25  ;;  %v2063_v22 = vadd.s32 4294967216, %v2788_v50 }
 0x831   : > { %v2042_v5 = vsel %vm2041_vm14, %v2040_v20, %v2038_v43  ;;  %v2102_v43 = vperm.slane %v2004_v2, %v2055_v35  ;;  %v4072_v2 = vlaneseq }
 0x832   : > { %v2046_v63 = vsel %vm2045_vm3, %v2044_v38, %v2042_v5  ;;  %v2010_v5 = vpop.permute.xlu2 %2009 }
 0x833   : > { %v1953_v28 = vpop.permute.xlu0 %1952  ;;  %v2050_v47 = vsel %vm2049_vm15, %v2048_v46, %v2046_v63 }
 0x834   : > { %v2052_v3 = vperm.slane %v1953_v28, %v2051_v17  ;;  %v2075_v28 = vadd.s32 4294967192, %v2788_v50 }
 0x835   : > { %v1920_v26 = vld [vmem:[#allocation1] sm:$0xff] }
 0x836   : > { %2021 = vperm.xlu1 %2364, %v1920_v26   ;;  %1921 = vst [vmem:[#allocation1] ss:$9 sm:$0xff] %v1410_v37  ;;  %v2054_v59 = vsel %vm2053_vm0, %v2052_v3, %v2050_v47  ;;  %v2060_v26 = vperm.slane %v1959_v8, %v2059_v56 }
 0x837   : > { %1922 = vst [vmem:[#allocation1 + $0x1] ss:$9 sm:$0xff] %v1628_v53  ;;  %v2058_v37 = vsel %vm2057_vm12, %v2056_v36, %v2054_v59 }
 0x838   : > { %1923 = vst [vmem:[#allocation1 + $0x2] ss:$9 sm:$0xff] %v1629_v44  ;;  %v2067_v44 = vadd.s32 4294967208, %v2788_v50 }
 0x839   : > { %1924 = vst [vmem:[#allocation1 + $0x3] ss:$9 sm:$0xff] %v1630_v12 }
 0x83a   : > { %1925 = vst [vmem:[#allocation1 + $0x4] ss:$9 sm:$0xff] %v1631_v58  ;;  %v2062_v58 = vsel %vm2061_vm8, %v2060_v26, %v2058_v37  ;;  %v2068_v27 = vperm.slane %v3774_v11, %v2067_v44 }
 0x83b   : > { %1926 = vst [vmem:[#allocation1 + $0x5] ss:$9 sm:$0xff] %v1632_v10  ;;  %v3772_v52 = vpop.permute.xlu0 %1961 }
 0x83c   : > { %1927 = vst [vmem:[#allocation1 + $0x6] ss:$9 sm:$0xff] %v1633_v33  ;;  %v2064_v53 = vperm.slane %v3772_v52, %v2063_v22  ;;  %v2108_v52 = vperm.slane %v2013_v54, %v2067_v44 }
 0x83d   : > { %1928 = vst [vmem:[#allocation1 + $0x7] ss:$9 sm:$0xff] %v1634_v62  ;;  %v2071_v62 = vadd.s32 4294967200, %v2788_v50 }
 0x83e   : > { %v2066_v40 = vsel %vm2065_vm9, %v2064_v53, %v2062_v58 }
 0x843   : > { %v3778_v19 = vpop.permute.xlu0 %1970 }
 0x844   : > { %v1929_v34 = vld [vmem:[#allocation1] sm:$0xff]  ;;  %v2076_v0 = vperm.slane %v3778_v19, %v2075_v28 }
 0x845   : > { %2024 = vperm.xlu0 %2363, %v1929_v34   ;;  %v2106_v34 = vperm.slane %v2010_v5, %v2063_v22 }
 0x84b   : > { %v1980_v48 = vpop.permute.xlu0 %1979 }
 0x84c   : > { %v2087_v30 = vperm.slane %v1980_v48, %v2788_v50  ;;  %v2070_v48 = vsel %vm2069_vm5, %v2068_v27, %v2066_v40 }
 0x84e   : > { %v2089_v4 = vsel %vm2029_vm1, %v2088_v18, %v2087_v30  ;;  %v2019_v30 = vpop.permute.xlu2 %2018  ;;  %vm2123_vm1 = vcmp.lt.s32.totalorder %v4072_v2, 256 }
 0x84f   : > { %v2091_v39 = vsel %vm2033_vm2, %v2090_v23, %v2089_v4  ;;  %v2083_v4 = vadd.s32 4294967176, %v2788_v50  ;;  %v2112_v19 = vperm.slane %v2019_v30, %v2075_v28 }
 0x851   : > { %v2084_v50 = vperm.slane %v3782_v49, %v2083_v4 }
 0x853   : > { %v1989_v55 = vpop.permute.xlu0 %1988 }
 0x854   : > { %v2092_v60 = vperm.slane %v1989_v55, %v3755_v57  ;;  %v2072_v55 = vperm.slane %v3776_v13, %v2071_v62  ;;  %v2080_v13 = vperm.slane %v3780_v1, %v2079_v16 }
 0x856   : > { %v2093_v41 = vsel %vm2037_vm7, %v2092_v60, %v2091_v39  ;;  %v2074_v31 = vsel %vm2073_vm4, %v2072_v55, %v2070_v48 }
 0x857   : > { %v2095_v9 = vsel %vm2041_vm14, %v2094_v45, %v2093_v41  ;;  %v2078_v60 = vsel %vm2077_vm10, %v2076_v0, %v2074_v31 }
 0x858   : > { %v2097_v24 = vsel %vm2045_vm3, %v2096_v61, %v2095_v9  ;;  %v2082_v41 = vsel %vm2081_vm11, %v2080_v13, %v2078_v60 }
 0x859   : > { %v2086_v38 = vsel %vm2085_vm6, %v2084_v50, %v2082_v41 }
 0x85b   : > { %v1998_v32 = vpop.permute.xlu0 %1997 }
 0x85c   : > { %v2098_v14 = vperm.slane %v1998_v32, %v2047_v29 }
 0x85e   : > { %v2099_v21 = vsel %vm2049_vm15, %v2098_v14, %v2097_v24 }
 0x85f   : > { %v2101_v20 = vsel %vm2053_vm0, %v2100_v6, %v2099_v21 }
 0x860   : > { %v2103_v12 = vsel %vm2057_vm12, %v2102_v43, %v2101_v20 }
 0x863   : > { %v2007_v57 = vpop.permute.xlu0 %2006 }
 0x864   : > { %v2104_v25 = vperm.slane %v2007_v57, %v2059_v56 }
 0x866   : > { %v2105_v10 = vsel %vm2061_vm8, %v2104_v25, %v2103_v12 }
 0x867   : > { %v2107_v15 = vsel %vm2065_vm9, %v2106_v34, %v2105_v10 }
 0x868   : > { %v2109_v11 = vsel %vm2069_vm5, %v2108_v52, %v2107_v15 }
 0x86b   : > { %v2016_v33 = vpop.permute.xlu0 %2015 }
 0x86c   : > { %v2110_v8 = vperm.slane %v2016_v33, %v2071_v62 }
 0x86e   : > { %v2111_v18 = vsel %vm2073_vm4, %v2110_v8, %v2109_v11 }
 0x86f   : > { %v2113_v39 = vsel %vm2077_vm10, %v2112_v19, %v2111_v18 }
 0x8a8   : > { %v2022_v42 = vpop.permute.xlu1 %2021 }
 0x8a9   : > { %v2114_v32 = vperm.slane %v2022_v42, %v2079_v16 }
 0x8ab   : > { %v2115_v29 = vsel %vm2081_vm11, %v2114_v32, %v2113_v39 }
 0x8b7   : > { %v2025_v23 = vpop.permute.xlu0 %2024 }
 0x8b8   : > { %v2116_v7 = vperm.slane %v2025_v23, %v2083_v4 }
 0x8ba   : > { %v2117_v45 = vsel %vm2085_vm6, %v2116_v7, %v2115_v29 }
 0x8bb   : > { %v2118_v51 = vrot.slane %v2117_v45, 7 }
 0x8bd   : > { %v2120_v1 = vsel %vm2119_vm13, %v2086_v38, %v2118_v51 }
 0x8be   : > { %2125 = vst.msk [vmem:[%s200_s15] sm:$0x3] %vm2123_vm1, %v2120_v1 }
 0x8bf   : > { %2394 = shalt.err (!%p2391_p5)
}
 0x8c0   : > { %2306 = dma.vmem_to_hbm [thread:$0]  (%p2509_p4), %s2140_s11, 32, %s2142_s18, %s2127_s19  }
 0x8c1 PF: > { %p2312_p6 = scmp.ge.s32.totalorder %s2445_s17, 2  ;;  %s2153_s4 = sand.u32 1, %s2425_s12  }
 0x8c2   : > { %s2154_s5 = scalar_lea.sflag [#allocation5], %s2153_s4 }
 0x8c3   : > { %p2309_p7 = pnand %p2312_p6, %p2516_p8 }
 0x8c5   : > { %p2310_p9 = pneg %p2309_p7 }
 0x8c7   : > { %2420 = dma.done.wait (%p2310_p9), %s2154_s5, 32  }
 0x8c8   : > { %2422 = vsyncadd (%p2310_p9), %s2154_s5, 4294967264  ;;  %s16_s17 = sadd.s32 1, %s2445_s17   ;;  %s4073_s12 = smov %s2429_s13 }
 0x8c9   : > { %p13_p10 = scmp.ge.s32.totalorder %s16_s17, 4   ;;  %s4074_s13 = smov %s2433_s14 }
 0x8ca   : > { %s4075_s14 = smov %s2522_s25  ;;  %s4076_s15 = smov %s2441_s16 }
 0x8cb   : > { %s4077_s16 = smov %s4079_s20  ;;  %15 = sbr.rel (!%p13_p10) target bundleno = 4 (0x4), region = 88 }
 0x8d0   :  { %2160 = vsyncpa [#allocation5], 1 }
 0x8d1   :  { %2162 = vsyncpa [#allocation5 + $0x1], 1 }

</bundles_post_ra>
